<compile_context>
chip_gen: v5e
topology: v5e:2x2
jax: 0.10.0
libtpu: 0.0.40
codegen_flags: <defaults>
</compile_context>

<pallas_src>
import functools

import jax
import jax.numpy as jnp
from jax.experimental import pallas as pl
from jax.experimental.pallas import tpu as pltpu

_NEG_BIG = -9e15


def _mm(a, w):
    """(B, M, K) @ (K, L) -> (B, M, L) as ONE weight-stationary 2-D MXU matmul.

    The (B, M, K) -> (B*M, K) collapse is layout-free because M == 8 (exactly
    one sublane tile); the weight is pushed into the MXU once and B*M LHS rows
    are streamed through it (instead of broadcasting the weight over B)."""
    b, m, k = a.shape
    out = jnp.dot(a.reshape(b * m, k), w, preferred_element_type=jnp.float32)
    return out.reshape(b, m, w.shape[-1])


# ---------------------------------------------------------------------------
# The single fused kernel
# ---------------------------------------------------------------------------

def _generator_kernel(*refs, alpha, num_layers, dil):
    # ---- unpack refs: inputs..., outputs..., scratch... ---------------------
    (x_ref, adj0_ref, adj1_ref, gcn_w_ref, gcn_b_ref,
     w_heads_ref, w_out_ref) = refs[:7]
    pos = 7
    gru_refs = []
    for _ in range(num_layers):
        gru_refs.append(refs[pos:pos + 5])
        pos += 5
    (w1f_ref, w1b_ref, b1_ref, w2_ref, b2_ref,
     wg_ref, wrf_ref, wrb_ref, wt_ref, bsum_ref) = refs[pos:pos + 10]
    pos += 10
    out_ref, gcn_out_ref, gat_out_ref = refs[pos:pos + 3]
    outf_scr, outb_scr = refs[pos + 3:pos + 5]

    T, N, _ = x_ref.shape
    heads = w_heads_ref.shape[0]
    U = w_heads_ref.shape[2] - 2
    Fo = w_out_ref.shape[2] - 2

    x = x_ref[...]
    adj0 = adj0_ref[...]                       # (N, N)
    adj_mask = adj1_ref[...] > 0.0             # (N, N) — broadcast by jnp.where
    ones_col = jnp.ones((T, N, 1), jnp.float32)

    # ---- GCN branch: relu(row_norm(adj0) @ (x @ W + b)) ---------------------
    # NOTE: bias added before aggregation == aggregate-then-bias only because
    # the normalized adjacency rows sum to 1 (self-loops in the driver).
    xw = _mm(x, gcn_w_ref[...]) + gcn_b_ref[...]
    deg = jnp.sum(adj0, axis=-1, keepdims=True)
    adj0n = adj0 * pl.reciprocal(jnp.maximum(deg, 1e-6), approx=True)
    adj0n_b = jnp.broadcast_to(adj0n, (T, N, N))   # tiny (8,8) adj; negligible
    gcn_out = jnp.maximum(
        jnp.einsum('tmn,tnk->tmk', adj0n_b, xw,
                   preferred_element_type=jnp.float32), 0.0)
    gcn_out_ref[...] = gcn_out

    def attention(h, a_src, a_dst):
        # Masked-softmax graph attention for all T at once.  The dst-score
        # sublane->lane broadcast is realized as a tiny rank-1 batched outer
        # product on the MXU (proven lowering at this shape).
        dst_b = jnp.einsum('tic,tjc->tij', ones_col, a_dst,
                           preferred_element_type=jnp.float32)  # e[t,i,j]=dst[t,j]
        e = a_src + dst_b                                        # (T, N, N)
        e = jnp.where(e > 0, e, alpha * e)                       # LeakyReLU
        e = jnp.where(adj_mask, e, _NEG_BIG)                     # mask broadcast
        e = e - jnp.max(e, axis=-1, keepdims=True)
        p = jnp.exp(e)
        attn = p * pl.reciprocal(jnp.sum(p, axis=-1, keepdims=True), approx=True)
        out = jnp.einsum('tij,tjf->tif', attn, h,
                         preferred_element_type=jnp.float32)
        # ELU; input clamped so the discarded branch never overflows.
        return jnp.where(out > 0, out, jnp.exp(jnp.minimum(out, 0.0)) - 1.0)

    # ---- GAT heads: fused projection per head (cols [:U]=W, U=src, U+1=dst).
    # The "concat heads @ W_out" of the output layer is a sum of per-head
    # matmuls (no in-kernel concat).
    w_heads = w_heads_ref[...]
    w_out = w_out_ref[...]
    proj2 = jnp.zeros((T, N, Fo + 2), jnp.float32)
    for hd in range(heads):
        ph = _mm(x, w_heads[hd])                                 # (T, N, U+2)
        head_out = attention(ph[..., :U], ph[..., U:U + 1], ph[..., U + 1:])
        proj2 = proj2 + _mm(head_out, w_out[hd])
    gat_out = attention(proj2[..., :Fo], proj2[..., Fo:Fo + 1],
                        proj2[..., Fo + 1:])

    # ---- gated fusion: g = sigmoid(gcn + gat); gat = g*gat + (1-g)*gcn ------
    g = jax.nn.sigmoid(gcn_out + gat_out)
    gat_fused = g * gat_out + (1.0 - g) * gcn_out
    gat_out_ref[...] = gat_fused

    # ---- bidirectional GRU (PyTorch gate convention, gates = [r | z | n]) ---
    H = gru_refs[0][1].shape[1]

    def gru_cell(h, gi_t, wh_d, bh_d):
        # ONE (H, 3H) hidden matmul per step; gates lane-sliced from (N, 3H).
        hh = jnp.dot(h, wh_d, preferred_element_type=jnp.float32) + bh_d
        r = jax.nn.sigmoid(gi_t[:, :H] + hh[:, :H])
        z = jax.nn.sigmoid(gi_t[:, H:2 * H] + hh[:, H:2 * H])
        n = jnp.tanh(gi_t[:, 2 * H:] + r * hh[:, 2 * H:])
        return (1.0 - z) * n + z * h

    out_f = out_b = None
    for l in range(num_layers):
        wi_ref, wh_ref, bi_ref, bh_ref, h0_ref = gru_refs[l]
        wi = wi_ref[...]     # (2, Din_l, 3H)
        wh = wh_ref[...]     # (2, H, 3H)
        bi = bi_ref[...]     # (2, 1, 3H)
        bh = bh_ref[...]     # (2, 1, 3H)
        # Hidden-independent input-gate contributions hoisted out of the
        # recurrence.  Layer > 0 input is [out_f | out_b]: split the weight
        # instead of concatenating the activations.
        if l == 0:
            gi = [_mm(gat_fused, wi[d]) + bi[d] for d in range(2)]
        else:
            gi = [_mm(out_f, wi[d][:H]) + _mm(out_b, wi[d][H:]) + bi[d]
                  for d in range(2)]
        h_f = h0_ref[0]
        h_b = h0_ref[1]
        # T is small & static: fully unrolled; fwd + bwd share one loop.
        for s in range(T):
            rv = T - 1 - s
            h_f = gru_cell(h_f, gi[0][s], wh[0], bh[0])
            outf_scr[s] = h_f
            h_b = gru_cell(h_b, gi[1][rv], wh[1], bh[1])
            outb_scr[rv] = h_b
        out_f = outf_scr[...]
        out_b = outb_scr[...]

    # ---- TCN: 2 dilated causal convs via static shifted-slice taps ----------
    K = w2_ref.shape[0]
    C = w2_ref.shape[2]
    w1f = w1f_ref[...]
    w1b = w1b_ref[...]
    w2 = w2_ref[...]

    def causal_conv(parts, cout):
        # parts: list of (x:(T,N,Cin), w:(K,Cin,cout)).  Causal left padding of
        # (K-1)*dil realized by prepending zero rows to each tap contribution.
        acc = None
        for j in range(K):
            shift = (K - 1 - j) * dil
            if shift >= T:
                continue
            contrib = None
            for xv, wv in parts:
                xs = xv if shift == 0 else xv[:T - shift]
                c = _mm(xs, wv[j])
                contrib = c if contrib is None else contrib + c
            if shift:
                contrib = jnp.concatenate(
                    [jnp.zeros((shift, N, cout), jnp.float32), contrib], axis=0)
            acc = contrib if acc is None else acc + contrib
        return acc

    h1 = jnp.maximum(causal_conv([(out_f, w1f), (out_b, w1b)], C)
                     + b1_ref[...], 0.0)
    h2 = jnp.maximum(causal_conv([(h1, w2)], C) + b2_ref[...], 0.0)

    # ---- fused output heads: graph + rnn + tcn projections in one sum -------
    out = _mm(gat_fused, wg_ref[...])
    out = out + _mm(out_f, wrf_ref[...])
    out = out + _mm(out_b, wrb_ref[...])
    out = out + _mm(h2, wt_ref[...])
    out_ref[...] = out + bsum_ref[...]


# ---------------------------------------------------------------------------
# One-time parameter re-layout (hoisted out of the jitted forward)
# ---------------------------------------------------------------------------

def prepare_params(params, *, rnn_units, num_layers):
    f32 = jnp.float32
    H = rnn_units
    Fo = params["gcn_W"].shape[1]
    U = params["gat_heads"][0]["W"].shape[1]
    heads = len(params["gat_heads"])

    # Per-head fused projection: cols [:U] = W_h, col U = W_h@a[:U] (src),
    # col U+1 = W_h@a[U:] (dst) — exact linear composition.
    w_heads = []
    for hp in params["gat_heads"]:
        W = hp["W"].astype(f32)                      # (Din, U)
        a = hp["a"].astype(f32)                      # (2U, 1)
        w_heads.append(jnp.concatenate([W, W @ a[:U], W @ a[U:]], axis=1))
    w_heads = jnp.stack(w_heads, 0)                  # (heads, Din, U+2)

    Wo = params["gat_out"]["W"].astype(f32)          # (heads*U, Fo)
    ao = params["gat_out"]["a"].astype(f32)          # (2Fo, 1)
    Wo_all = jnp.concatenate([Wo, Wo @ ao[:Fo], Wo @ ao[Fo:]], axis=1)
    w_out = jnp.stack([Wo_all[hd * U:(hd + 1) * U] for hd in range(heads)], 0)

    gru = []
    for l in range(num_layers):
        layer = params["gru"][l]
        Wi = jnp.stack([layer["w_ih_f"].astype(f32),
                        layer["w_ih_b"].astype(f32)], 0)          # (2, Din, 3H)
        Wh = jnp.stack([layer["w_hh_f"].astype(f32),
                        layer["w_hh_b"].astype(f32)], 0)          # (2, H, 3H)
        Bi = jnp.stack([layer["b_ih_f"].astype(f32),
                        layer["b_ih_b"].astype(f32)], 0)[:, None, :]
        Bh = jnp.stack([layer["b_hh_f"].astype(f32),
                        layer["b_hh_b"].astype(f32)], 0)[:, None, :]
        gru.append((Wi, Wh, Bi, Bh))

    w1 = params["tcn_w1"].astype(f32)                # (K, 2H, C)
    prep = dict(
        gcn_W=params["gcn_W"].astype(f32),
        gcn_b=params["gcn_b"].reshape(1, -1).astype(f32),
        w_heads=w_heads, w_out=w_out, gru=gru,
        w1f=w1[:, :H, :], w1b=w1[:, H:, :],
        b1=params["tcn_b1"].reshape(1, -1).astype(f32),
        w2=params["tcn_w2"].astype(f32),
        b2=params["tcn_b2"].reshape(1, -1).astype(f32),
        wg=params["lin_gra_W"].astype(f32),
        wrf=params["lin_rnn_W"][:H].astype(f32),
        wrb=params["lin_rnn_W"][H:].astype(f32),
        wt=params["tcn_wout"].astype(f32),
        bsum=(params["lin_gra_b"] + params["lin_rnn_b"]
              + params["tcn_bout"]).reshape(1, -1).astype(f32),
    )
    return prep


# ---------------------------------------------------------------------------
# Forward: one fused gridless pallas_call
# ---------------------------------------------------------------------------

def generator_forward(x, adj0, adj1, h0, prep, *, alpha, dilation, num_layers):
    f32 = jnp.float32
    T, N, _ = x.shape
    Fo = prep["gcn_W"].shape[1]
    P = prep["wg"].shape[1]
    H = prep["gru"][0][1].shape[1]

    args = [x.astype(f32), adj0.astype(f32), adj1.astype(f32),
            prep["gcn_W"], prep["gcn_b"], prep["w_heads"], prep["w_out"]]
    for l in range(num_layers):
        Wi, Wh, Bi, Bh = prep["gru"][l]
        args.extend([Wi, Wh, Bi, Bh, h0[2 * l:2 * l + 2].astype(f32)])
    args.extend([prep["w1f"], prep["w1b"], prep["b1"], prep["w2"], prep["b2"],
                 prep["wg"], prep["wrf"], prep["wrb"], prep["wt"],
                 prep["bsum"]])

    kernel = functools.partial(_generator_kernel, alpha=alpha,
                               num_layers=num_layers, dil=dilation)
    # Gridless, everything VMEM-resident (total footprint well under 1 MiB on
    # v5e/v6e/v7x); a grid would only add per-step overhead here.
    out, gcn_out, gat_out = pl.pallas_call(
        kernel,
        out_shape=(jax.ShapeDtypeStruct((T, N, P), f32),
                   jax.ShapeDtypeStruct((T, N, Fo), f32),
                   jax.ShapeDtypeStruct((T, N, Fo), f32)),
        scratch_shapes=[pltpu.VMEM((T, N, H), f32),   # GRU forward outputs
                        pltpu.VMEM((T, N, H), f32)],  # GRU backward outputs
    )(*args)

    return out[..., None], gcn_out, gat_out


# ---------------------------------------------------------------------------
# Deterministic parameter init
# ---------------------------------------------------------------------------

def init_params(key, *, input_dim, gat_units, gatOut_dim, gat_heads,
                predict_length, rnn_units, num_layers, tcn_units,
                kernel_size):
    keys = iter(jax.random.split(key, 128))

    def nrm(shape, scale=0.1):
        return scale * jax.random.normal(next(keys), shape, jnp.float32)

    params = {}
    params["gcn_W"] = nrm((input_dim, gatOut_dim))
    params["gcn_b"] = nrm((gatOut_dim,))

    params["gat_heads"] = [{"W": nrm((input_dim, gat_units)),
                            "a": nrm((2 * gat_units, 1))}
                           for _ in range(gat_heads)]
    params["gat_out"] = {"W": nrm((gat_heads * gat_units, gatOut_dim)),
                         "a": nrm((2 * gatOut_dim, 1))}

    gru = []
    in_dim = gatOut_dim
    for _ in range(num_layers):
        layer = {}
        for dr in ("f", "b"):
            layer["w_ih_" + dr] = nrm((in_dim, 3 * rnn_units))
            layer["w_hh_" + dr] = nrm((rnn_units, 3 * rnn_units))
            layer["b_ih_" + dr] = nrm((3 * rnn_units,))
            layer["b_hh_" + dr] = nrm((3 * rnn_units,))
        gru.append(layer)
        in_dim = 2 * rnn_units
    params["gru"] = gru

    params["lin_gra_W"] = nrm((gatOut_dim, predict_length))
    params["lin_gra_b"] = nrm((predict_length,))
    params["lin_rnn_W"] = nrm((2 * rnn_units, predict_length))
    params["lin_rnn_b"] = nrm((predict_length,))

    params["tcn_w1"] = nrm((kernel_size, 2 * rnn_units, tcn_units))
    params["tcn_b1"] = nrm((tcn_units,))
    params["tcn_w2"] = nrm((kernel_size, tcn_units, tcn_units))
    params["tcn_b2"] = nrm((tcn_units,))
    params["tcn_wout"] = nrm((tcn_units, predict_length))
    params["tcn_bout"] = nrm((predict_length,))
    return params


# ---------------------------------------------------------------------------
# Main
# ---------------------------------------------------------------------------

if __name__ == "__main__":
    T, N = 8, 8                       # seq_len, node_nums
    input_dim, gat_units, gatOut_dim, gat_heads = 4, 8, 16, 2
    predict_length, rnn_units, num_layers = 4, 16, 1
    alpha, tcn_units, d, kernel_size = 0.2, 16, 2, 3

    key = jax.random.PRNGKey(0)
    k_x, k_a0, k_a1, k_h0, k_p = jax.random.split(key, 5)

    x = jax.random.normal(k_x, (T, N, input_dim), jnp.float32)
    adj0 = (jax.random.uniform(k_a0, (N, N)) > 0.5).astype(jnp.float32)
    adj0 = jnp.minimum(adj0 + jnp.eye(N, dtype=jnp.float32), 1.0)
    adj1 = (jax.random.uniform(k_a1, (N, N)) > 0.5).astype(jnp.float32)
    adj1 = jnp.minimum(adj1 + jnp.eye(N, dtype=jnp.float32), 1.0)

    params = init_params(
        k_p, input_dim=input_dim, gat_units=gat_units, gatOut_dim=gatOut_dim,
        gat_heads=gat_heads, predict_length=predict_length,
        rnn_units=rnn_units, num_layers=num_layers, tcn_units=tcn_units,
        kernel_size=kernel_size)

    # One-time parameter re-layout (kept out of the jitted per-call forward).
    prep = prepare_params(params, rnn_units=rnn_units, num_layers=num_layers)

    # torch.randn(...) initial hidden -> deterministic jax.random equivalent
    # TODO(synk): the original draws a fresh h0 inside forward(); here it is an
    # explicit deterministic input.
    h0 = jax.random.normal(k_h0, (num_layers * 2, N, rnn_units), jnp.float32)

    fwd = jax.jit(functools.partial(
        generator_forward, alpha=alpha, dilation=d, num_layers=num_layers))

    out, gcn_out, gat_out = fwd(x, adj0, adj1, h0, prep)

    jax.block_until_ready((out, gcn_out, gat_out))
    assert out.shape == (T, N, predict_length, 1)
    assert gcn_out.shape == (T, N, gatOut_dim)
    assert gat_out.shape == (T, N, gatOut_dim)
    print("KERNEL_OK")
</pallas_src>

<mosaic_0001>
module attributes {stable_mosaic.version = 11 : i64} {
  func.func @_generator_kernel(%arg0: memref<8x8x4xf32, #tpu.memory_space<vmem>>, %arg1: memref<8x8xf32, #tpu.memory_space<vmem>>, %arg2: memref<8x8xf32, #tpu.memory_space<vmem>>, %arg3: memref<4x16xf32, #tpu.memory_space<vmem>>, %arg4: memref<1x16xf32, #tpu.memory_space<vmem>>, %arg5: memref<2x4x10xf32, #tpu.memory_space<vmem>>, %arg6: memref<2x8x18xf32, #tpu.memory_space<vmem>>, %arg7: memref<2x16x48xf32, #tpu.memory_space<vmem>>, %arg8: memref<2x16x48xf32, #tpu.memory_space<vmem>>, %arg9: memref<2x1x48xf32, #tpu.memory_space<vmem>>, %arg10: memref<2x1x48xf32, #tpu.memory_space<vmem>>, %arg11: memref<2x8x16xf32, #tpu.memory_space<vmem>>, %arg12: memref<3x16x16xf32, #tpu.memory_space<vmem>>, %arg13: memref<3x16x16xf32, #tpu.memory_space<vmem>>, %arg14: memref<1x16xf32, #tpu.memory_space<vmem>>, %arg15: memref<3x16x16xf32, #tpu.memory_space<vmem>>, %arg16: memref<1x16xf32, #tpu.memory_space<vmem>>, %arg17: memref<16x4xf32, #tpu.memory_space<vmem>>, %arg18: memref<16x4xf32, #tpu.memory_space<vmem>>, %arg19: memref<16x4xf32, #tpu.memory_space<vmem>>, %arg20: memref<16x4xf32, #tpu.memory_space<vmem>>, %arg21: memref<1x4xf32, #tpu.memory_space<vmem>>, %arg22: memref<8x8x4xf32, #tpu.memory_space<vmem>>, %arg23: memref<8x8x16xf32, #tpu.memory_space<vmem>>, %arg24: memref<8x8x16xf32, #tpu.memory_space<vmem>>, %arg25: memref<8x8x16xf32, #tpu.memory_space<vmem>>, %arg26: memref<8x8x16xf32, #tpu.memory_space<vmem>>) attributes {dimension_semantics = [], scalar_prefetch = 0 : i64, scratch_operands = 2 : i64, tpu.core_type = #tpu.core_type<tc>} {
    %c0 = arith.constant 0 : index
    %c0_0 = arith.constant 0 : index
    %c0_1 = arith.constant 0 : index
    %0 = vector.load %arg0[%c0, %c0_0, %c0_1] : memref<8x8x4xf32, #tpu.memory_space<vmem>>, vector<8x8x4xf32>
    %c0_2 = arith.constant 0 : index
    %c0_3 = arith.constant 0 : index
    %1 = vector.load %arg1[%c0_2, %c0_3] : memref<8x8xf32, #tpu.memory_space<vmem>>, vector<8x8xf32>
    %c0_4 = arith.constant 0 : index
    %c0_5 = arith.constant 0 : index
    %2 = vector.load %arg2[%c0_4, %c0_5] : memref<8x8xf32, #tpu.memory_space<vmem>>, vector<8x8xf32>
    %cst = arith.constant 0.000000e+00 : f32
    %3 = vector.broadcast %cst : f32 to vector<8x8xf32>
    %4 = arith.cmpf ogt, %2, %3 : vector<8x8xf32>
    %cst_6 = arith.constant 1.000000e+00 : f32
    %5 = vector.broadcast %cst_6 : f32 to vector<8x8x1xf32>
    %c0_7 = arith.constant 0 : index
    %c0_8 = arith.constant 0 : index
    %6 = vector.load %arg3[%c0_7, %c0_8] : memref<4x16xf32, #tpu.memory_space<vmem>>, vector<4x16xf32>
    %7 = vector.shape_cast %0 : vector<8x8x4xf32> to vector<64x4xf32>
    %cst_9 = arith.constant dense<0.000000e+00> : vector<64x16xf32>
    %8 = tpu.matmul %7, %6, %cst_9 {dimension_numbers = #tpu.dot_dimension_numbers<[1], [0], [0], [1], [0, 0, 1, 1], [], []>} : vector<64x4xf32>, vector<4x16xf32>, vector<64x16xf32> -> vector<64x16xf32>
    %9 = vector.shape_cast %8 : vector<64x16xf32> to vector<8x8x16xf32>
    %c0_10 = arith.constant 0 : index
    %c0_11 = arith.constant 0 : index
    %10 = vector.load %arg4[%c0_10, %c0_11] : memref<1x16xf32, #tpu.memory_space<vmem>>, vector<1x16xf32>
    %11 = vector.shape_cast %10 : vector<1x16xf32> to vector<1x1x16xf32>
    %12 = vector.broadcast %11 : vector<1x1x16xf32> to vector<8x8x16xf32>
    %13 = arith.addf %9, %12 : vector<8x8x16xf32>
    %cst_12 = arith.constant dense<0.000000e+00> : vector<8xf32>
    %14 = vector.multi_reduction <add>, %1, %cst_12 [1] : vector<8x8xf32> to vector<8xf32>
    %15 = vector.shape_cast %14 : vector<8xf32> to vector<8x1xf32>
    %cst_13 = arith.constant 9.99999997E-7 : f32
    %16 = vector.broadcast %cst_13 : f32 to vector<8x1xf32>
    %17 = arith.maximumf %15, %16 : vector<8x1xf32>
    %18 = tpu.reciprocal %17 {approx = true} : vector<8x1xf32> -> vector<8x1xf32>
    %19 = vector.broadcast %18 : vector<8x1xf32> to vector<8x8xf32>
    %20 = arith.mulf %1, %19 : vector<8x8xf32>
    %21 = vector.shape_cast %20 : vector<8x8xf32> to vector<1x8x8xf32>
    %22 = vector.broadcast %21 : vector<1x8x8xf32> to vector<8x8x8xf32>
    "tpu.trace_start"() <{level = 10 : i32, message = "tmn,tnk->tmk"}> : () -> ()
    %cst_14 = arith.constant dense<0.000000e+00> : vector<8x8x16xf32>
    %23 = tpu.matmul %22, %13, %cst_14 {dimension_numbers = #tpu.dot_dimension_numbers<[2], [1], [1], [2], [0, 0, 0, 1, 1, 2], [0], [0]>} : vector<8x8x8xf32>, vector<8x8x16xf32>, vector<8x8x16xf32> -> vector<8x8x16xf32>
    "tpu.trace_stop"() : () -> ()
    %cst_15 = arith.constant 0.000000e+00 : f32
    %24 = vector.broadcast %cst_15 : f32 to vector<8x8x16xf32>
    %25 = arith.maximumf %23, %24 : vector<8x8x16xf32>
    %c0_16 = arith.constant 0 : index
    %c0_17 = arith.constant 0 : index
    %c0_18 = arith.constant 0 : index
    %26 = vector.load %arg23[%c0_16, %c0_17, %c0_18] : memref<8x8x16xf32, #tpu.memory_space<vmem>>, vector<8x8x16xf32>
    tpu.vector_store %arg23[%c0_16, %c0_17, %c0_18], %25 {strides = array<i32>} : memref<8x8x16xf32, #tpu.memory_space<vmem>>, vector<8x8x16xf32>,
    %c0_19 = arith.constant 0 : index
    %c0_20 = arith.constant 0 : index
    %c0_21 = arith.constant 0 : index
    %27 = vector.load %arg5[%c0_19, %c0_20, %c0_21] : memref<2x4x10xf32, #tpu.memory_space<vmem>>, vector<2x4x10xf32>
    %c0_22 = arith.constant 0 : index
    %c0_23 = arith.constant 0 : index
    %c0_24 = arith.constant 0 : index
    %28 = vector.load %arg6[%c0_22, %c0_23, %c0_24] : memref<2x8x18xf32, #tpu.memory_space<vmem>>, vector<2x8x18xf32>
    %cst_25 = arith.constant 0.000000e+00 : f32
    %29 = vector.broadcast %cst_25 : f32 to vector<8x8x18xf32>
    %30 = vector.extract_strided_slice %27 {offsets = [0, 0, 0], sizes = [1, 4, 10], strides = [1, 1, 1]} : vector<2x4x10xf32> to vector<1x4x10xf32>
    %31 = vector.shape_cast %30 : vector<1x4x10xf32> to vector<4x10xf32>
    %32 = vector.shape_cast %0 : vector<8x8x4xf32> to vector<64x4xf32>
    %cst_26 = arith.constant dense<0.000000e+00> : vector<64x10xf32>
    %33 = tpu.matmul %32, %31, %cst_26 {dimension_numbers = #tpu.dot_dimension_numbers<[1], [0], [0], [1], [0, 0, 1, 1], [], []>} : vector<64x4xf32>, vector<4x10xf32>, vector<64x10xf32> -> vector<64x10xf32>
    %34 = vector.shape_cast %33 : vector<64x10xf32> to vector<8x8x10xf32>
    %35 = vector.extract_strided_slice %34 {offsets = [0, 0, 0], sizes = [8, 8, 8], strides = [1, 1, 1]} : vector<8x8x10xf32> to vector<8x8x8xf32>
    %36 = vector.extract_strided_slice %34 {offsets = [0, 0, 8], sizes = [8, 8, 1], strides = [1, 1, 1]} : vector<8x8x10xf32> to vector<8x8x1xf32>
    %37 = vector.extract_strided_slice %34 {offsets = [0, 0, 9], sizes = [8, 8, 1], strides = [1, 1, 1]} : vector<8x8x10xf32> to vector<8x8x1xf32>
    "tpu.trace_start"() <{level = 10 : i32, message = "tic,tjc->tij"}> : () -> ()
    %cst_27 = arith.constant dense<0.000000e+00> : vector<8x8x8xf32>
    %38 = tpu.matmul %5, %37, %cst_27 {dimension_numbers = #tpu.dot_dimension_numbers<[2], [2], [1], [1], [0, 0, 0, 1, 1, 1], [0], [0]>} : vector<8x8x1xf32>, vector<8x8x1xf32>, vector<8x8x8xf32> -> vector<8x8x8xf32>
    "tpu.trace_stop"() : () -> ()
    %39 = vector.broadcast %36 : vector<8x8x1xf32> to vector<8x8x8xf32>
    %40 = arith.addf %39, %38 : vector<8x8x8xf32>
    %cst_28 = arith.constant 0.000000e+00 : f32
    %41 = vector.broadcast %cst_28 : f32 to vector<8x8x8xf32>
    %42 = arith.cmpf ogt, %40, %41 : vector<8x8x8xf32>
    %cst_29 = arith.constant 2.000000e-01 : f32
    %43 = vector.broadcast %cst_29 : f32 to vector<8x8x8xf32>
    %44 = arith.mulf %43, %40 : vector<8x8x8xf32>
    %45 = arith.select %42, %40, %44 : vector<8x8x8xi1>, vector<8x8x8xf32>
    %cst_30 = arith.constant -9.000000e+15 : f32
    %46 = vector.shape_cast %4 : vector<8x8xi1> to vector<1x8x8xi1>
    %47 = vector.broadcast %46 : vector<1x8x8xi1> to vector<8x8x8xi1>
    %48 = vector.broadcast %cst_30 : f32 to vector<8x8x8xf32>
    %49 = arith.select %47, %45, %48 : vector<8x8x8xi1>, vector<8x8x8xf32>
    %cst_31 = arith.constant dense<0xFF800000> : vector<8x8xf32>
    %50 = vector.multi_reduction <maximumf>, %49, %cst_31 [2] : vector<8x8x8xf32> to vector<8x8xf32>
    %51 = vector.shape_cast %50 : vector<8x8xf32> to vector<8x8x1xf32>
    %52 = vector.broadcast %51 : vector<8x8x1xf32> to vector<8x8x8xf32>
    %53 = arith.subf %49, %52 : vector<8x8x8xf32>
    %54 = math.exp %53 : vector<8x8x8xf32>
    %cst_32 = arith.constant dense<0.000000e+00> : vector<8x8xf32>
    %55 = vector.multi_reduction <add>, %54, %cst_32 [2] : vector<8x8x8xf32> to vector<8x8xf32>
    %56 = vector.shape_cast %55 : vector<8x8xf32> to vector<8x8x1xf32>
    %57 = tpu.reciprocal %56 {approx = true} : vector<8x8x1xf32> -> vector<8x8x1xf32>
    %58 = vector.broadcast %57 : vector<8x8x1xf32> to vector<8x8x8xf32>
    %59 = arith.mulf %54, %58 : vector<8x8x8xf32>
    "tpu.trace_start"() <{level = 10 : i32, message = "tij,tjf->tif"}> : () -> ()
    %cst_33 = arith.constant dense<0.000000e+00> : vector<8x8x8xf32>
    %60 = tpu.matmul %59, %35, %cst_33 {dimension_numbers = #tpu.dot_dimension_numbers<[2], [1], [1], [2], [0, 0, 0, 1, 1, 2], [0], [0]>} : vector<8x8x8xf32>, vector<8x8x8xf32>, vector<8x8x8xf32> -> vector<8x8x8xf32>
    %cst_34 = arith.constant 0.000000e+00 : f32
    "tpu.trace_stop"() : () -> ()
    %61 = vector.broadcast %cst_34 : f32 to vector<8x8x8xf32>
    %62 = arith.cmpf ogt, %60, %61 : vector<8x8x8xf32>
    %cst_35 = arith.constant 0.000000e+00 : f32
    %63 = vector.broadcast %cst_35 : f32 to vector<8x8x8xf32>
    %64 = arith.minimumf %60, %63 : vector<8x8x8xf32>
    %65 = math.exp %64 : vector<8x8x8xf32>
    %cst_36 = arith.constant 1.000000e+00 : f32
    %66 = vector.broadcast %cst_36 : f32 to vector<8x8x8xf32>
    %67 = arith.subf %65, %66 : vector<8x8x8xf32>
    %68 = arith.select %62, %60, %67 : vector<8x8x8xi1>, vector<8x8x8xf32>
    %69 = vector.extract_strided_slice %28 {offsets = [0, 0, 0], sizes = [1, 8, 18], strides = [1, 1, 1]} : vector<2x8x18xf32> to vector<1x8x18xf32>
    %70 = vector.shape_cast %69 : vector<1x8x18xf32> to vector<8x18xf32>
    %71 = vector.shape_cast %68 : vector<8x8x8xf32> to vector<64x8xf32>
    %cst_37 = arith.constant dense<0.000000e+00> : vector<64x18xf32>
    %72 = tpu.matmul %71, %70, %cst_37 {dimension_numbers = #tpu.dot_dimension_numbers<[1], [0], [0], [1], [0, 0, 1, 1], [], []>} : vector<64x8xf32>, vector<8x18xf32>, vector<64x18xf32> -> vector<64x18xf32>
    %73 = vector.shape_cast %72 : vector<64x18xf32> to vector<8x8x18xf32>
    %74 = arith.addf %29, %73 : vector<8x8x18xf32>
    %75 = vector.extract_strided_slice %27 {offsets = [1, 0, 0], sizes = [1, 4, 10], strides = [1, 1, 1]} : vector<2x4x10xf32> to vector<1x4x10xf32>
    %76 = vector.shape_cast %75 : vector<1x4x10xf32> to vector<4x10xf32>
    %77 = vector.shape_cast %0 : vector<8x8x4xf32> to vector<64x4xf32>
    %cst_38 = arith.constant dense<0.000000e+00> : vector<64x10xf32>
    %78 = tpu.matmul %77, %76, %cst_38 {dimension_numbers = #tpu.dot_dimension_numbers<[1], [0], [0], [1], [0, 0, 1, 1], [], []>} : vector<64x4xf32>, vector<4x10xf32>, vector<64x10xf32> -> vector<64x10xf32>
    %79 = vector.shape_cast %78 : vector<64x10xf32> to vector<8x8x10xf32>
    %80 = vector.extract_strided_slice %79 {offsets = [0, 0, 0], sizes = [8, 8, 8], strides = [1, 1, 1]} : vector<8x8x10xf32> to vector<8x8x8xf32>
    %81 = vector.extract_strided_slice %79 {offsets = [0, 0, 8], sizes = [8, 8, 1], strides = [1, 1, 1]} : vector<8x8x10xf32> to vector<8x8x1xf32>
    %82 = vector.extract_strided_slice %79 {offsets = [0, 0, 9], sizes = [8, 8, 1], strides = [1, 1, 1]} : vector<8x8x10xf32> to vector<8x8x1xf32>
    "tpu.trace_start"() <{level = 10 : i32, message = "tic,tjc->tij"}> : () -> ()
    %cst_39 = arith.constant dense<0.000000e+00> : vector<8x8x8xf32>
    %83 = tpu.matmul %5, %82, %cst_39 {dimension_numbers = #tpu.dot_dimension_numbers<[2], [2], [1], [1], [0, 0, 0, 1, 1, 1], [0], [0]>} : vector<8x8x1xf32>, vector<8x8x1xf32>, vector<8x8x8xf32> -> vector<8x8x8xf32>
    "tpu.trace_stop"() : () -> ()
    %84 = vector.broadcast %81 : vector<8x8x1xf32> to vector<8x8x8xf32>
    %85 = arith.addf %84, %83 : vector<8x8x8xf32>
    %cst_40 = arith.constant 0.000000e+00 : f32
    %86 = vector.broadcast %cst_40 : f32 to vector<8x8x8xf32>
    %87 = arith.cmpf ogt, %85, %86 : vector<8x8x8xf32>
    %cst_41 = arith.constant 2.000000e-01 : f32
    %88 = vector.broadcast %cst_41 : f32 to vector<8x8x8xf32>
    %89 = arith.mulf %88, %85 : vector<8x8x8xf32>
    %90 = arith.select %87, %85, %89 : vector<8x8x8xi1>, vector<8x8x8xf32>
    %cst_42 = arith.constant -9.000000e+15 : f32
    %91 = vector.shape_cast %4 : vector<8x8xi1> to vector<1x8x8xi1>
    %92 = vector.broadcast %91 : vector<1x8x8xi1> to vector<8x8x8xi1>
    %93 = vector.broadcast %cst_42 : f32 to vector<8x8x8xf32>
    %94 = arith.select %92, %90, %93 : vector<8x8x8xi1>, vector<8x8x8xf32>
    %cst_43 = arith.constant dense<0xFF800000> : vector<8x8xf32>
    %95 = vector.multi_reduction <maximumf>, %94, %cst_43 [2] : vector<8x8x8xf32> to vector<8x8xf32>
    %96 = vector.shape_cast %95 : vector<8x8xf32> to vector<8x8x1xf32>
    %97 = vector.broadcast %96 : vector<8x8x1xf32> to vector<8x8x8xf32>
    %98 = arith.subf %94, %97 : vector<8x8x8xf32>
    %99 = math.exp %98 : vector<8x8x8xf32>
    %cst_44 = arith.constant dense<0.000000e+00> : vector<8x8xf32>
    %100 = vector.multi_reduction <add>, %99, %cst_44 [2] : vector<8x8x8xf32> to vector<8x8xf32>
    %101 = vector.shape_cast %100 : vector<8x8xf32> to vector<8x8x1xf32>
    %102 = tpu.reciprocal %101 {approx = true} : vector<8x8x1xf32> -> vector<8x8x1xf32>
    %103 = vector.broadcast %102 : vector<8x8x1xf32> to vector<8x8x8xf32>
    %104 = arith.mulf %99, %103 : vector<8x8x8xf32>
    "tpu.trace_start"() <{level = 10 : i32, message = "tij,tjf->tif"}> : () -> ()
    %cst_45 = arith.constant dense<0.000000e+00> : vector<8x8x8xf32>
    %105 = tpu.matmul %104, %80, %cst_45 {dimension_numbers = #tpu.dot_dimension_numbers<[2], [1], [1], [2], [0, 0, 0, 1, 1, 2], [0], [0]>} : vector<8x8x8xf32>, vector<8x8x8xf32>, vector<8x8x8xf32> -> vector<8x8x8xf32>
    %cst_46 = arith.constant 0.000000e+00 : f32
    "tpu.trace_stop"() : () -> ()
    %106 = vector.broadcast %cst_46 : f32 to vector<8x8x8xf32>
    %107 = arith.cmpf ogt, %105, %106 : vector<8x8x8xf32>
    %cst_47 = arith.constant 0.000000e+00 : f32
    %108 = vector.broadcast %cst_47 : f32 to vector<8x8x8xf32>
    %109 = arith.minimumf %105, %108 : vector<8x8x8xf32>
    %110 = math.exp %109 : vector<8x8x8xf32>
    %cst_48 = arith.constant 1.000000e+00 : f32
    %111 = vector.broadcast %cst_48 : f32 to vector<8x8x8xf32>
    %112 = arith.subf %110, %111 : vector<8x8x8xf32>
    %113 = arith.select %107, %105, %112 : vector<8x8x8xi1>, vector<8x8x8xf32>
    %114 = vector.extract_strided_slice %28 {offsets = [1, 0, 0], sizes = [1, 8, 18], strides = [1, 1, 1]} : vector<2x8x18xf32> to vector<1x8x18xf32>
    %115 = vector.shape_cast %114 : vector<1x8x18xf32> to vector<8x18xf32>
    %116 = vector.shape_cast %113 : vector<8x8x8xf32> to vector<64x8xf32>
    %cst_49 = arith.constant dense<0.000000e+00> : vector<64x18xf32>
    %117 = tpu.matmul %116, %115, %cst_49 {dimension_numbers = #tpu.dot_dimension_numbers<[1], [0], [0], [1], [0, 0, 1, 1], [], []>} : vector<64x8xf32>, vector<8x18xf32>, vector<64x18xf32> -> vector<64x18xf32>
    %118 = vector.shape_cast %117 : vector<64x18xf32> to vector<8x8x18xf32>
    %119 = arith.addf %74, %118 : vector<8x8x18xf32>
    %120 = vector.extract_strided_slice %119 {offsets = [0, 0, 0], sizes = [8, 8, 16], strides = [1, 1, 1]} : vector<8x8x18xf32> to vector<8x8x16xf32>
    %121 = vector.extract_strided_slice %119 {offsets = [0, 0, 16], sizes = [8, 8, 1], strides = [1, 1, 1]} : vector<8x8x18xf32> to vector<8x8x1xf32>
    %122 = vector.extract_strided_slice %119 {offsets = [0, 0, 17], sizes = [8, 8, 1], strides = [1, 1, 1]} : vector<8x8x18xf32> to vector<8x8x1xf32>
    "tpu.trace_start"() <{level = 10 : i32, message = "tic,tjc->tij"}> : () -> ()
    %cst_50 = arith.constant dense<0.000000e+00> : vector<8x8x8xf32>
    %123 = tpu.matmul %5, %122, %cst_50 {dimension_numbers = #tpu.dot_dimension_numbers<[2], [2], [1], [1], [0, 0, 0, 1, 1, 1], [0], [0]>} : vector<8x8x1xf32>, vector<8x8x1xf32>, vector<8x8x8xf32> -> vector<8x8x8xf32>
    "tpu.trace_stop"() : () -> ()
    %124 = vector.broadcast %121 : vector<8x8x1xf32> to vector<8x8x8xf32>
    %125 = arith.addf %124, %123 : vector<8x8x8xf32>
    %cst_51 = arith.constant 0.000000e+00 : f32
    %126 = vector.broadcast %cst_51 : f32 to vector<8x8x8xf32>
    %127 = arith.cmpf ogt, %125, %126 : vector<8x8x8xf32>
    %cst_52 = arith.constant 2.000000e-01 : f32
    %128 = vector.broadcast %cst_52 : f32 to vector<8x8x8xf32>
    %129 = arith.mulf %128, %125 : vector<8x8x8xf32>
    %130 = arith.select %127, %125, %129 : vector<8x8x8xi1>, vector<8x8x8xf32>
    %cst_53 = arith.constant -9.000000e+15 : f32
    %131 = vector.shape_cast %4 : vector<8x8xi1> to vector<1x8x8xi1>
    %132 = vector.broadcast %131 : vector<1x8x8xi1> to vector<8x8x8xi1>
    %133 = vector.broadcast %cst_53 : f32 to vector<8x8x8xf32>
    %134 = arith.select %132, %130, %133 : vector<8x8x8xi1>, vector<8x8x8xf32>
    %cst_54 = arith.constant dense<0xFF800000> : vector<8x8xf32>
    %135 = vector.multi_reduction <maximumf>, %134, %cst_54 [2] : vector<8x8x8xf32> to vector<8x8xf32>
    %136 = vector.shape_cast %135 : vector<8x8xf32> to vector<8x8x1xf32>
    %137 = vector.broadcast %136 : vector<8x8x1xf32> to vector<8x8x8xf32>
    %138 = arith.subf %134, %137 : vector<8x8x8xf32>
    %139 = math.exp %138 : vector<8x8x8xf32>
    %cst_55 = arith.constant dense<0.000000e+00> : vector<8x8xf32>
    %140 = vector.multi_reduction <add>, %139, %cst_55 [2] : vector<8x8x8xf32> to vector<8x8xf32>
    %141 = vector.shape_cast %140 : vector<8x8xf32> to vector<8x8x1xf32>
    %142 = tpu.reciprocal %141 {approx = true} : vector<8x8x1xf32> -> vector<8x8x1xf32>
    %143 = vector.broadcast %142 : vector<8x8x1xf32> to vector<8x8x8xf32>
    %144 = arith.mulf %139, %143 : vector<8x8x8xf32>
    "tpu.trace_start"() <{level = 10 : i32, message = "tij,tjf->tif"}> : () -> ()
    %cst_56 = arith.constant dense<0.000000e+00> : vector<8x8x16xf32>
    %145 = tpu.matmul %144, %120, %cst_56 {dimension_numbers = #tpu.dot_dimension_numbers<[2], [1], [1], [2], [0, 0, 0, 1, 1, 2], [0], [0]>} : vector<8x8x8xf32>, vector<8x8x16xf32>, vector<8x8x16xf32> -> vector<8x8x16xf32>
    %cst_57 = arith.constant 0.000000e+00 : f32
    "tpu.trace_stop"() : () -> ()
    %146 = vector.broadcast %cst_57 : f32 to vector<8x8x16xf32>
    %147 = arith.cmpf ogt, %145, %146 : vector<8x8x16xf32>
    %cst_58 = arith.constant 0.000000e+00 : f32
    %148 = vector.broadcast %cst_58 : f32 to vector<8x8x16xf32>
    %149 = arith.minimumf %145, %148 : vector<8x8x16xf32>
    %150 = math.exp %149 : vector<8x8x16xf32>
    %cst_59 = arith.constant 1.000000e+00 : f32
    %151 = vector.broadcast %cst_59 : f32 to vector<8x8x16xf32>
    %152 = arith.subf %150, %151 : vector<8x8x16xf32>
    %153 = arith.select %147, %145, %152 : vector<8x8x16xi1>, vector<8x8x16xf32>
    %154 = arith.addf %25, %153 : vector<8x8x16xf32>
    %155 = arith.negf %154 : vector<8x8x16xf32>
    %156 = math.exp %155 : vector<8x8x16xf32>
    %cst_60 = arith.constant 1.000000e+00 : f32
    %157 = vector.broadcast %cst_60 : f32 to vector<8x8x16xf32>
    %158 = arith.addf %157, %156 : vector<8x8x16xf32>
    %159 = arith.divf %157, %158 : vector<8x8x16xf32>
    %160 = arith.mulf %159, %153 : vector<8x8x16xf32>
    %cst_61 = arith.constant 1.000000e+00 : f32
    %161 = vector.broadcast %cst_61 : f32 to vector<8x8x16xf32>
    %162 = arith.subf %161, %159 : vector<8x8x16xf32>
    %163 = arith.mulf %162, %25 : vector<8x8x16xf32>
    %164 = arith.addf %160, %163 : vector<8x8x16xf32>
    %c0_62 = arith.constant 0 : index
    %c0_63 = arith.constant 0 : index
    %c0_64 = arith.constant 0 : index
    %165 = vector.load %arg24[%c0_62, %c0_63, %c0_64] : memref<8x8x16xf32, #tpu.memory_space<vmem>>, vector<8x8x16xf32>
    tpu.vector_store %arg24[%c0_62, %c0_63, %c0_64], %164 {strides = array<i32>} : memref<8x8x16xf32, #tpu.memory_space<vmem>>, vector<8x8x16xf32>,
    %c0_65 = arith.constant 0 : index
    %c0_66 = arith.constant 0 : index
    %c0_67 = arith.constant 0 : index
    %166 = vector.load %arg7[%c0_65, %c0_66, %c0_67] : memref<2x16x48xf32, #tpu.memory_space<vmem>>, vector<2x16x48xf32>
    %c0_68 = arith.constant 0 : index
    %c0_69 = arith.constant 0 : index
    %c0_70 = arith.constant 0 : index
    %167 = vector.load %arg8[%c0_68, %c0_69, %c0_70] : memref<2x16x48xf32, #tpu.memory_space<vmem>>, vector<2x16x48xf32>
    %c0_71 = arith.constant 0 : index
    %c0_72 = arith.constant 0 : index
    %c0_73 = arith.constant 0 : index
    %168 = vector.load %arg9[%c0_71, %c0_72, %c0_73] : memref<2x1x48xf32, #tpu.memory_space<vmem>>, vector<2x1x48xf32>
    %c0_74 = arith.constant 0 : index
    %c0_75 = arith.constant 0 : index
    %c0_76 = arith.constant 0 : index
    %169 = vector.load %arg10[%c0_74, %c0_75, %c0_76] : memref<2x1x48xf32, #tpu.memory_space<vmem>>, vector<2x1x48xf32>
    %170 = vector.extract_strided_slice %166 {offsets = [0, 0, 0], sizes = [1, 16, 48], strides = [1, 1, 1]} : vector<2x16x48xf32> to vector<1x16x48xf32>
    %171 = vector.shape_cast %170 : vector<1x16x48xf32> to vector<16x48xf32>
    %172 = vector.shape_cast %164 : vector<8x8x16xf32> to vector<64x16xf32>
    %cst_77 = arith.constant dense<0.000000e+00> : vector<64x48xf32>
    %173 = tpu.matmul %172, %171, %cst_77 {dimension_numbers = #tpu.dot_dimension_numbers<[1], [0], [0], [1], [0, 0, 1, 1], [], []>} : vector<64x16xf32>, vector<16x48xf32>, vector<64x48xf32> -> vector<64x48xf32>
    %174 = vector.shape_cast %173 : vector<64x48xf32> to vector<8x8x48xf32>
    %175 = vector.extract_strided_slice %168 {offsets = [0, 0, 0], sizes = [1, 1, 48], strides = [1, 1, 1]} : vector<2x1x48xf32> to vector<1x1x48xf32>
    %176 = vector.shape_cast %175 : vector<1x1x48xf32> to vector<1x48xf32>
    %177 = vector.shape_cast %176 : vector<1x48xf32> to vector<1x1x48xf32>
    %178 = vector.broadcast %177 : vector<1x1x48xf32> to vector<8x8x48xf32>
    %179 = arith.addf %174, %178 : vector<8x8x48xf32>
    %180 = vector.extract_strided_slice %166 {offsets = [1, 0, 0], sizes = [1, 16, 48], strides = [1, 1, 1]} : vector<2x16x48xf32> to vector<1x16x48xf32>
    %181 = vector.shape_cast %180 : vector<1x16x48xf32> to vector<16x48xf32>
    %182 = vector.shape_cast %164 : vector<8x8x16xf32> to vector<64x16xf32>
    %cst_78 = arith.constant dense<0.000000e+00> : vector<64x48xf32>
    %183 = tpu.matmul %182, %181, %cst_78 {dimension_numbers = #tpu.dot_dimension_numbers<[1], [0], [0], [1], [0, 0, 1, 1], [], []>} : vector<64x16xf32>, vector<16x48xf32>, vector<64x48xf32> -> vector<64x48xf32>
    %184 = vector.shape_cast %183 : vector<64x48xf32> to vector<8x8x48xf32>
    %185 = vector.extract_strided_slice %168 {offsets = [1, 0, 0], sizes = [1, 1, 48], strides = [1, 1, 1]} : vector<2x1x48xf32> to vector<1x1x48xf32>
    %186 = vector.shape_cast %185 : vector<1x1x48xf32> to vector<1x48xf32>
    %187 = vector.shape_cast %186 : vector<1x48xf32> to vector<1x1x48xf32>
    %188 = vector.broadcast %187 : vector<1x1x48xf32> to vector<8x8x48xf32>
    %189 = arith.addf %184, %188 : vector<8x8x48xf32>
    %c0_79 = arith.constant 0 : index
    %c0_80 = arith.constant 0 : index
    %c0_81 = arith.constant 0 : index
    %190 = vector.load %arg11[%c0_79, %c0_80, %c0_81] : memref<2x8x16xf32, #tpu.memory_space<vmem>>, vector<1x8x16xf32>
    %191 = vector.shape_cast %190 : vector<1x8x16xf32> to vector<8x16xf32>
    %c1 = arith.constant 1 : index
    %c0_82 = arith.constant 0 : index
    %c0_83 = arith.constant 0 : index
    %192 = vector.load %arg11[%c1, %c0_82, %c0_83] : memref<2x8x16xf32, #tpu.memory_space<vmem>>, vector<1x8x16xf32>
    %193 = vector.shape_cast %192 : vector<1x8x16xf32> to vector<8x16xf32>
    %194 = vector.extract_strided_slice %179 {offsets = [0, 0, 0], sizes = [1, 8, 48], strides = [1, 1, 1]} : vector<8x8x48xf32> to vector<1x8x48xf32>
    %195 = vector.shape_cast %194 : vector<1x8x48xf32> to vector<8x48xf32>
    %196 = vector.extract_strided_slice %167 {offsets = [0, 0, 0], sizes = [1, 16, 48], strides = [1, 1, 1]} : vector<2x16x48xf32> to vector<1x16x48xf32>
    %197 = vector.shape_cast %196 : vector<1x16x48xf32> to vector<16x48xf32>
    %198 = vector.extract_strided_slice %169 {offsets = [0, 0, 0], sizes = [1, 1, 48], strides = [1, 1, 1]} : vector<2x1x48xf32> to vector<1x1x48xf32>
    %199 = vector.shape_cast %198 : vector<1x1x48xf32> to vector<1x48xf32>
    %cst_84 = arith.constant dense<0.000000e+00> : vector<8x48xf32>
    %200 = tpu.matmul %191, %197, %cst_84 {dimension_numbers = #tpu.dot_dimension_numbers<[1], [0], [0], [1], [0, 0, 1, 1], [], []>} : vector<8x16xf32>, vector<16x48xf32>, vector<8x48xf32> -> vector<8x48xf32>
    %201 = vector.broadcast %199 : vector<1x48xf32> to vector<8x48xf32>
    %202 = arith.addf %200, %201 : vector<8x48xf32>
    %203 = vector.extract_strided_slice %195 {offsets = [0, 0], sizes = [8, 16], strides = [1, 1]} : vector<8x48xf32> to vector<8x16xf32>
    %204 = vector.extract_strided_slice %202 {offsets = [0, 0], sizes = [8, 16], strides = [1, 1]} : vector<8x48xf32> to vector<8x16xf32>
    %205 = arith.addf %203, %204 : vector<8x16xf32>
    %206 = arith.negf %205 : vector<8x16xf32>
    %207 = math.exp %206 : vector<8x16xf32>
    %cst_85 = arith.constant 1.000000e+00 : f32
    %208 = vector.broadcast %cst_85 : f32 to vector<8x16xf32>
    %209 = arith.addf %208, %207 : vector<8x16xf32>
    %210 = arith.divf %208, %209 : vector<8x16xf32>
    %211 = vector.extract_strided_slice %195 {offsets = [0, 16], sizes = [8, 16], strides = [1, 1]} : vector<8x48xf32> to vector<8x16xf32>
    %212 = vector.extract_strided_slice %202 {offsets = [0, 16], sizes = [8, 16], strides = [1, 1]} : vector<8x48xf32> to vector<8x16xf32>
    %213 = arith.addf %211, %212 : vector<8x16xf32>
    %214 = arith.negf %213 : vector<8x16xf32>
    %215 = math.exp %214 : vector<8x16xf32>
    %cst_86 = arith.constant 1.000000e+00 : f32
    %216 = vector.broadcast %cst_86 : f32 to vector<8x16xf32>
    %217 = arith.addf %216, %215 : vector<8x16xf32>
    %218 = arith.divf %216, %217 : vector<8x16xf32>
    %219 = vector.extract_strided_slice %195 {offsets = [0, 32], sizes = [8, 16], strides = [1, 1]} : vector<8x48xf32> to vector<8x16xf32>
    %220 = vector.extract_strided_slice %202 {offsets = [0, 32], sizes = [8, 16], strides = [1, 1]} : vector<8x48xf32> to vector<8x16xf32>
    %221 = arith.mulf %210, %220 : vector<8x16xf32>
    %222 = arith.addf %219, %221 : vector<8x16xf32>
    %223 = math.tanh %222 : vector<8x16xf32>
    %cst_87 = arith.constant 1.000000e+00 : f32
    %224 = vector.broadcast %cst_87 : f32 to vector<8x16xf32>
    %225 = arith.subf %224, %218 : vector<8x16xf32>
    %226 = arith.mulf %225, %223 : vector<8x16xf32>
    %227 = arith.mulf %218, %191 : vector<8x16xf32>
    %228 = arith.addf %226, %227 : vector<8x16xf32>
    %c0_88 = arith.constant 0 : index
    %c0_89 = arith.constant 0 : index
    %c0_90 = arith.constant 0 : index
    %229 = vector.load %arg25[%c0_88, %c0_89, %c0_90] : memref<8x8x16xf32, #tpu.memory_space<vmem>>, vector<1x8x16xf32>
    %230 = vector.shape_cast %229 : vector<1x8x16xf32> to vector<8x16xf32>
    %231 = vector.shape_cast %228 : vector<8x16xf32> to vector<1x8x16xf32>
    tpu.vector_store %arg25[%c0_88, %c0_89, %c0_90], %231 {strides = array<i32>} : memref<8x8x16xf32, #tpu.memory_space<vmem>>, vector<1x8x16xf32>,
    %232 = vector.extract_strided_slice %189 {offsets = [7, 0, 0], sizes = [1, 8, 48], strides = [1, 1, 1]} : vector<8x8x48xf32> to vector<1x8x48xf32>
    %233 = vector.shape_cast %232 : vector<1x8x48xf32> to vector<8x48xf32>
    %234 = vector.extract_strided_slice %167 {offsets = [1, 0, 0], sizes = [1, 16, 48], strides = [1, 1, 1]} : vector<2x16x48xf32> to vector<1x16x48xf32>
    %235 = vector.shape_cast %234 : vector<1x16x48xf32> to vector<16x48xf32>
    %236 = vector.extract_strided_slice %169 {offsets = [1, 0, 0], sizes = [1, 1, 48], strides = [1, 1, 1]} : vector<2x1x48xf32> to vector<1x1x48xf32>
    %237 = vector.shape_cast %236 : vector<1x1x48xf32> to vector<1x48xf32>
    %cst_91 = arith.constant dense<0.000000e+00> : vector<8x48xf32>
    %238 = tpu.matmul %193, %235, %cst_91 {dimension_numbers = #tpu.dot_dimension_numbers<[1], [0], [0], [1], [0, 0, 1, 1], [], []>} : vector<8x16xf32>, vector<16x48xf32>, vector<8x48xf32> -> vector<8x48xf32>
    %239 = vector.broadcast %237 : vector<1x48xf32> to vector<8x48xf32>
    %240 = arith.addf %238, %239 : vector<8x48xf32>
    %241 = vector.extract_strided_slice %233 {offsets = [0, 0], sizes = [8, 16], strides = [1, 1]} : vector<8x48xf32> to vector<8x16xf32>
    %242 = vector.extract_strided_slice %240 {offsets = [0, 0], sizes = [8, 16], strides = [1, 1]} : vector<8x48xf32> to vector<8x16xf32>
    %243 = arith.addf %241, %242 : vector<8x16xf32>
    %244 = arith.negf %243 : vector<8x16xf32>
    %245 = math.exp %244 : vector<8x16xf32>
    %cst_92 = arith.constant 1.000000e+00 : f32
    %246 = vector.broadcast %cst_92 : f32 to vector<8x16xf32>
    %247 = arith.addf %246, %245 : vector<8x16xf32>
    %248 = arith.divf %246, %247 : vector<8x16xf32>
    %249 = vector.extract_strided_slice %233 {offsets = [0, 16], sizes = [8, 16], strides = [1, 1]} : vector<8x48xf32> to vector<8x16xf32>
    %250 = vector.extract_strided_slice %240 {offsets = [0, 16], sizes = [8, 16], strides = [1, 1]} : vector<8x48xf32> to vector<8x16xf32>
    %251 = arith.addf %249, %250 : vector<8x16xf32>
    %252 = arith.negf %251 : vector<8x16xf32>
    %253 = math.exp %252 : vector<8x16xf32>
    %cst_93 = arith.constant 1.000000e+00 : f32
    %254 = vector.broadcast %cst_93 : f32 to vector<8x16xf32>
    %255 = arith.addf %254, %253 : vector<8x16xf32>
    %256 = arith.divf %254, %255 : vector<8x16xf32>
    %257 = vector.extract_strided_slice %233 {offsets = [0, 32], sizes = [8, 16], strides = [1, 1]} : vector<8x48xf32> to vector<8x16xf32>
    %258 = vector.extract_strided_slice %240 {offsets = [0, 32], sizes = [8, 16], strides = [1, 1]} : vector<8x48xf32> to vector<8x16xf32>
    %259 = arith.mulf %248, %258 : vector<8x16xf32>
    %260 = arith.addf %257, %259 : vector<8x16xf32>
    %261 = math.tanh %260 : vector<8x16xf32>
    %cst_94 = arith.constant 1.000000e+00 : f32
    %262 = vector.broadcast %cst_94 : f32 to vector<8x16xf32>
    %263 = arith.subf %262, %256 : vector<8x16xf32>
    %264 = arith.mulf %263, %261 : vector<8x16xf32>
    %265 = arith.mulf %256, %193 : vector<8x16xf32>
    %266 = arith.addf %264, %265 : vector<8x16xf32>
    %c7 = arith.constant 7 : index
    %c0_95 = arith.constant 0 : index
    %c0_96 = arith.constant 0 : index
    %267 = vector.load %arg26[%c7, %c0_95, %c0_96] : memref<8x8x16xf32, #tpu.memory_space<vmem>>, vector<1x8x16xf32>
    %268 = vector.shape_cast %267 : vector<1x8x16xf32> to vector<8x16xf32>
    %269 = vector.shape_cast %266 : vector<8x16xf32> to vector<1x8x16xf32>
    tpu.vector_store %arg26[%c7, %c0_95, %c0_96], %269 {strides = array<i32>} : memref<8x8x16xf32, #tpu.memory_space<vmem>>, vector<1x8x16xf32>,
    %270 = vector.extract_strided_slice %179 {offsets = [1, 0, 0], sizes = [1, 8, 48], strides = [1, 1, 1]} : vector<8x8x48xf32> to vector<1x8x48xf32>
    %271 = vector.shape_cast %270 : vector<1x8x48xf32> to vector<8x48xf32>
    %272 = vector.extract_strided_slice %167 {offsets = [0, 0, 0], sizes = [1, 16, 48], strides = [1, 1, 1]} : vector<2x16x48xf32> to vector<1x16x48xf32>
    %273 = vector.shape_cast %272 : vector<1x16x48xf32> to vector<16x48xf32>
    %274 = vector.extract_strided_slice %169 {offsets = [0, 0, 0], sizes = [1, 1, 48], strides = [1, 1, 1]} : vector<2x1x48xf32> to vector<1x1x48xf32>
    %275 = vector.shape_cast %274 : vector<1x1x48xf32> to vector<1x48xf32>
    %cst_97 = arith.constant dense<0.000000e+00> : vector<8x48xf32>
    %276 = tpu.matmul %228, %273, %cst_97 {dimension_numbers = #tpu.dot_dimension_numbers<[1], [0], [0], [1], [0, 0, 1, 1], [], []>} : vector<8x16xf32>, vector<16x48xf32>, vector<8x48xf32> -> vector<8x48xf32>
    %277 = vector.broadcast %275 : vector<1x48xf32> to vector<8x48xf32>
    %278 = arith.addf %276, %277 : vector<8x48xf32>
    %279 = vector.extract_strided_slice %271 {offsets = [0, 0], sizes = [8, 16], strides = [1, 1]} : vector<8x48xf32> to vector<8x16xf32>
    %280 = vector.extract_strided_slice %278 {offsets = [0, 0], sizes = [8, 16], strides = [1, 1]} : vector<8x48xf32> to vector<8x16xf32>
    %281 = arith.addf %279, %280 : vector<8x16xf32>
    %282 = arith.negf %281 : vector<8x16xf32>
    %283 = math.exp %282 : vector<8x16xf32>
    %cst_98 = arith.constant 1.000000e+00 : f32
    %284 = vector.broadcast %cst_98 : f32 to vector<8x16xf32>
    %285 = arith.addf %284, %283 : vector<8x16xf32>
    %286 = arith.divf %284, %285 : vector<8x16xf32>
    %287 = vector.extract_strided_slice %271 {offsets = [0, 16], sizes = [8, 16], strides = [1, 1]} : vector<8x48xf32> to vector<8x16xf32>
    %288 = vector.extract_strided_slice %278 {offsets = [0, 16], sizes = [8, 16], strides = [1, 1]} : vector<8x48xf32> to vector<8x16xf32>
    %289 = arith.addf %287, %288 : vector<8x16xf32>
    %290 = arith.negf %289 : vector<8x16xf32>
    %291 = math.exp %290 : vector<8x16xf32>
    %cst_99 = arith.constant 1.000000e+00 : f32
    %292 = vector.broadcast %cst_99 : f32 to vector<8x16xf32>
    %293 = arith.addf %292, %291 : vector<8x16xf32>
    %294 = arith.divf %292, %293 : vector<8x16xf32>
    %295 = vector.extract_strided_slice %271 {offsets = [0, 32], sizes = [8, 16], strides = [1, 1]} : vector<8x48xf32> to vector<8x16xf32>
    %296 = vector.extract_strided_slice %278 {offsets = [0, 32], sizes = [8, 16], strides = [1, 1]} : vector<8x48xf32> to vector<8x16xf32>
    %297 = arith.mulf %286, %296 : vector<8x16xf32>
    %298 = arith.addf %295, %297 : vector<8x16xf32>
    %299 = math.tanh %298 : vector<8x16xf32>
    %cst_100 = arith.constant 1.000000e+00 : f32
    %300 = vector.broadcast %cst_100 : f32 to vector<8x16xf32>
    %301 = arith.subf %300, %294 : vector<8x16xf32>
    %302 = arith.mulf %301, %299 : vector<8x16xf32>
    %303 = arith.mulf %294, %228 : vector<8x16xf32>
    %304 = arith.addf %302, %303 : vector<8x16xf32>
    %c1_101 = arith.constant 1 : index
    %c0_102 = arith.constant 0 : index
    %c0_103 = arith.constant 0 : index
    %305 = vector.load %arg25[%c1_101, %c0_102, %c0_103] : memref<8x8x16xf32, #tpu.memory_space<vmem>>, vector<1x8x16xf32>
    %306 = vector.shape_cast %305 : vector<1x8x16xf32> to vector<8x16xf32>
    %307 = vector.shape_cast %304 : vector<8x16xf32> to vector<1x8x16xf32>
    tpu.vector_store %arg25[%c1_101, %c0_102, %c0_103], %307 {strides = array<i32>} : memref<8x8x16xf32, #tpu.memory_space<vmem>>, vector<1x8x16xf32>,
    %308 = vector.extract_strided_slice %189 {offsets = [6, 0, 0], sizes = [1, 8, 48], strides = [1, 1, 1]} : vector<8x8x48xf32> to vector<1x8x48xf32>
    %309 = vector.shape_cast %308 : vector<1x8x48xf32> to vector<8x48xf32>
    %310 = vector.extract_strided_slice %167 {offsets = [1, 0, 0], sizes = [1, 16, 48], strides = [1, 1, 1]} : vector<2x16x48xf32> to vector<1x16x48xf32>
    %311 = vector.shape_cast %310 : vector<1x16x48xf32> to vector<16x48xf32>
    %312 = vector.extract_strided_slice %169 {offsets = [1, 0, 0], sizes = [1, 1, 48], strides = [1, 1, 1]} : vector<2x1x48xf32> to vector<1x1x48xf32>
    %313 = vector.shape_cast %312 : vector<1x1x48xf32> to vector<1x48xf32>
    %cst_104 = arith.constant dense<0.000000e+00> : vector<8x48xf32>
    %314 = tpu.matmul %266, %311, %cst_104 {dimension_numbers = #tpu.dot_dimension_numbers<[1], [0], [0], [1], [0, 0, 1, 1], [], []>} : vector<8x16xf32>, vector<16x48xf32>, vector<8x48xf32> -> vector<8x48xf32>
    %315 = vector.broadcast %313 : vector<1x48xf32> to vector<8x48xf32>
    %316 = arith.addf %314, %315 : vector<8x48xf32>
    %317 = vector.extract_strided_slice %309 {offsets = [0, 0], sizes = [8, 16], strides = [1, 1]} : vector<8x48xf32> to vector<8x16xf32>
    %318 = vector.extract_strided_slice %316 {offsets = [0, 0], sizes = [8, 16], strides = [1, 1]} : vector<8x48xf32> to vector<8x16xf32>
    %319 = arith.addf %317, %318 : vector<8x16xf32>
    %320 = arith.negf %319 : vector<8x16xf32>
    %321 = math.exp %320 : vector<8x16xf32>
    %cst_105 = arith.constant 1.000000e+00 : f32
    %322 = vector.broadcast %cst_105 : f32 to vector<8x16xf32>
    %323 = arith.addf %322, %321 : vector<8x16xf32>
    %324 = arith.divf %322, %323 : vector<8x16xf32>
    %325 = vector.extract_strided_slice %309 {offsets = [0, 16], sizes = [8, 16], strides = [1, 1]} : vector<8x48xf32> to vector<8x16xf32>
    %326 = vector.extract_strided_slice %316 {offsets = [0, 16], sizes = [8, 16], strides = [1, 1]} : vector<8x48xf32> to vector<8x16xf32>
    %327 = arith.addf %325, %326 : vector<8x16xf32>
    %328 = arith.negf %327 : vector<8x16xf32>
    %329 = math.exp %328 : vector<8x16xf32>
    %cst_106 = arith.constant 1.000000e+00 : f32
    %330 = vector.broadcast %cst_106 : f32 to vector<8x16xf32>
    %331 = arith.addf %330, %329 : vector<8x16xf32>
    %332 = arith.divf %330, %331 : vector<8x16xf32>
    %333 = vector.extract_strided_slice %309 {offsets = [0, 32], sizes = [8, 16], strides = [1, 1]} : vector<8x48xf32> to vector<8x16xf32>
    %334 = vector.extract_strided_slice %316 {offsets = [0, 32], sizes = [8, 16], strides = [1, 1]} : vector<8x48xf32> to vector<8x16xf32>
    %335 = arith.mulf %324, %334 : vector<8x16xf32>
    %336 = arith.addf %333, %335 : vector<8x16xf32>
    %337 = math.tanh %336 : vector<8x16xf32>
    %cst_107 = arith.constant 1.000000e+00 : f32
    %338 = vector.broadcast %cst_107 : f32 to vector<8x16xf32>
    %339 = arith.subf %338, %332 : vector<8x16xf32>
    %340 = arith.mulf %339, %337 : vector<8x16xf32>
    %341 = arith.mulf %332, %266 : vector<8x16xf32>
    %342 = arith.addf %340, %341 : vector<8x16xf32>
    %c6 = arith.constant 6 : index
    %c0_108 = arith.constant 0 : index
    %c0_109 = arith.constant 0 : index
    %343 = vector.load %arg26[%c6, %c0_108, %c0_109] : memref<8x8x16xf32, #tpu.memory_space<vmem>>, vector<1x8x16xf32>
    %344 = vector.shape_cast %343 : vector<1x8x16xf32> to vector<8x16xf32>
    %345 = vector.shape_cast %342 : vector<8x16xf32> to vector<1x8x16xf32>
    tpu.vector_store %arg26[%c6, %c0_108, %c0_109], %345 {strides = array<i32>} : memref<8x8x16xf32, #tpu.memory_space<vmem>>, vector<1x8x16xf32>,
    %346 = vector.extract_strided_slice %179 {offsets = [2, 0, 0], sizes = [1, 8, 48], strides = [1, 1, 1]} : vector<8x8x48xf32> to vector<1x8x48xf32>
    %347 = vector.shape_cast %346 : vector<1x8x48xf32> to vector<8x48xf32>
    %348 = vector.extract_strided_slice %167 {offsets = [0, 0, 0], sizes = [1, 16, 48], strides = [1, 1, 1]} : vector<2x16x48xf32> to vector<1x16x48xf32>
    %349 = vector.shape_cast %348 : vector<1x16x48xf32> to vector<16x48xf32>
    %350 = vector.extract_strided_slice %169 {offsets = [0, 0, 0], sizes = [1, 1, 48], strides = [1, 1, 1]} : vector<2x1x48xf32> to vector<1x1x48xf32>
    %351 = vector.shape_cast %350 : vector<1x1x48xf32> to vector<1x48xf32>
    %cst_110 = arith.constant dense<0.000000e+00> : vector<8x48xf32>
    %352 = tpu.matmul %304, %349, %cst_110 {dimension_numbers = #tpu.dot_dimension_numbers<[1], [0], [0], [1], [0, 0, 1, 1], [], []>} : vector<8x16xf32>, vector<16x48xf32>, vector<8x48xf32> -> vector<8x48xf32>
    %353 = vector.broadcast %351 : vector<1x48xf32> to vector<8x48xf32>
    %354 = arith.addf %352, %353 : vector<8x48xf32>
    %355 = vector.extract_strided_slice %347 {offsets = [0, 0], sizes = [8, 16], strides = [1, 1]} : vector<8x48xf32> to vector<8x16xf32>
    %356 = vector.extract_strided_slice %354 {offsets = [0, 0], sizes = [8, 16], strides = [1, 1]} : vector<8x48xf32> to vector<8x16xf32>
    %357 = arith.addf %355, %356 : vector<8x16xf32>
    %358 = arith.negf %357 : vector<8x16xf32>
    %359 = math.exp %358 : vector<8x16xf32>
    %cst_111 = arith.constant 1.000000e+00 : f32
    %360 = vector.broadcast %cst_111 : f32 to vector<8x16xf32>
    %361 = arith.addf %360, %359 : vector<8x16xf32>
    %362 = arith.divf %360, %361 : vector<8x16xf32>
    %363 = vector.extract_strided_slice %347 {offsets = [0, 16], sizes = [8, 16], strides = [1, 1]} : vector<8x48xf32> to vector<8x16xf32>
    %364 = vector.extract_strided_slice %354 {offsets = [0, 16], sizes = [8, 16], strides = [1, 1]} : vector<8x48xf32> to vector<8x16xf32>
    %365 = arith.addf %363, %364 : vector<8x16xf32>
    %366 = arith.negf %365 : vector<8x16xf32>
    %367 = math.exp %366 : vector<8x16xf32>
    %cst_112 = arith.constant 1.000000e+00 : f32
    %368 = vector.broadcast %cst_112 : f32 to vector<8x16xf32>
    %369 = arith.addf %368, %367 : vector<8x16xf32>
    %370 = arith.divf %368, %369 : vector<8x16xf32>
    %371 = vector.extract_strided_slice %347 {offsets = [0, 32], sizes = [8, 16], strides = [1, 1]} : vector<8x48xf32> to vector<8x16xf32>
    %372 = vector.extract_strided_slice %354 {offsets = [0, 32], sizes = [8, 16], strides = [1, 1]} : vector<8x48xf32> to vector<8x16xf32>
    %373 = arith.mulf %362, %372 : vector<8x16xf32>
    %374 = arith.addf %371, %373 : vector<8x16xf32>
    %375 = math.tanh %374 : vector<8x16xf32>
    %cst_113 = arith.constant 1.000000e+00 : f32
    %376 = vector.broadcast %cst_113 : f32 to vector<8x16xf32>
    %377 = arith.subf %376, %370 : vector<8x16xf32>
    %378 = arith.mulf %377, %375 : vector<8x16xf32>
    %379 = arith.mulf %370, %304 : vector<8x16xf32>
    %380 = arith.addf %378, %379 : vector<8x16xf32>
    %c2 = arith.constant 2 : index
    %c0_114 = arith.constant 0 : index
    %c0_115 = arith.constant 0 : index
    %381 = vector.load %arg25[%c2, %c0_114, %c0_115] : memref<8x8x16xf32, #tpu.memory_space<vmem>>, vector<1x8x16xf32>
    %382 = vector.shape_cast %381 : vector<1x8x16xf32> to vector<8x16xf32>
    %383 = vector.shape_cast %380 : vector<8x16xf32> to vector<1x8x16xf32>
    tpu.vector_store %arg25[%c2, %c0_114, %c0_115], %383 {strides = array<i32>} : memref<8x8x16xf32, #tpu.memory_space<vmem>>, vector<1x8x16xf32>,
    %384 = vector.extract_strided_slice %189 {offsets = [5, 0, 0], sizes = [1, 8, 48], strides = [1, 1, 1]} : vector<8x8x48xf32> to vector<1x8x48xf32>
    %385 = vector.shape_cast %384 : vector<1x8x48xf32> to vector<8x48xf32>
    %386 = vector.extract_strided_slice %167 {offsets = [1, 0, 0], sizes = [1, 16, 48], strides = [1, 1, 1]} : vector<2x16x48xf32> to vector<1x16x48xf32>
    %387 = vector.shape_cast %386 : vector<1x16x48xf32> to vector<16x48xf32>
    %388 = vector.extract_strided_slice %169 {offsets = [1, 0, 0], sizes = [1, 1, 48], strides = [1, 1, 1]} : vector<2x1x48xf32> to vector<1x1x48xf32>
    %389 = vector.shape_cast %388 : vector<1x1x48xf32> to vector<1x48xf32>
    %cst_116 = arith.constant dense<0.000000e+00> : vector<8x48xf32>
    %390 = tpu.matmul %342, %387, %cst_116 {dimension_numbers = #tpu.dot_dimension_numbers<[1], [0], [0], [1], [0, 0, 1, 1], [], []>} : vector<8x16xf32>, vector<16x48xf32>, vector<8x48xf32> -> vector<8x48xf32>
    %391 = vector.broadcast %389 : vector<1x48xf32> to vector<8x48xf32>
    %392 = arith.addf %390, %391 : vector<8x48xf32>
    %393 = vector.extract_strided_slice %385 {offsets = [0, 0], sizes = [8, 16], strides = [1, 1]} : vector<8x48xf32> to vector<8x16xf32>
    %394 = vector.extract_strided_slice %392 {offsets = [0, 0], sizes = [8, 16], strides = [1, 1]} : vector<8x48xf32> to vector<8x16xf32>
    %395 = arith.addf %393, %394 : vector<8x16xf32>
    %396 = arith.negf %395 : vector<8x16xf32>
    %397 = math.exp %396 : vector<8x16xf32>
    %cst_117 = arith.constant 1.000000e+00 : f32
    %398 = vector.broadcast %cst_117 : f32 to vector<8x16xf32>
    %399 = arith.addf %398, %397 : vector<8x16xf32>
    %400 = arith.divf %398, %399 : vector<8x16xf32>
    %401 = vector.extract_strided_slice %385 {offsets = [0, 16], sizes = [8, 16], strides = [1, 1]} : vector<8x48xf32> to vector<8x16xf32>
    %402 = vector.extract_strided_slice %392 {offsets = [0, 16], sizes = [8, 16], strides = [1, 1]} : vector<8x48xf32> to vector<8x16xf32>
    %403 = arith.addf %401, %402 : vector<8x16xf32>
    %404 = arith.negf %403 : vector<8x16xf32>
    %405 = math.exp %404 : vector<8x16xf32>
    %cst_118 = arith.constant 1.000000e+00 : f32
    %406 = vector.broadcast %cst_118 : f32 to vector<8x16xf32>
    %407 = arith.addf %406, %405 : vector<8x16xf32>
    %408 = arith.divf %406, %407 : vector<8x16xf32>
    %409 = vector.extract_strided_slice %385 {offsets = [0, 32], sizes = [8, 16], strides = [1, 1]} : vector<8x48xf32> to vector<8x16xf32>
    %410 = vector.extract_strided_slice %392 {offsets = [0, 32], sizes = [8, 16], strides = [1, 1]} : vector<8x48xf32> to vector<8x16xf32>
    %411 = arith.mulf %400, %410 : vector<8x16xf32>
    %412 = arith.addf %409, %411 : vector<8x16xf32>
    %413 = math.tanh %412 : vector<8x16xf32>
    %cst_119 = arith.constant 1.000000e+00 : f32
    %414 = vector.broadcast %cst_119 : f32 to vector<8x16xf32>
    %415 = arith.subf %414, %408 : vector<8x16xf32>
    %416 = arith.mulf %415, %413 : vector<8x16xf32>
    %417 = arith.mulf %408, %342 : vector<8x16xf32>
    %418 = arith.addf %416, %417 : vector<8x16xf32>
    %c5 = arith.constant 5 : index
    %c0_120 = arith.constant 0 : index
    %c0_121 = arith.constant 0 : index
    %419 = vector.load %arg26[%c5, %c0_120, %c0_121] : memref<8x8x16xf32, #tpu.memory_space<vmem>>, vector<1x8x16xf32>
    %420 = vector.shape_cast %419 : vector<1x8x16xf32> to vector<8x16xf32>
    %421 = vector.shape_cast %418 : vector<8x16xf32> to vector<1x8x16xf32>
    tpu.vector_store %arg26[%c5, %c0_120, %c0_121], %421 {strides = array<i32>} : memref<8x8x16xf32, #tpu.memory_space<vmem>>, vector<1x8x16xf32>,
    %422 = vector.extract_strided_slice %179 {offsets = [3, 0, 0], sizes = [1, 8, 48], strides = [1, 1, 1]} : vector<8x8x48xf32> to vector<1x8x48xf32>
    %423 = vector.shape_cast %422 : vector<1x8x48xf32> to vector<8x48xf32>
    %424 = vector.extract_strided_slice %167 {offsets = [0, 0, 0], sizes = [1, 16, 48], strides = [1, 1, 1]} : vector<2x16x48xf32> to vector<1x16x48xf32>
    %425 = vector.shape_cast %424 : vector<1x16x48xf32> to vector<16x48xf32>
    %426 = vector.extract_strided_slice %169 {offsets = [0, 0, 0], sizes = [1, 1, 48], strides = [1, 1, 1]} : vector<2x1x48xf32> to vector<1x1x48xf32>
    %427 = vector.shape_cast %426 : vector<1x1x48xf32> to vector<1x48xf32>
    %cst_122 = arith.constant dense<0.000000e+00> : vector<8x48xf32>
    %428 = tpu.matmul %380, %425, %cst_122 {dimension_numbers = #tpu.dot_dimension_numbers<[1], [0], [0], [1], [0, 0, 1, 1], [], []>} : vector<8x16xf32>, vector<16x48xf32>, vector<8x48xf32> -> vector<8x48xf32>
    %429 = vector.broadcast %427 : vector<1x48xf32> to vector<8x48xf32>
    %430 = arith.addf %428, %429 : vector<8x48xf32>
    %431 = vector.extract_strided_slice %423 {offsets = [0, 0], sizes = [8, 16], strides = [1, 1]} : vector<8x48xf32> to vector<8x16xf32>
    %432 = vector.extract_strided_slice %430 {offsets = [0, 0], sizes = [8, 16], strides = [1, 1]} : vector<8x48xf32> to vector<8x16xf32>
    %433 = arith.addf %431, %432 : vector<8x16xf32>
    %434 = arith.negf %433 : vector<8x16xf32>
    %435 = math.exp %434 : vector<8x16xf32>
    %cst_123 = arith.constant 1.000000e+00 : f32
    %436 = vector.broadcast %cst_123 : f32 to vector<8x16xf32>
    %437 = arith.addf %436, %435 : vector<8x16xf32>
    %438 = arith.divf %436, %437 : vector<8x16xf32>
    %439 = vector.extract_strided_slice %423 {offsets = [0, 16], sizes = [8, 16], strides = [1, 1]} : vector<8x48xf32> to vector<8x16xf32>
    %440 = vector.extract_strided_slice %430 {offsets = [0, 16], sizes = [8, 16], strides = [1, 1]} : vector<8x48xf32> to vector<8x16xf32>
    %441 = arith.addf %439, %440 : vector<8x16xf32>
    %442 = arith.negf %441 : vector<8x16xf32>
    %443 = math.exp %442 : vector<8x16xf32>
    %cst_124 = arith.constant 1.000000e+00 : f32
    %444 = vector.broadcast %cst_124 : f32 to vector<8x16xf32>
    %445 = arith.addf %444, %443 : vector<8x16xf32>
    %446 = arith.divf %444, %445 : vector<8x16xf32>
    %447 = vector.extract_strided_slice %423 {offsets = [0, 32], sizes = [8, 16], strides = [1, 1]} : vector<8x48xf32> to vector<8x16xf32>
    %448 = vector.extract_strided_slice %430 {offsets = [0, 32], sizes = [8, 16], strides = [1, 1]} : vector<8x48xf32> to vector<8x16xf32>
    %449 = arith.mulf %438, %448 : vector<8x16xf32>
    %450 = arith.addf %447, %449 : vector<8x16xf32>
    %451 = math.tanh %450 : vector<8x16xf32>
    %cst_125 = arith.constant 1.000000e+00 : f32
    %452 = vector.broadcast %cst_125 : f32 to vector<8x16xf32>
    %453 = arith.subf %452, %446 : vector<8x16xf32>
    %454 = arith.mulf %453, %451 : vector<8x16xf32>
    %455 = arith.mulf %446, %380 : vector<8x16xf32>
    %456 = arith.addf %454, %455 : vector<8x16xf32>
    %c3 = arith.constant 3 : index
    %c0_126 = arith.constant 0 : index
    %c0_127 = arith.constant 0 : index
    %457 = vector.load %arg25[%c3, %c0_126, %c0_127] : memref<8x8x16xf32, #tpu.memory_space<vmem>>, vector<1x8x16xf32>
    %458 = vector.shape_cast %457 : vector<1x8x16xf32> to vector<8x16xf32>
    %459 = vector.shape_cast %456 : vector<8x16xf32> to vector<1x8x16xf32>
    tpu.vector_store %arg25[%c3, %c0_126, %c0_127], %459 {strides = array<i32>} : memref<8x8x16xf32, #tpu.memory_space<vmem>>, vector<1x8x16xf32>,
    %460 = vector.extract_strided_slice %189 {offsets = [4, 0, 0], sizes = [1, 8, 48], strides = [1, 1, 1]} : vector<8x8x48xf32> to vector<1x8x48xf32>
    %461 = vector.shape_cast %460 : vector<1x8x48xf32> to vector<8x48xf32>
    %462 = vector.extract_strided_slice %167 {offsets = [1, 0, 0], sizes = [1, 16, 48], strides = [1, 1, 1]} : vector<2x16x48xf32> to vector<1x16x48xf32>
    %463 = vector.shape_cast %462 : vector<1x16x48xf32> to vector<16x48xf32>
    %464 = vector.extract_strided_slice %169 {offsets = [1, 0, 0], sizes = [1, 1, 48], strides = [1, 1, 1]} : vector<2x1x48xf32> to vector<1x1x48xf32>
    %465 = vector.shape_cast %464 : vector<1x1x48xf32> to vector<1x48xf32>
    %cst_128 = arith.constant dense<0.000000e+00> : vector<8x48xf32>
    %466 = tpu.matmul %418, %463, %cst_128 {dimension_numbers = #tpu.dot_dimension_numbers<[1], [0], [0], [1], [0, 0, 1, 1], [], []>} : vector<8x16xf32>, vector<16x48xf32>, vector<8x48xf32> -> vector<8x48xf32>
    %467 = vector.broadcast %465 : vector<1x48xf32> to vector<8x48xf32>
    %468 = arith.addf %466, %467 : vector<8x48xf32>
    %469 = vector.extract_strided_slice %461 {offsets = [0, 0], sizes = [8, 16], strides = [1, 1]} : vector<8x48xf32> to vector<8x16xf32>
    %470 = vector.extract_strided_slice %468 {offsets = [0, 0], sizes = [8, 16], strides = [1, 1]} : vector<8x48xf32> to vector<8x16xf32>
    %471 = arith.addf %469, %470 : vector<8x16xf32>
    %472 = arith.negf %471 : vector<8x16xf32>
    %473 = math.exp %472 : vector<8x16xf32>
    %cst_129 = arith.constant 1.000000e+00 : f32
    %474 = vector.broadcast %cst_129 : f32 to vector<8x16xf32>
    %475 = arith.addf %474, %473 : vector<8x16xf32>
    %476 = arith.divf %474, %475 : vector<8x16xf32>
    %477 = vector.extract_strided_slice %461 {offsets = [0, 16], sizes = [8, 16], strides = [1, 1]} : vector<8x48xf32> to vector<8x16xf32>
    %478 = vector.extract_strided_slice %468 {offsets = [0, 16], sizes = [8, 16], strides = [1, 1]} : vector<8x48xf32> to vector<8x16xf32>
    %479 = arith.addf %477, %478 : vector<8x16xf32>
    %480 = arith.negf %479 : vector<8x16xf32>
    %481 = math.exp %480 : vector<8x16xf32>
    %cst_130 = arith.constant 1.000000e+00 : f32
    %482 = vector.broadcast %cst_130 : f32 to vector<8x16xf32>
    %483 = arith.addf %482, %481 : vector<8x16xf32>
    %484 = arith.divf %482, %483 : vector<8x16xf32>
    %485 = vector.extract_strided_slice %461 {offsets = [0, 32], sizes = [8, 16], strides = [1, 1]} : vector<8x48xf32> to vector<8x16xf32>
    %486 = vector.extract_strided_slice %468 {offsets = [0, 32], sizes = [8, 16], strides = [1, 1]} : vector<8x48xf32> to vector<8x16xf32>
    %487 = arith.mulf %476, %486 : vector<8x16xf32>
    %488 = arith.addf %485, %487 : vector<8x16xf32>
    %489 = math.tanh %488 : vector<8x16xf32>
    %cst_131 = arith.constant 1.000000e+00 : f32
    %490 = vector.broadcast %cst_131 : f32 to vector<8x16xf32>
    %491 = arith.subf %490, %484 : vector<8x16xf32>
    %492 = arith.mulf %491, %489 : vector<8x16xf32>
    %493 = arith.mulf %484, %418 : vector<8x16xf32>
    %494 = arith.addf %492, %493 : vector<8x16xf32>
    %c4 = arith.constant 4 : index
    %c0_132 = arith.constant 0 : index
    %c0_133 = arith.constant 0 : index
    %495 = vector.load %arg26[%c4, %c0_132, %c0_133] : memref<8x8x16xf32, #tpu.memory_space<vmem>>, vector<1x8x16xf32>
    %496 = vector.shape_cast %495 : vector<1x8x16xf32> to vector<8x16xf32>
    %497 = vector.shape_cast %494 : vector<8x16xf32> to vector<1x8x16xf32>
    tpu.vector_store %arg26[%c4, %c0_132, %c0_133], %497 {strides = array<i32>} : memref<8x8x16xf32, #tpu.memory_space<vmem>>, vector<1x8x16xf32>,
    %498 = vector.extract_strided_slice %179 {offsets = [4, 0, 0], sizes = [1, 8, 48], strides = [1, 1, 1]} : vector<8x8x48xf32> to vector<1x8x48xf32>
    %499 = vector.shape_cast %498 : vector<1x8x48xf32> to vector<8x48xf32>
    %500 = vector.extract_strided_slice %167 {offsets = [0, 0, 0], sizes = [1, 16, 48], strides = [1, 1, 1]} : vector<2x16x48xf32> to vector<1x16x48xf32>
    %501 = vector.shape_cast %500 : vector<1x16x48xf32> to vector<16x48xf32>
    %502 = vector.extract_strided_slice %169 {offsets = [0, 0, 0], sizes = [1, 1, 48], strides = [1, 1, 1]} : vector<2x1x48xf32> to vector<1x1x48xf32>
    %503 = vector.shape_cast %502 : vector<1x1x48xf32> to vector<1x48xf32>
    %cst_134 = arith.constant dense<0.000000e+00> : vector<8x48xf32>
    %504 = tpu.matmul %456, %501, %cst_134 {dimension_numbers = #tpu.dot_dimension_numbers<[1], [0], [0], [1], [0, 0, 1, 1], [], []>} : vector<8x16xf32>, vector<16x48xf32>, vector<8x48xf32> -> vector<8x48xf32>
    %505 = vector.broadcast %503 : vector<1x48xf32> to vector<8x48xf32>
    %506 = arith.addf %504, %505 : vector<8x48xf32>
    %507 = vector.extract_strided_slice %499 {offsets = [0, 0], sizes = [8, 16], strides = [1, 1]} : vector<8x48xf32> to vector<8x16xf32>
    %508 = vector.extract_strided_slice %506 {offsets = [0, 0], sizes = [8, 16], strides = [1, 1]} : vector<8x48xf32> to vector<8x16xf32>
    %509 = arith.addf %507, %508 : vector<8x16xf32>
    %510 = arith.negf %509 : vector<8x16xf32>
    %511 = math.exp %510 : vector<8x16xf32>
    %cst_135 = arith.constant 1.000000e+00 : f32
    %512 = vector.broadcast %cst_135 : f32 to vector<8x16xf32>
    %513 = arith.addf %512, %511 : vector<8x16xf32>
    %514 = arith.divf %512, %513 : vector<8x16xf32>
    %515 = vector.extract_strided_slice %499 {offsets = [0, 16], sizes = [8, 16], strides = [1, 1]} : vector<8x48xf32> to vector<8x16xf32>
    %516 = vector.extract_strided_slice %506 {offsets = [0, 16], sizes = [8, 16], strides = [1, 1]} : vector<8x48xf32> to vector<8x16xf32>
    %517 = arith.addf %515, %516 : vector<8x16xf32>
    %518 = arith.negf %517 : vector<8x16xf32>
    %519 = math.exp %518 : vector<8x16xf32>
    %cst_136 = arith.constant 1.000000e+00 : f32
    %520 = vector.broadcast %cst_136 : f32 to vector<8x16xf32>
    %521 = arith.addf %520, %519 : vector<8x16xf32>
    %522 = arith.divf %520, %521 : vector<8x16xf32>
    %523 = vector.extract_strided_slice %499 {offsets = [0, 32], sizes = [8, 16], strides = [1, 1]} : vector<8x48xf32> to vector<8x16xf32>
    %524 = vector.extract_strided_slice %506 {offsets = [0, 32], sizes = [8, 16], strides = [1, 1]} : vector<8x48xf32> to vector<8x16xf32>
    %525 = arith.mulf %514, %524 : vector<8x16xf32>
    %526 = arith.addf %523, %525 : vector<8x16xf32>
    %527 = math.tanh %526 : vector<8x16xf32>
    %cst_137 = arith.constant 1.000000e+00 : f32
    %528 = vector.broadcast %cst_137 : f32 to vector<8x16xf32>
    %529 = arith.subf %528, %522 : vector<8x16xf32>
    %530 = arith.mulf %529, %527 : vector<8x16xf32>
    %531 = arith.mulf %522, %456 : vector<8x16xf32>
    %532 = arith.addf %530, %531 : vector<8x16xf32>
    %c4_138 = arith.constant 4 : index
    %c0_139 = arith.constant 0 : index
    %c0_140 = arith.constant 0 : index
    %533 = vector.load %arg25[%c4_138, %c0_139, %c0_140] : memref<8x8x16xf32, #tpu.memory_space<vmem>>, vector<1x8x16xf32>
    %534 = vector.shape_cast %533 : vector<1x8x16xf32> to vector<8x16xf32>
    %535 = vector.shape_cast %532 : vector<8x16xf32> to vector<1x8x16xf32>
    tpu.vector_store %arg25[%c4_138, %c0_139, %c0_140], %535 {strides = array<i32>} : memref<8x8x16xf32, #tpu.memory_space<vmem>>, vector<1x8x16xf32>,
    %536 = vector.extract_strided_slice %189 {offsets = [3, 0, 0], sizes = [1, 8, 48], strides = [1, 1, 1]} : vector<8x8x48xf32> to vector<1x8x48xf32>
    %537 = vector.shape_cast %536 : vector<1x8x48xf32> to vector<8x48xf32>
    %538 = vector.extract_strided_slice %167 {offsets = [1, 0, 0], sizes = [1, 16, 48], strides = [1, 1, 1]} : vector<2x16x48xf32> to vector<1x16x48xf32>
    %539 = vector.shape_cast %538 : vector<1x16x48xf32> to vector<16x48xf32>
    %540 = vector.extract_strided_slice %169 {offsets = [1, 0, 0], sizes = [1, 1, 48], strides = [1, 1, 1]} : vector<2x1x48xf32> to vector<1x1x48xf32>
    %541 = vector.shape_cast %540 : vector<1x1x48xf32> to vector<1x48xf32>
    %cst_141 = arith.constant dense<0.000000e+00> : vector<8x48xf32>
    %542 = tpu.matmul %494, %539, %cst_141 {dimension_numbers = #tpu.dot_dimension_numbers<[1], [0], [0], [1], [0, 0, 1, 1], [], []>} : vector<8x16xf32>, vector<16x48xf32>, vector<8x48xf32> -> vector<8x48xf32>
    %543 = vector.broadcast %541 : vector<1x48xf32> to vector<8x48xf32>
    %544 = arith.addf %542, %543 : vector<8x48xf32>
    %545 = vector.extract_strided_slice %537 {offsets = [0, 0], sizes = [8, 16], strides = [1, 1]} : vector<8x48xf32> to vector<8x16xf32>
    %546 = vector.extract_strided_slice %544 {offsets = [0, 0], sizes = [8, 16], strides = [1, 1]} : vector<8x48xf32> to vector<8x16xf32>
    %547 = arith.addf %545, %546 : vector<8x16xf32>
    %548 = arith.negf %547 : vector<8x16xf32>
    %549 = math.exp %548 : vector<8x16xf32>
    %cst_142 = arith.constant 1.000000e+00 : f32
    %550 = vector.broadcast %cst_142 : f32 to vector<8x16xf32>
    %551 = arith.addf %550, %549 : vector<8x16xf32>
    %552 = arith.divf %550, %551 : vector<8x16xf32>
    %553 = vector.extract_strided_slice %537 {offsets = [0, 16], sizes = [8, 16], strides = [1, 1]} : vector<8x48xf32> to vector<8x16xf32>
    %554 = vector.extract_strided_slice %544 {offsets = [0, 16], sizes = [8, 16], strides = [1, 1]} : vector<8x48xf32> to vector<8x16xf32>
    %555 = arith.addf %553, %554 : vector<8x16xf32>
    %556 = arith.negf %555 : vector<8x16xf32>
    %557 = math.exp %556 : vector<8x16xf32>
    %cst_143 = arith.constant 1.000000e+00 : f32
    %558 = vector.broadcast %cst_143 : f32 to vector<8x16xf32>
    %559 = arith.addf %558, %557 : vector<8x16xf32>
    %560 = arith.divf %558, %559 : vector<8x16xf32>
    %561 = vector.extract_strided_slice %537 {offsets = [0, 32], sizes = [8, 16], strides = [1, 1]} : vector<8x48xf32> to vector<8x16xf32>
    %562 = vector.extract_strided_slice %544 {offsets = [0, 32], sizes = [8, 16], strides = [1, 1]} : vector<8x48xf32> to vector<8x16xf32>
    %563 = arith.mulf %552, %562 : vector<8x16xf32>
    %564 = arith.addf %561, %563 : vector<8x16xf32>
    %565 = math.tanh %564 : vector<8x16xf32>
    %cst_144 = arith.constant 1.000000e+00 : f32
    %566 = vector.broadcast %cst_144 : f32 to vector<8x16xf32>
    %567 = arith.subf %566, %560 : vector<8x16xf32>
    %568 = arith.mulf %567, %565 : vector<8x16xf32>
    %569 = arith.mulf %560, %494 : vector<8x16xf32>
    %570 = arith.addf %568, %569 : vector<8x16xf32>
    %c3_145 = arith.constant 3 : index
    %c0_146 = arith.constant 0 : index
    %c0_147 = arith.constant 0 : index
    %571 = vector.load %arg26[%c3_145, %c0_146, %c0_147] : memref<8x8x16xf32, #tpu.memory_space<vmem>>, vector<1x8x16xf32>
    %572 = vector.shape_cast %571 : vector<1x8x16xf32> to vector<8x16xf32>
    %573 = vector.shape_cast %570 : vector<8x16xf32> to vector<1x8x16xf32>
    tpu.vector_store %arg26[%c3_145, %c0_146, %c0_147], %573 {strides = array<i32>} : memref<8x8x16xf32, #tpu.memory_space<vmem>>, vector<1x8x16xf32>,
    %574 = vector.extract_strided_slice %179 {offsets = [5, 0, 0], sizes = [1, 8, 48], strides = [1, 1, 1]} : vector<8x8x48xf32> to vector<1x8x48xf32>
    %575 = vector.shape_cast %574 : vector<1x8x48xf32> to vector<8x48xf32>
    %576 = vector.extract_strided_slice %167 {offsets = [0, 0, 0], sizes = [1, 16, 48], strides = [1, 1, 1]} : vector<2x16x48xf32> to vector<1x16x48xf32>
    %577 = vector.shape_cast %576 : vector<1x16x48xf32> to vector<16x48xf32>
    %578 = vector.extract_strided_slice %169 {offsets = [0, 0, 0], sizes = [1, 1, 48], strides = [1, 1, 1]} : vector<2x1x48xf32> to vector<1x1x48xf32>
    %579 = vector.shape_cast %578 : vector<1x1x48xf32> to vector<1x48xf32>
    %cst_148 = arith.constant dense<0.000000e+00> : vector<8x48xf32>
    %580 = tpu.matmul %532, %577, %cst_148 {dimension_numbers = #tpu.dot_dimension_numbers<[1], [0], [0], [1], [0, 0, 1, 1], [], []>} : vector<8x16xf32>, vector<16x48xf32>, vector<8x48xf32> -> vector<8x48xf32>
    %581 = vector.broadcast %579 : vector<1x48xf32> to vector<8x48xf32>
    %582 = arith.addf %580, %581 : vector<8x48xf32>
    %583 = vector.extract_strided_slice %575 {offsets = [0, 0], sizes = [8, 16], strides = [1, 1]} : vector<8x48xf32> to vector<8x16xf32>
    %584 = vector.extract_strided_slice %582 {offsets = [0, 0], sizes = [8, 16], strides = [1, 1]} : vector<8x48xf32> to vector<8x16xf32>
    %585 = arith.addf %583, %584 : vector<8x16xf32>
    %586 = arith.negf %585 : vector<8x16xf32>
    %587 = math.exp %586 : vector<8x16xf32>
    %cst_149 = arith.constant 1.000000e+00 : f32
    %588 = vector.broadcast %cst_149 : f32 to vector<8x16xf32>
    %589 = arith.addf %588, %587 : vector<8x16xf32>
    %590 = arith.divf %588, %589 : vector<8x16xf32>
    %591 = vector.extract_strided_slice %575 {offsets = [0, 16], sizes = [8, 16], strides = [1, 1]} : vector<8x48xf32> to vector<8x16xf32>
    %592 = vector.extract_strided_slice %582 {offsets = [0, 16], sizes = [8, 16], strides = [1, 1]} : vector<8x48xf32> to vector<8x16xf32>
    %593 = arith.addf %591, %592 : vector<8x16xf32>
    %594 = arith.negf %593 : vector<8x16xf32>
    %595 = math.exp %594 : vector<8x16xf32>
    %cst_150 = arith.constant 1.000000e+00 : f32
    %596 = vector.broadcast %cst_150 : f32 to vector<8x16xf32>
    %597 = arith.addf %596, %595 : vector<8x16xf32>
    %598 = arith.divf %596, %597 : vector<8x16xf32>
    %599 = vector.extract_strided_slice %575 {offsets = [0, 32], sizes = [8, 16], strides = [1, 1]} : vector<8x48xf32> to vector<8x16xf32>
    %600 = vector.extract_strided_slice %582 {offsets = [0, 32], sizes = [8, 16], strides = [1, 1]} : vector<8x48xf32> to vector<8x16xf32>
    %601 = arith.mulf %590, %600 : vector<8x16xf32>
    %602 = arith.addf %599, %601 : vector<8x16xf32>
    %603 = math.tanh %602 : vector<8x16xf32>
    %cst_151 = arith.constant 1.000000e+00 : f32
    %604 = vector.broadcast %cst_151 : f32 to vector<8x16xf32>
    %605 = arith.subf %604, %598 : vector<8x16xf32>
    %606 = arith.mulf %605, %603 : vector<8x16xf32>
    %607 = arith.mulf %598, %532 : vector<8x16xf32>
    %608 = arith.addf %606, %607 : vector<8x16xf32>
    %c5_152 = arith.constant 5 : index
    %c0_153 = arith.constant 0 : index
    %c0_154 = arith.constant 0 : index
    %609 = vector.load %arg25[%c5_152, %c0_153, %c0_154] : memref<8x8x16xf32, #tpu.memory_space<vmem>>, vector<1x8x16xf32>
    %610 = vector.shape_cast %609 : vector<1x8x16xf32> to vector<8x16xf32>
    %611 = vector.shape_cast %608 : vector<8x16xf32> to vector<1x8x16xf32>
    tpu.vector_store %arg25[%c5_152, %c0_153, %c0_154], %611 {strides = array<i32>} : memref<8x8x16xf32, #tpu.memory_space<vmem>>, vector<1x8x16xf32>,
    %612 = vector.extract_strided_slice %189 {offsets = [2, 0, 0], sizes = [1, 8, 48], strides = [1, 1, 1]} : vector<8x8x48xf32> to vector<1x8x48xf32>
    %613 = vector.shape_cast %612 : vector<1x8x48xf32> to vector<8x48xf32>
    %614 = vector.extract_strided_slice %167 {offsets = [1, 0, 0], sizes = [1, 16, 48], strides = [1, 1, 1]} : vector<2x16x48xf32> to vector<1x16x48xf32>
    %615 = vector.shape_cast %614 : vector<1x16x48xf32> to vector<16x48xf32>
    %616 = vector.extract_strided_slice %169 {offsets = [1, 0, 0], sizes = [1, 1, 48], strides = [1, 1, 1]} : vector<2x1x48xf32> to vector<1x1x48xf32>
    %617 = vector.shape_cast %616 : vector<1x1x48xf32> to vector<1x48xf32>
    %cst_155 = arith.constant dense<0.000000e+00> : vector<8x48xf32>
    %618 = tpu.matmul %570, %615, %cst_155 {dimension_numbers = #tpu.dot_dimension_numbers<[1], [0], [0], [1], [0, 0, 1, 1], [], []>} : vector<8x16xf32>, vector<16x48xf32>, vector<8x48xf32> -> vector<8x48xf32>
    %619 = vector.broadcast %617 : vector<1x48xf32> to vector<8x48xf32>
    %620 = arith.addf %618, %619 : vector<8x48xf32>
    %621 = vector.extract_strided_slice %613 {offsets = [0, 0], sizes = [8, 16], strides = [1, 1]} : vector<8x48xf32> to vector<8x16xf32>
    %622 = vector.extract_strided_slice %620 {offsets = [0, 0], sizes = [8, 16], strides = [1, 1]} : vector<8x48xf32> to vector<8x16xf32>
    %623 = arith.addf %621, %622 : vector<8x16xf32>
    %624 = arith.negf %623 : vector<8x16xf32>
    %625 = math.exp %624 : vector<8x16xf32>
    %cst_156 = arith.constant 1.000000e+00 : f32
    %626 = vector.broadcast %cst_156 : f32 to vector<8x16xf32>
    %627 = arith.addf %626, %625 : vector<8x16xf32>
    %628 = arith.divf %626, %627 : vector<8x16xf32>
    %629 = vector.extract_strided_slice %613 {offsets = [0, 16], sizes = [8, 16], strides = [1, 1]} : vector<8x48xf32> to vector<8x16xf32>
    %630 = vector.extract_strided_slice %620 {offsets = [0, 16], sizes = [8, 16], strides = [1, 1]} : vector<8x48xf32> to vector<8x16xf32>
    %631 = arith.addf %629, %630 : vector<8x16xf32>
    %632 = arith.negf %631 : vector<8x16xf32>
    %633 = math.exp %632 : vector<8x16xf32>
    %cst_157 = arith.constant 1.000000e+00 : f32
    %634 = vector.broadcast %cst_157 : f32 to vector<8x16xf32>
    %635 = arith.addf %634, %633 : vector<8x16xf32>
    %636 = arith.divf %634, %635 : vector<8x16xf32>
    %637 = vector.extract_strided_slice %613 {offsets = [0, 32], sizes = [8, 16], strides = [1, 1]} : vector<8x48xf32> to vector<8x16xf32>
    %638 = vector.extract_strided_slice %620 {offsets = [0, 32], sizes = [8, 16], strides = [1, 1]} : vector<8x48xf32> to vector<8x16xf32>
    %639 = arith.mulf %628, %638 : vector<8x16xf32>
    %640 = arith.addf %637, %639 : vector<8x16xf32>
    %641 = math.tanh %640 : vector<8x16xf32>
    %cst_158 = arith.constant 1.000000e+00 : f32
    %642 = vector.broadcast %cst_158 : f32 to vector<8x16xf32>
    %643 = arith.subf %642, %636 : vector<8x16xf32>
    %644 = arith.mulf %643, %641 : vector<8x16xf32>
    %645 = arith.mulf %636, %570 : vector<8x16xf32>
    %646 = arith.addf %644, %645 : vector<8x16xf32>
    %c2_159 = arith.constant 2 : index
    %c0_160 = arith.constant 0 : index
    %c0_161 = arith.constant 0 : index
    %647 = vector.load %arg26[%c2_159, %c0_160, %c0_161] : memref<8x8x16xf32, #tpu.memory_space<vmem>>, vector<1x8x16xf32>
    %648 = vector.shape_cast %647 : vector<1x8x16xf32> to vector<8x16xf32>
    %649 = vector.shape_cast %646 : vector<8x16xf32> to vector<1x8x16xf32>
    tpu.vector_store %arg26[%c2_159, %c0_160, %c0_161], %649 {strides = array<i32>} : memref<8x8x16xf32, #tpu.memory_space<vmem>>, vector<1x8x16xf32>,
    %650 = vector.extract_strided_slice %179 {offsets = [6, 0, 0], sizes = [1, 8, 48], strides = [1, 1, 1]} : vector<8x8x48xf32> to vector<1x8x48xf32>
    %651 = vector.shape_cast %650 : vector<1x8x48xf32> to vector<8x48xf32>
    %652 = vector.extract_strided_slice %167 {offsets = [0, 0, 0], sizes = [1, 16, 48], strides = [1, 1, 1]} : vector<2x16x48xf32> to vector<1x16x48xf32>
    %653 = vector.shape_cast %652 : vector<1x16x48xf32> to vector<16x48xf32>
    %654 = vector.extract_strided_slice %169 {offsets = [0, 0, 0], sizes = [1, 1, 48], strides = [1, 1, 1]} : vector<2x1x48xf32> to vector<1x1x48xf32>
    %655 = vector.shape_cast %654 : vector<1x1x48xf32> to vector<1x48xf32>
    %cst_162 = arith.constant dense<0.000000e+00> : vector<8x48xf32>
    %656 = tpu.matmul %608, %653, %cst_162 {dimension_numbers = #tpu.dot_dimension_numbers<[1], [0], [0], [1], [0, 0, 1, 1], [], []>} : vector<8x16xf32>, vector<16x48xf32>, vector<8x48xf32> -> vector<8x48xf32>
    %657 = vector.broadcast %655 : vector<1x48xf32> to vector<8x48xf32>
    %658 = arith.addf %656, %657 : vector<8x48xf32>
    %659 = vector.extract_strided_slice %651 {offsets = [0, 0], sizes = [8, 16], strides = [1, 1]} : vector<8x48xf32> to vector<8x16xf32>
    %660 = vector.extract_strided_slice %658 {offsets = [0, 0], sizes = [8, 16], strides = [1, 1]} : vector<8x48xf32> to vector<8x16xf32>
    %661 = arith.addf %659, %660 : vector<8x16xf32>
    %662 = arith.negf %661 : vector<8x16xf32>
    %663 = math.exp %662 : vector<8x16xf32>
    %cst_163 = arith.constant 1.000000e+00 : f32
    %664 = vector.broadcast %cst_163 : f32 to vector<8x16xf32>
    %665 = arith.addf %664, %663 : vector<8x16xf32>
    %666 = arith.divf %664, %665 : vector<8x16xf32>
    %667 = vector.extract_strided_slice %651 {offsets = [0, 16], sizes = [8, 16], strides = [1, 1]} : vector<8x48xf32> to vector<8x16xf32>
    %668 = vector.extract_strided_slice %658 {offsets = [0, 16], sizes = [8, 16], strides = [1, 1]} : vector<8x48xf32> to vector<8x16xf32>
    %669 = arith.addf %667, %668 : vector<8x16xf32>
    %670 = arith.negf %669 : vector<8x16xf32>
    %671 = math.exp %670 : vector<8x16xf32>
    %cst_164 = arith.constant 1.000000e+00 : f32
    %672 = vector.broadcast %cst_164 : f32 to vector<8x16xf32>
    %673 = arith.addf %672, %671 : vector<8x16xf32>
    %674 = arith.divf %672, %673 : vector<8x16xf32>
    %675 = vector.extract_strided_slice %651 {offsets = [0, 32], sizes = [8, 16], strides = [1, 1]} : vector<8x48xf32> to vector<8x16xf32>
    %676 = vector.extract_strided_slice %658 {offsets = [0, 32], sizes = [8, 16], strides = [1, 1]} : vector<8x48xf32> to vector<8x16xf32>
    %677 = arith.mulf %666, %676 : vector<8x16xf32>
    %678 = arith.addf %675, %677 : vector<8x16xf32>
    %679 = math.tanh %678 : vector<8x16xf32>
    %cst_165 = arith.constant 1.000000e+00 : f32
    %680 = vector.broadcast %cst_165 : f32 to vector<8x16xf32>
    %681 = arith.subf %680, %674 : vector<8x16xf32>
    %682 = arith.mulf %681, %679 : vector<8x16xf32>
    %683 = arith.mulf %674, %608 : vector<8x16xf32>
    %684 = arith.addf %682, %683 : vector<8x16xf32>
    %c6_166 = arith.constant 6 : index
    %c0_167 = arith.constant 0 : index
    %c0_168 = arith.constant 0 : index
    %685 = vector.load %arg25[%c6_166, %c0_167, %c0_168] : memref<8x8x16xf32, #tpu.memory_space<vmem>>, vector<1x8x16xf32>
    %686 = vector.shape_cast %685 : vector<1x8x16xf32> to vector<8x16xf32>
    %687 = vector.shape_cast %684 : vector<8x16xf32> to vector<1x8x16xf32>
    tpu.vector_store %arg25[%c6_166, %c0_167, %c0_168], %687 {strides = array<i32>} : memref<8x8x16xf32, #tpu.memory_space<vmem>>, vector<1x8x16xf32>,
    %688 = vector.extract_strided_slice %189 {offsets = [1, 0, 0], sizes = [1, 8, 48], strides = [1, 1, 1]} : vector<8x8x48xf32> to vector<1x8x48xf32>
    %689 = vector.shape_cast %688 : vector<1x8x48xf32> to vector<8x48xf32>
    %690 = vector.extract_strided_slice %167 {offsets = [1, 0, 0], sizes = [1, 16, 48], strides = [1, 1, 1]} : vector<2x16x48xf32> to vector<1x16x48xf32>
    %691 = vector.shape_cast %690 : vector<1x16x48xf32> to vector<16x48xf32>
    %692 = vector.extract_strided_slice %169 {offsets = [1, 0, 0], sizes = [1, 1, 48], strides = [1, 1, 1]} : vector<2x1x48xf32> to vector<1x1x48xf32>
    %693 = vector.shape_cast %692 : vector<1x1x48xf32> to vector<1x48xf32>
    %cst_169 = arith.constant dense<0.000000e+00> : vector<8x48xf32>
    %694 = tpu.matmul %646, %691, %cst_169 {dimension_numbers = #tpu.dot_dimension_numbers<[1], [0], [0], [1], [0, 0, 1, 1], [], []>} : vector<8x16xf32>, vector<16x48xf32>, vector<8x48xf32> -> vector<8x48xf32>
    %695 = vector.broadcast %693 : vector<1x48xf32> to vector<8x48xf32>
    %696 = arith.addf %694, %695 : vector<8x48xf32>
    %697 = vector.extract_strided_slice %689 {offsets = [0, 0], sizes = [8, 16], strides = [1, 1]} : vector<8x48xf32> to vector<8x16xf32>
    %698 = vector.extract_strided_slice %696 {offsets = [0, 0], sizes = [8, 16], strides = [1, 1]} : vector<8x48xf32> to vector<8x16xf32>
    %699 = arith.addf %697, %698 : vector<8x16xf32>
    %700 = arith.negf %699 : vector<8x16xf32>
    %701 = math.exp %700 : vector<8x16xf32>
    %cst_170 = arith.constant 1.000000e+00 : f32
    %702 = vector.broadcast %cst_170 : f32 to vector<8x16xf32>
    %703 = arith.addf %702, %701 : vector<8x16xf32>
    %704 = arith.divf %702, %703 : vector<8x16xf32>
    %705 = vector.extract_strided_slice %689 {offsets = [0, 16], sizes = [8, 16], strides = [1, 1]} : vector<8x48xf32> to vector<8x16xf32>
    %706 = vector.extract_strided_slice %696 {offsets = [0, 16], sizes = [8, 16], strides = [1, 1]} : vector<8x48xf32> to vector<8x16xf32>
    %707 = arith.addf %705, %706 : vector<8x16xf32>
    %708 = arith.negf %707 : vector<8x16xf32>
    %709 = math.exp %708 : vector<8x16xf32>
    %cst_171 = arith.constant 1.000000e+00 : f32
    %710 = vector.broadcast %cst_171 : f32 to vector<8x16xf32>
    %711 = arith.addf %710, %709 : vector<8x16xf32>
    %712 = arith.divf %710, %711 : vector<8x16xf32>
    %713 = vector.extract_strided_slice %689 {offsets = [0, 32], sizes = [8, 16], strides = [1, 1]} : vector<8x48xf32> to vector<8x16xf32>
    %714 = vector.extract_strided_slice %696 {offsets = [0, 32], sizes = [8, 16], strides = [1, 1]} : vector<8x48xf32> to vector<8x16xf32>
    %715 = arith.mulf %704, %714 : vector<8x16xf32>
    %716 = arith.addf %713, %715 : vector<8x16xf32>
    %717 = math.tanh %716 : vector<8x16xf32>
    %cst_172 = arith.constant 1.000000e+00 : f32
    %718 = vector.broadcast %cst_172 : f32 to vector<8x16xf32>
    %719 = arith.subf %718, %712 : vector<8x16xf32>
    %720 = arith.mulf %719, %717 : vector<8x16xf32>
    %721 = arith.mulf %712, %646 : vector<8x16xf32>
    %722 = arith.addf %720, %721 : vector<8x16xf32>
    %c1_173 = arith.constant 1 : index
    %c0_174 = arith.constant 0 : index
    %c0_175 = arith.constant 0 : index
    %723 = vector.load %arg26[%c1_173, %c0_174, %c0_175] : memref<8x8x16xf32, #tpu.memory_space<vmem>>, vector<1x8x16xf32>
    %724 = vector.shape_cast %723 : vector<1x8x16xf32> to vector<8x16xf32>
    %725 = vector.shape_cast %722 : vector<8x16xf32> to vector<1x8x16xf32>
    tpu.vector_store %arg26[%c1_173, %c0_174, %c0_175], %725 {strides = array<i32>} : memref<8x8x16xf32, #tpu.memory_space<vmem>>, vector<1x8x16xf32>,
    %726 = vector.extract_strided_slice %179 {offsets = [7, 0, 0], sizes = [1, 8, 48], strides = [1, 1, 1]} : vector<8x8x48xf32> to vector<1x8x48xf32>
    %727 = vector.shape_cast %726 : vector<1x8x48xf32> to vector<8x48xf32>
    %728 = vector.extract_strided_slice %167 {offsets = [0, 0, 0], sizes = [1, 16, 48], strides = [1, 1, 1]} : vector<2x16x48xf32> to vector<1x16x48xf32>
    %729 = vector.shape_cast %728 : vector<1x16x48xf32> to vector<16x48xf32>
    %730 = vector.extract_strided_slice %169 {offsets = [0, 0, 0], sizes = [1, 1, 48], strides = [1, 1, 1]} : vector<2x1x48xf32> to vector<1x1x48xf32>
    %731 = vector.shape_cast %730 : vector<1x1x48xf32> to vector<1x48xf32>
    %cst_176 = arith.constant dense<0.000000e+00> : vector<8x48xf32>
    %732 = tpu.matmul %684, %729, %cst_176 {dimension_numbers = #tpu.dot_dimension_numbers<[1], [0], [0], [1], [0, 0, 1, 1], [], []>} : vector<8x16xf32>, vector<16x48xf32>, vector<8x48xf32> -> vector<8x48xf32>
    %733 = vector.broadcast %731 : vector<1x48xf32> to vector<8x48xf32>
    %734 = arith.addf %732, %733 : vector<8x48xf32>
    %735 = vector.extract_strided_slice %727 {offsets = [0, 0], sizes = [8, 16], strides = [1, 1]} : vector<8x48xf32> to vector<8x16xf32>
    %736 = vector.extract_strided_slice %734 {offsets = [0, 0], sizes = [8, 16], strides = [1, 1]} : vector<8x48xf32> to vector<8x16xf32>
    %737 = arith.addf %735, %736 : vector<8x16xf32>
    %738 = arith.negf %737 : vector<8x16xf32>
    %739 = math.exp %738 : vector<8x16xf32>
    %cst_177 = arith.constant 1.000000e+00 : f32
    %740 = vector.broadcast %cst_177 : f32 to vector<8x16xf32>
    %741 = arith.addf %740, %739 : vector<8x16xf32>
    %742 = arith.divf %740, %741 : vector<8x16xf32>
    %743 = vector.extract_strided_slice %727 {offsets = [0, 16], sizes = [8, 16], strides = [1, 1]} : vector<8x48xf32> to vector<8x16xf32>
    %744 = vector.extract_strided_slice %734 {offsets = [0, 16], sizes = [8, 16], strides = [1, 1]} : vector<8x48xf32> to vector<8x16xf32>
    %745 = arith.addf %743, %744 : vector<8x16xf32>
    %746 = arith.negf %745 : vector<8x16xf32>
    %747 = math.exp %746 : vector<8x16xf32>
    %cst_178 = arith.constant 1.000000e+00 : f32
    %748 = vector.broadcast %cst_178 : f32 to vector<8x16xf32>
    %749 = arith.addf %748, %747 : vector<8x16xf32>
    %750 = arith.divf %748, %749 : vector<8x16xf32>
    %751 = vector.extract_strided_slice %727 {offsets = [0, 32], sizes = [8, 16], strides = [1, 1]} : vector<8x48xf32> to vector<8x16xf32>
    %752 = vector.extract_strided_slice %734 {offsets = [0, 32], sizes = [8, 16], strides = [1, 1]} : vector<8x48xf32> to vector<8x16xf32>
    %753 = arith.mulf %742, %752 : vector<8x16xf32>
    %754 = arith.addf %751, %753 : vector<8x16xf32>
    %755 = math.tanh %754 : vector<8x16xf32>
    %cst_179 = arith.constant 1.000000e+00 : f32
    %756 = vector.broadcast %cst_179 : f32 to vector<8x16xf32>
    %757 = arith.subf %756, %750 : vector<8x16xf32>
    %758 = arith.mulf %757, %755 : vector<8x16xf32>
    %759 = arith.mulf %750, %684 : vector<8x16xf32>
    %760 = arith.addf %758, %759 : vector<8x16xf32>
    %c7_180 = arith.constant 7 : index
    %c0_181 = arith.constant 0 : index
    %c0_182 = arith.constant 0 : index
    %761 = vector.load %arg25[%c7_180, %c0_181, %c0_182] : memref<8x8x16xf32, #tpu.memory_space<vmem>>, vector<1x8x16xf32>
    %762 = vector.shape_cast %761 : vector<1x8x16xf32> to vector<8x16xf32>
    %763 = vector.shape_cast %760 : vector<8x16xf32> to vector<1x8x16xf32>
    tpu.vector_store %arg25[%c7_180, %c0_181, %c0_182], %763 {strides = array<i32>} : memref<8x8x16xf32, #tpu.memory_space<vmem>>, vector<1x8x16xf32>,
    %764 = vector.extract_strided_slice %189 {offsets = [0, 0, 0], sizes = [1, 8, 48], strides = [1, 1, 1]} : vector<8x8x48xf32> to vector<1x8x48xf32>
    %765 = vector.shape_cast %764 : vector<1x8x48xf32> to vector<8x48xf32>
    %766 = vector.extract_strided_slice %167 {offsets = [1, 0, 0], sizes = [1, 16, 48], strides = [1, 1, 1]} : vector<2x16x48xf32> to vector<1x16x48xf32>
    %767 = vector.shape_cast %766 : vector<1x16x48xf32> to vector<16x48xf32>
    %768 = vector.extract_strided_slice %169 {offsets = [1, 0, 0], sizes = [1, 1, 48], strides = [1, 1, 1]} : vector<2x1x48xf32> to vector<1x1x48xf32>
    %769 = vector.shape_cast %768 : vector<1x1x48xf32> to vector<1x48xf32>
    %cst_183 = arith.constant dense<0.000000e+00> : vector<8x48xf32>
    %770 = tpu.matmul %722, %767, %cst_183 {dimension_numbers = #tpu.dot_dimension_numbers<[1], [0], [0], [1], [0, 0, 1, 1], [], []>} : vector<8x16xf32>, vector<16x48xf32>, vector<8x48xf32> -> vector<8x48xf32>
    %771 = vector.broadcast %769 : vector<1x48xf32> to vector<8x48xf32>
    %772 = arith.addf %770, %771 : vector<8x48xf32>
    %773 = vector.extract_strided_slice %765 {offsets = [0, 0], sizes = [8, 16], strides = [1, 1]} : vector<8x48xf32> to vector<8x16xf32>
    %774 = vector.extract_strided_slice %772 {offsets = [0, 0], sizes = [8, 16], strides = [1, 1]} : vector<8x48xf32> to vector<8x16xf32>
    %775 = arith.addf %773, %774 : vector<8x16xf32>
    %776 = arith.negf %775 : vector<8x16xf32>
    %777 = math.exp %776 : vector<8x16xf32>
    %cst_184 = arith.constant 1.000000e+00 : f32
    %778 = vector.broadcast %cst_184 : f32 to vector<8x16xf32>
    %779 = arith.addf %778, %777 : vector<8x16xf32>
    %780 = arith.divf %778, %779 : vector<8x16xf32>
    %781 = vector.extract_strided_slice %765 {offsets = [0, 16], sizes = [8, 16], strides = [1, 1]} : vector<8x48xf32> to vector<8x16xf32>
    %782 = vector.extract_strided_slice %772 {offsets = [0, 16], sizes = [8, 16], strides = [1, 1]} : vector<8x48xf32> to vector<8x16xf32>
    %783 = arith.addf %781, %782 : vector<8x16xf32>
    %784 = arith.negf %783 : vector<8x16xf32>
    %785 = math.exp %784 : vector<8x16xf32>
    %cst_185 = arith.constant 1.000000e+00 : f32
    %786 = vector.broadcast %cst_185 : f32 to vector<8x16xf32>
    %787 = arith.addf %786, %785 : vector<8x16xf32>
    %788 = arith.divf %786, %787 : vector<8x16xf32>
    %789 = vector.extract_strided_slice %765 {offsets = [0, 32], sizes = [8, 16], strides = [1, 1]} : vector<8x48xf32> to vector<8x16xf32>
    %790 = vector.extract_strided_slice %772 {offsets = [0, 32], sizes = [8, 16], strides = [1, 1]} : vector<8x48xf32> to vector<8x16xf32>
    %791 = arith.mulf %780, %790 : vector<8x16xf32>
    %792 = arith.addf %789, %791 : vector<8x16xf32>
    %793 = math.tanh %792 : vector<8x16xf32>
    %cst_186 = arith.constant 1.000000e+00 : f32
    %794 = vector.broadcast %cst_186 : f32 to vector<8x16xf32>
    %795 = arith.subf %794, %788 : vector<8x16xf32>
    %796 = arith.mulf %795, %793 : vector<8x16xf32>
    %797 = arith.mulf %788, %722 : vector<8x16xf32>
    %798 = arith.addf %796, %797 : vector<8x16xf32>
    %c0_187 = arith.constant 0 : index
    %c0_188 = arith.constant 0 : index
    %c0_189 = arith.constant 0 : index
    %799 = vector.load %arg26[%c0_187, %c0_188, %c0_189] : memref<8x8x16xf32, #tpu.memory_space<vmem>>, vector<1x8x16xf32>
    %800 = vector.shape_cast %799 : vector<1x8x16xf32> to vector<8x16xf32>
    %801 = vector.shape_cast %798 : vector<8x16xf32> to vector<1x8x16xf32>
    tpu.vector_store %arg26[%c0_187, %c0_188, %c0_189], %801 {strides = array<i32>} : memref<8x8x16xf32, #tpu.memory_space<vmem>>, vector<1x8x16xf32>,
    %c0_190 = arith.constant 0 : index
    %c0_191 = arith.constant 0 : index
    %c0_192 = arith.constant 0 : index
    %802 = vector.load %arg25[%c0_190, %c0_191, %c0_192] : memref<8x8x16xf32, #tpu.memory_space<vmem>>, vector<8x8x16xf32>
    %c0_193 = arith.constant 0 : index
    %c0_194 = arith.constant 0 : index
    %c0_195 = arith.constant 0 : index
    %803 = vector.load %arg26[%c0_193, %c0_194, %c0_195] : memref<8x8x16xf32, #tpu.memory_space<vmem>>, vector<8x8x16xf32>
    %c0_196 = arith.constant 0 : index
    %c0_197 = arith.constant 0 : index
    %c0_198 = arith.constant 0 : index
    %804 = vector.load %arg12[%c0_196, %c0_197, %c0_198] : memref<3x16x16xf32, #tpu.memory_space<vmem>>, vector<3x16x16xf32>
    %c0_199 = arith.constant 0 : index
    %c0_200 = arith.constant 0 : index
    %c0_201 = arith.constant 0 : index
    %805 = vector.load %arg13[%c0_199, %c0_200, %c0_201] : memref<3x16x16xf32, #tpu.memory_space<vmem>>, vector<3x16x16xf32>
    %c0_202 = arith.constant 0 : index
    %c0_203 = arith.constant 0 : index
    %c0_204 = arith.constant 0 : index
    %806 = vector.load %arg15[%c0_202, %c0_203, %c0_204] : memref<3x16x16xf32, #tpu.memory_space<vmem>>, vector<3x16x16xf32>
    %807 = vector.extract_strided_slice %802 {offsets = [0, 0, 0], sizes = [4, 8, 16], strides = [1, 1, 1]} : vector<8x8x16xf32> to vector<4x8x16xf32>
    %808 = vector.extract_strided_slice %804 {offsets = [0, 0, 0], sizes = [1, 16, 16], strides = [1, 1, 1]} : vector<3x16x16xf32> to vector<1x16x16xf32>
    %809 = vector.shape_cast %808 : vector<1x16x16xf32> to vector<16x16xf32>
    %810 = vector.shape_cast %807 : vector<4x8x16xf32> to vector<32x16xf32>
    %cst_205 = arith.constant dense<0.000000e+00> : vector<32x16xf32>
    %811 = tpu.matmul %810, %809, %cst_205 {dimension_numbers = #tpu.dot_dimension_numbers<[1], [0], [0], [1], [0, 0, 1, 1], [], []>} : vector<32x16xf32>, vector<16x16xf32>, vector<32x16xf32> -> vector<32x16xf32>
    %812 = vector.shape_cast %811 : vector<32x16xf32> to vector<4x8x16xf32>
    %813 = vector.extract_strided_slice %803 {offsets = [0, 0, 0], sizes = [4, 8, 16], strides = [1, 1, 1]} : vector<8x8x16xf32> to vector<4x8x16xf32>
    %814 = vector.extract_strided_slice %805 {offsets = [0, 0, 0], sizes = [1, 16, 16], strides = [1, 1, 1]} : vector<3x16x16xf32> to vector<1x16x16xf32>
    %815 = vector.shape_cast %814 : vector<1x16x16xf32> to vector<16x16xf32>
    %816 = vector.shape_cast %813 : vector<4x8x16xf32> to vector<32x16xf32>
    %cst_206 = arith.constant dense<0.000000e+00> : vector<32x16xf32>
    %817 = tpu.matmul %816, %815, %cst_206 {dimension_numbers = #tpu.dot_dimension_numbers<[1], [0], [0], [1], [0, 0, 1, 1], [], []>} : vector<32x16xf32>, vector<16x16xf32>, vector<32x16xf32> -> vector<32x16xf32>
    %818 = vector.shape_cast %817 : vector<32x16xf32> to vector<4x8x16xf32>
    %819 = arith.addf %812, %818 : vector<4x8x16xf32>
    %cst_207 = arith.constant 0.000000e+00 : f32
    %820 = vector.broadcast %cst_207 : f32 to vector<4x8x16xf32>
    %821 = tpu.concatenate %820, %819 in 0 : vector<4x8x16xf32>, vector<4x8x16xf32> -> vector<8x8x16xf32>
    %822 = vector.extract_strided_slice %802 {offsets = [0, 0, 0], sizes = [6, 8, 16], strides = [1, 1, 1]} : vector<8x8x16xf32> to vector<6x8x16xf32>
    %823 = vector.extract_strided_slice %804 {offsets = [1, 0, 0], sizes = [1, 16, 16], strides = [1, 1, 1]} : vector<3x16x16xf32> to vector<1x16x16xf32>
    %824 = vector.shape_cast %823 : vector<1x16x16xf32> to vector<16x16xf32>
    %825 = vector.shape_cast %822 : vector<6x8x16xf32> to vector<48x16xf32>
    %cst_208 = arith.constant dense<0.000000e+00> : vector<48x16xf32>
    %826 = tpu.matmul %825, %824, %cst_208 {dimension_numbers = #tpu.dot_dimension_numbers<[1], [0], [0], [1], [0, 0, 1, 1], [], []>} : vector<48x16xf32>, vector<16x16xf32>, vector<48x16xf32> -> vector<48x16xf32>
    %827 = vector.shape_cast %826 : vector<48x16xf32> to vector<6x8x16xf32>
    %828 = vector.extract_strided_slice %803 {offsets = [0, 0, 0], sizes = [6, 8, 16], strides = [1, 1, 1]} : vector<8x8x16xf32> to vector<6x8x16xf32>
    %829 = vector.extract_strided_slice %805 {offsets = [1, 0, 0], sizes = [1, 16, 16], strides = [1, 1, 1]} : vector<3x16x16xf32> to vector<1x16x16xf32>
    %830 = vector.shape_cast %829 : vector<1x16x16xf32> to vector<16x16xf32>
    %831 = vector.shape_cast %828 : vector<6x8x16xf32> to vector<48x16xf32>
    %cst_209 = arith.constant dense<0.000000e+00> : vector<48x16xf32>
    %832 = tpu.matmul %831, %830, %cst_209 {dimension_numbers = #tpu.dot_dimension_numbers<[1], [0], [0], [1], [0, 0, 1, 1], [], []>} : vector<48x16xf32>, vector<16x16xf32>, vector<48x16xf32> -> vector<48x16xf32>
    %833 = vector.shape_cast %832 : vector<48x16xf32> to vector<6x8x16xf32>
    %834 = arith.addf %827, %833 : vector<6x8x16xf32>
    %cst_210 = arith.constant 0.000000e+00 : f32
    %835 = vector.broadcast %cst_210 : f32 to vector<2x8x16xf32>
    %836 = tpu.concatenate %835, %834 in 0 : vector<2x8x16xf32>, vector<6x8x16xf32> -> vector<8x8x16xf32>
    %837 = arith.addf %821, %836 : vector<8x8x16xf32>
    %838 = vector.extract_strided_slice %804 {offsets = [2, 0, 0], sizes = [1, 16, 16], strides = [1, 1, 1]} : vector<3x16x16xf32> to vector<1x16x16xf32>
    %839 = vector.shape_cast %838 : vector<1x16x16xf32> to vector<16x16xf32>
    %840 = vector.shape_cast %802 : vector<8x8x16xf32> to vector<64x16xf32>
    %cst_211 = arith.constant dense<0.000000e+00> : vector<64x16xf32>
    %841 = tpu.matmul %840, %839, %cst_211 {dimension_numbers = #tpu.dot_dimension_numbers<[1], [0], [0], [1], [0, 0, 1, 1], [], []>} : vector<64x16xf32>, vector<16x16xf32>, vector<64x16xf32> -> vector<64x16xf32>
    %842 = vector.shape_cast %841 : vector<64x16xf32> to vector<8x8x16xf32>
    %843 = vector.extract_strided_slice %805 {offsets = [2, 0, 0], sizes = [1, 16, 16], strides = [1, 1, 1]} : vector<3x16x16xf32> to vector<1x16x16xf32>
    %844 = vector.shape_cast %843 : vector<1x16x16xf32> to vector<16x16xf32>
    %845 = vector.shape_cast %803 : vector<8x8x16xf32> to vector<64x16xf32>
    %cst_212 = arith.constant dense<0.000000e+00> : vector<64x16xf32>
    %846 = tpu.matmul %845, %844, %cst_212 {dimension_numbers = #tpu.dot_dimension_numbers<[1], [0], [0], [1], [0, 0, 1, 1], [], []>} : vector<64x16xf32>, vector<16x16xf32>, vector<64x16xf32> -> vector<64x16xf32>
    %847 = vector.shape_cast %846 : vector<64x16xf32> to vector<8x8x16xf32>
    %848 = arith.addf %842, %847 : vector<8x8x16xf32>
    %849 = arith.addf %837, %848 : vector<8x8x16xf32>
    %c0_213 = arith.constant 0 : index
    %c0_214 = arith.constant 0 : index
    %850 = vector.load %arg14[%c0_213, %c0_214] : memref<1x16xf32, #tpu.memory_space<vmem>>, vector<1x16xf32>
    %851 = vector.shape_cast %850 : vector<1x16xf32> to vector<1x1x16xf32>
    %852 = vector.broadcast %851 : vector<1x1x16xf32> to vector<8x8x16xf32>
    %853 = arith.addf %849, %852 : vector<8x8x16xf32>
    %cst_215 = arith.constant 0.000000e+00 : f32
    %854 = vector.broadcast %cst_215 : f32 to vector<8x8x16xf32>
    %855 = arith.maximumf %853, %854 : vector<8x8x16xf32>
    %856 = vector.extract_strided_slice %855 {offsets = [0, 0, 0], sizes = [4, 8, 16], strides = [1, 1, 1]} : vector<8x8x16xf32> to vector<4x8x16xf32>
    %857 = vector.extract_strided_slice %806 {offsets = [0, 0, 0], sizes = [1, 16, 16], strides = [1, 1, 1]} : vector<3x16x16xf32> to vector<1x16x16xf32>
    %858 = vector.shape_cast %857 : vector<1x16x16xf32> to vector<16x16xf32>
    %859 = vector.shape_cast %856 : vector<4x8x16xf32> to vector<32x16xf32>
    %cst_216 = arith.constant dense<0.000000e+00> : vector<32x16xf32>
    %860 = tpu.matmul %859, %858, %cst_216 {dimension_numbers = #tpu.dot_dimension_numbers<[1], [0], [0], [1], [0, 0, 1, 1], [], []>} : vector<32x16xf32>, vector<16x16xf32>, vector<32x16xf32> -> vector<32x16xf32>
    %861 = vector.shape_cast %860 : vector<32x16xf32> to vector<4x8x16xf32>
    %cst_217 = arith.constant 0.000000e+00 : f32
    %862 = vector.broadcast %cst_217 : f32 to vector<4x8x16xf32>
    %863 = tpu.concatenate %862, %861 in 0 : vector<4x8x16xf32>, vector<4x8x16xf32> -> vector<8x8x16xf32>
    %864 = vector.extract_strided_slice %855 {offsets = [0, 0, 0], sizes = [6, 8, 16], strides = [1, 1, 1]} : vector<8x8x16xf32> to vector<6x8x16xf32>
    %865 = vector.extract_strided_slice %806 {offsets = [1, 0, 0], sizes = [1, 16, 16], strides = [1, 1, 1]} : vector<3x16x16xf32> to vector<1x16x16xf32>
    %866 = vector.shape_cast %865 : vector<1x16x16xf32> to vector<16x16xf32>
    %867 = vector.shape_cast %864 : vector<6x8x16xf32> to vector<48x16xf32>
    %cst_218 = arith.constant dense<0.000000e+00> : vector<48x16xf32>
    %868 = tpu.matmul %867, %866, %cst_218 {dimension_numbers = #tpu.dot_dimension_numbers<[1], [0], [0], [1], [0, 0, 1, 1], [], []>} : vector<48x16xf32>, vector<16x16xf32>, vector<48x16xf32> -> vector<48x16xf32>
    %869 = vector.shape_cast %868 : vector<48x16xf32> to vector<6x8x16xf32>
    %cst_219 = arith.constant 0.000000e+00 : f32
    %870 = vector.broadcast %cst_219 : f32 to vector<2x8x16xf32>
    %871 = tpu.concatenate %870, %869 in 0 : vector<2x8x16xf32>, vector<6x8x16xf32> -> vector<8x8x16xf32>
    %872 = arith.addf %863, %871 : vector<8x8x16xf32>
    %873 = vector.extract_strided_slice %806 {offsets = [2, 0, 0], sizes = [1, 16, 16], strides = [1, 1, 1]} : vector<3x16x16xf32> to vector<1x16x16xf32>
    %874 = vector.shape_cast %873 : vector<1x16x16xf32> to vector<16x16xf32>
    %875 = vector.shape_cast %855 : vector<8x8x16xf32> to vector<64x16xf32>
    %cst_220 = arith.constant dense<0.000000e+00> : vector<64x16xf32>
    %876 = tpu.matmul %875, %874, %cst_220 {dimension_numbers = #tpu.dot_dimension_numbers<[1], [0], [0], [1], [0, 0, 1, 1], [], []>} : vector<64x16xf32>, vector<16x16xf32>, vector<64x16xf32> -> vector<64x16xf32>
    %877 = vector.shape_cast %876 : vector<64x16xf32> to vector<8x8x16xf32>
    %878 = arith.addf %872, %877 : vector<8x8x16xf32>
    %c0_221 = arith.constant 0 : index
    %c0_222 = arith.constant 0 : index
    %879 = vector.load %arg16[%c0_221, %c0_222] : memref<1x16xf32, #tpu.memory_space<vmem>>, vector<1x16xf32>
    %880 = vector.shape_cast %879 : vector<1x16xf32> to vector<1x1x16xf32>
    %881 = vector.broadcast %880 : vector<1x1x16xf32> to vector<8x8x16xf32>
    %882 = arith.addf %878, %881 : vector<8x8x16xf32>
    %cst_223 = arith.constant 0.000000e+00 : f32
    %883 = vector.broadcast %cst_223 : f32 to vector<8x8x16xf32>
    %884 = arith.maximumf %882, %883 : vector<8x8x16xf32>
    %c0_224 = arith.constant 0 : index
    %c0_225 = arith.constant 0 : index
    %885 = vector.load %arg17[%c0_224, %c0_225] : memref<16x4xf32, #tpu.memory_space<vmem>>, vector<16x4xf32>
    %886 = vector.shape_cast %164 : vector<8x8x16xf32> to vector<64x16xf32>
    %cst_226 = arith.constant dense<0.000000e+00> : vector<64x4xf32>
    %887 = tpu.matmul %886, %885, %cst_226 {dimension_numbers = #tpu.dot_dimension_numbers<[1], [0], [0], [1], [0, 0, 1, 1], [], []>} : vector<64x16xf32>, vector<16x4xf32>, vector<64x4xf32> -> vector<64x4xf32>
    %888 = vector.shape_cast %887 : vector<64x4xf32> to vector<8x8x4xf32>
    %c0_227 = arith.constant 0 : index
    %c0_228 = arith.constant 0 : index
    %889 = vector.load %arg18[%c0_227, %c0_228] : memref<16x4xf32, #tpu.memory_space<vmem>>, vector<16x4xf32>
    %890 = vector.shape_cast %802 : vector<8x8x16xf32> to vector<64x16xf32>
    %cst_229 = arith.constant dense<0.000000e+00> : vector<64x4xf32>
    %891 = tpu.matmul %890, %889, %cst_229 {dimension_numbers = #tpu.dot_dimension_numbers<[1], [0], [0], [1], [0, 0, 1, 1], [], []>} : vector<64x16xf32>, vector<16x4xf32>, vector<64x4xf32> -> vector<64x4xf32>
    %892 = vector.shape_cast %891 : vector<64x4xf32> to vector<8x8x4xf32>
    %893 = arith.addf %888, %892 : vector<8x8x4xf32>
    %c0_230 = arith.constant 0 : index
    %c0_231 = arith.constant 0 : index
    %894 = vector.load %arg19[%c0_230, %c0_231] : memref<16x4xf32, #tpu.memory_space<vmem>>, vector<16x4xf32>
    %895 = vector.shape_cast %803 : vector<8x8x16xf32> to vector<64x16xf32>
    %cst_232 = arith.constant dense<0.000000e+00> : vector<64x4xf32>
    %896 = tpu.matmul %895, %894, %cst_232 {dimension_numbers = #tpu.dot_dimension_numbers<[1], [0], [0], [1], [0, 0, 1, 1], [], []>} : vector<64x16xf32>, vector<16x4xf32>, vector<64x4xf32> -> vector<64x4xf32>
    %897 = vector.shape_cast %896 : vector<64x4xf32> to vector<8x8x4xf32>
    %898 = arith.addf %893, %897 : vector<8x8x4xf32>
    %c0_233 = arith.constant 0 : index
    %c0_234 = arith.constant 0 : index
    %899 = vector.load %arg20[%c0_233, %c0_234] : memref<16x4xf32, #tpu.memory_space<vmem>>, vector<16x4xf32>
    %900 = vector.shape_cast %884 : vector<8x8x16xf32> to vector<64x16xf32>
    %cst_235 = arith.constant dense<0.000000e+00> : vector<64x4xf32>
    %901 = tpu.matmul %900, %899, %cst_235 {dimension_numbers = #tpu.dot_dimension_numbers<[1], [0], [0], [1], [0, 0, 1, 1], [], []>} : vector<64x16xf32>, vector<16x4xf32>, vector<64x4xf32> -> vector<64x4xf32>
    %902 = vector.shape_cast %901 : vector<64x4xf32> to vector<8x8x4xf32>
    %903 = arith.addf %898, %902 : vector<8x8x4xf32>
    %c0_236 = arith.constant 0 : index
    %c0_237 = arith.constant 0 : index
    %904 = vector.load %arg21[%c0_236, %c0_237] : memref<1x4xf32, #tpu.memory_space<vmem>>, vector<1x4xf32>
    %905 = vector.shape_cast %904 : vector<1x4xf32> to vector<1x1x4xf32>
    %906 = vector.broadcast %905 : vector<1x1x4xf32> to vector<8x8x4xf32>
    %907 = arith.addf %903, %906 : vector<8x8x4xf32>
    %c0_238 = arith.constant 0 : index
    %c0_239 = arith.constant 0 : index
    %c0_240 = arith.constant 0 : index
    %908 = vector.load %arg22[%c0_238, %c0_239, %c0_240] : memref<8x8x4xf32, #tpu.memory_space<vmem>>, vector<8x8x4xf32>
    tpu.vector_store %arg22[%c0_238, %c0_239, %c0_240], %907 {strides = array<i32>} : memref<8x8x4xf32, #tpu.memory_space<vmem>>, vector<8x8x4xf32>,
    return
  }
}

</mosaic_0001>

<bundles_post_ra>
// kernel: generator_forward.1
= control target key start
LH: loop header
LB: loop body
LE: loop exit
PB: predicated region body
PF: predicated region fallthrough
CT: control target
= control target key end

     0   :  { %s7144_s0 = inlined_call_operand.vmem [shape: f32[8,8,4], index: 0, kind: input, shape index: {}]   ;;  %s7145_s1 = inlined_call_operand.hbm [shape: f32[8,8], index: 1, kind: input, shape index: {}]   ;;  %s7146_s2 = inlined_call_operand.hbm [shape: f32[8,8], index: 2, kind: input, shape index: {}]   ;;  %s7147_s3 = inlined_call_operand.vmem [shape: f32[4,16], index: 3, kind: input, shape index: {}]   ;;  %s7148_s4 = inlined_call_operand.vmem [shape: f32[1,16], index: 4, kind: input, shape index: {}]   ;;  %s7149_s5 = inlined_call_operand.vmem [shape: f32[2,4,10], index: 5, kind: input, shape index: {}]   ;;  %s7150_s6 = inlined_call_operand.vmem [shape: f32[2,8,18], index: 6, kind: input, shape index: {}]   ;;  %s7151_s7 = inlined_call_operand.hbm [shape: f32[2,16,48], index: 7, kind: input, shape index: {}]   ;;  %s7152_s8 = inlined_call_operand.hbm [shape: f32[2,16,48], index: 8, kind: input, shape index: {}]   ;;  %s7153_s9 = inlined_call_operand.hbm [shape: f32[2,1,48], index: 9, kind: input, shape index: {}]   ;;  %s7154_s10 = inlined_call_operand.hbm [shape: f32[2,1,48], index: 10, kind: input, shape index: {}]   ;;  %s7155_s11 = inlined_call_operand.vmem [shape: f32[2,8,16], index: 11, kind: input, shape index: {}]   ;;  %s7156_s12 = inlined_call_operand.vmem [shape: f32[3,16,16], index: 12, kind: input, shape index: {}]   ;;  %s7157_s13 = inlined_call_operand.vmem [shape: f32[3,16,16], index: 13, kind: input, shape index: {}]   ;;  %s7158_s14 = inlined_call_operand.hbm [shape: f32[1,16], index: 14, kind: input, shape index: {}]   ;;  %s7159_s15 = inlined_call_operand.hbm [shape: f32[3,16,16], index: 15, kind: input, shape index: {}]   ;;  %s7160_s16 = inlined_call_operand.hbm [shape: f32[1,16], index: 16, kind: input, shape index: {}]   ;;  %s7161_s17 = inlined_call_operand.vmem [shape: f32[16,4], index: 17, kind: input, shape index: {}]   ;;  %s7162_s18 = inlined_call_operand.vmem [shape: f32[16,4], index: 18, kind: input, shape index: {}]   ;;  %s7163_s19 = inlined_call_operand.vmem [shape: f32[16,4], index: 19, kind: input, shape index: {}]   ;;  %s7164_s20 = inlined_call_operand.vmem [shape: f32[16,4], index: 20, kind: input, shape index: {}]   ;;  %s7165_s21 = inlined_call_operand.hbm [shape: f32[1,4], index: 21, kind: input, shape index: {}]   ;;  %s7166_s22 = inlined_call_operand.vmem [shape: f32[8,8,4], index: 22, kind: output, shape index: {0}]   ;;  %s7167_s23 = inlined_call_operand.hbm [shape: f32[8,8,16], index: 23, kind: output, shape index: {1}]   ;;  %s7168_s24 = inlined_call_operand.hbm [shape: f32[8,8,16], index: 24, kind: output, shape index: {2}]  }
   0x1   :  { %7173 = sst [smem:[#allocation32_spill]] %s7144_s0 }
   0x2   :  { %7174 = sst [smem:[#allocation33_spill]] %s7145_s1 }
   0x3   :  { %7175 = sst [smem:[#allocation34_spill]] %s7146_s2 }
   0x4   :  { %7176 = sst [smem:[#allocation35_spill]] %s7147_s3 }
   0x5   :  { %7177 = sst [smem:[#allocation36_spill]] %s7148_s4 }
   0x6   :  { %7178 = sst [smem:[#allocation37_spill]] %s7149_s5 }
   0x7   :  { %7179 = sst [smem:[#allocation38_spill]] %s7150_s6 }
   0x8   :  { %7180 = sst [smem:[#allocation39_spill]] %s7151_s7 }
   0x9   :  { %7181 = sst [smem:[#allocation40_spill]] %s7152_s8 }
   0xa   :  { %7182 = sst [smem:[#allocation41_spill]] %s7166_s22 }
   0xb   :  { %7183 = sst [smem:[#allocation42_spill]] %s7168_s24 }
   0xc   :  { %30 = vsyncpa [#allocation5], 0 }
   0xd   :  { %31 = vsyncpa [#allocation8], 0 }
   0xe   :  { %32 = vsyncpa [#allocation11], 0 }
   0xf   :  { %33 = vsyncpa [#allocation14], 0 }
  0x10   :  { %34 = vsyncpa [#allocation17], 0 }
  0x11   :  { %35 = vsyncpa [#allocation20], 0 }
  0x12   :  { %36 = vsyncpa [#allocation6], 0  ;;  %s7184_s27 = sld [smem:[#allocation34_spill]] }
  0x18   :  { %s56_s28 = sshll.u32 %s7184_s27, 4  ;;  %s57_s28 = int_to_ptr.hbm [resolvable:$true] %s56_s28 }
  0x19   :  { %37 = vsyncpa [#allocation23], 0  ;;  %s5660_s6 = smov [#allocation7]   ;;  %s7185_s7 = sld [smem:[#allocation40_spill]] }
  0x1a   :  { %s58_s2 = sshll.u32 %s5660_s6, 4  ;;  %s5661_s3 = smov [#allocation10]   ;;  %s59_s2 = int_to_ptr.vmem [resolvable:$true] %s58_s2 }
  0x1b   :  { %61 = dma.hbm_to_vmem [thread:$0]  %s57_s28, 128, %s59_s2, [#allocation8]  }
  0x1c   :  { %s89_s25 = sshll.u32 %s5661_s3, 4  ;;  %s5662_s8 = smov 128   ;;  %s90_s25 = int_to_ptr.vmem [resolvable:$true] %s89_s25 }
  0x1d   :  { %s5663_s4 = smov 8   ;;  %s113_s26 = sshll.u32 %s7154_s10, 4  ;;  %s114_s26 = int_to_ptr.hbm [resolvable:$true] %s113_s26 }
  0x1e   :  { %s5664_s27 = smov [#allocation13]   ;;  %s143_s29 = sshll.u32 %s7159_s15, 4  ;;  %s144_s29 = int_to_ptr.hbm [resolvable:$true] %s143_s29 }
  0x1f   :  { %s87_s30 = sshll.u32 %s7185_s7, 4  ;;  %s115_s28 = sshll.u32 %s5664_s27, 4  ;;  %s88_s30 = int_to_ptr.hbm [resolvable:$true] %s87_s30  ;;  %s116_s28 = int_to_ptr.vmem [resolvable:$true] %s115_s28 }
  0x20   :  { %95 = dma.hbm_to_vmem [thread:$0]  %s88_s30, 512, %s90_s25, [#allocation11], %s5662_s8, %s5662_s8, %s5663_s4  }
  0x21   :  { %s5665_s0 = smov 16   ;;  %s5666_s7 = smov 1  }
  0x22   :  { %121 = dma.hbm_to_vmem [thread:$0]  %s114_s26, 32, %s116_s28, [#allocation14], %s5665_s0, %s5665_s0, %s5666_s7  }
  0x23   :  { %s5667_s30 = smov [#allocation16]   ;;  %s7186_s10 = sld [smem:[#allocation33_spill]] }
  0x24   :  { %s145_s3 = sshll.u32 %s5667_s30, 4  ;;  %s7187_s6 = sld [smem:[#allocation39_spill]]  ;;  %s146_s3 = int_to_ptr.vmem [resolvable:$true] %s145_s3 }
  0x25   :  { %151 = dma.hbm_to_vmem [thread:$0]  %s144_s29, 768, %s146_s3, [#allocation17], %s5662_s8, %s5662_s8, %s5663_s4  }
  0x26   :  { %s5668_s22 = smov [#allocation4]   ;;  %s5669_s26 = smov [#allocation9]  }
  0x27   :  { %s47_s24 = sshll.u32 %s5668_s22, 4  ;;  %s76_s28 = sshll.u32 %s5669_s26, 4  ;;  %s48_s24 = int_to_ptr.vmem [resolvable:$true] %s47_s24  ;;  %s77_s28 = int_to_ptr.vmem [resolvable:$true] %s76_s28 }
  0x28   :  { %s100_s1 = sshll.u32 %s7153_s9, 4  ;;  %s5670_s22 = smov [#allocation12]   ;;  %s101_s1 = int_to_ptr.hbm [resolvable:$true] %s100_s1 }
  0x29   :  { %s45_s5 = sshll.u32 %s7186_s10, 4  ;;  %s133_s10 = sshll.u32 %s7158_s14, 4  ;;  %s46_s5 = int_to_ptr.hbm [resolvable:$true] %s45_s5  ;;  %s134_s10 = int_to_ptr.hbm [resolvable:$true] %s133_s10 }
  0x2a   :  { %s74_s2 = sshll.u32 %s7187_s6, 4  ;;  %s102_s15 = sshll.u32 %s5670_s22, 4  ;;  %s75_s2 = int_to_ptr.hbm [resolvable:$true] %s74_s2  ;;  %s103_s15 = int_to_ptr.vmem [resolvable:$true] %s102_s15 }
  0x2b   :  { %50 = dma.hbm_to_vmem [thread:$0]  %s46_s5, 128, %s48_s24, [#allocation5]  }
  0x2c   :  { %82 = dma.hbm_to_vmem [thread:$0]  %s75_s2, 512, %s77_s28, [#allocation8], %s5662_s8, %s5662_s8, %s5663_s4  }
  0x2d   :  { %108 = dma.hbm_to_vmem [thread:$0]  %s101_s1, 32, %s103_s15, [#allocation11], %s5665_s0, %s5665_s0, %s5666_s7  }
  0x2e   :  { %s5671_s24 = smov [#allocation15]   ;;  %s157_s6 = sshll.u32 %s7160_s16, 4  ;;  %s158_s6 = int_to_ptr.hbm [resolvable:$true] %s157_s6 }
  0x2f   :  { %s135_s9 = sshll.u32 %s5671_s24, 4  ;;  %s176_s14 = sshll.u32 %s7165_s21, 4  ;;  %s136_s9 = int_to_ptr.vmem [resolvable:$true] %s135_s9  ;;  %s177_s14 = int_to_ptr.hbm [resolvable:$true] %s176_s14 }
  0x30   :  { %138 = dma.hbm_to_vmem [thread:$0]  %s134_s10, 16, %s136_s9, [#allocation14]  }
  0x31   :  { %s5672_s28 = smov [#allocation18]   ;;  %s5673_s25 = smov [#allocation19]  }
  0x32   :  { %s159_s30 = sshll.u32 %s5672_s28, 4  ;;  %s178_s7 = sshll.u32 %s5673_s25, 4  ;;  %s160_s30 = int_to_ptr.vmem [resolvable:$true] %s159_s30  ;;  %s179_s7 = int_to_ptr.vmem [resolvable:$true] %s178_s7 }
  0x33   :  { %162 = dma.hbm_to_vmem [thread:$0]  %s158_s6, 16, %s160_s30, [#allocation17]  }
  0x34   :  { %181 = dma.hbm_to_vmem [thread:$0]  %s177_s14, 16, %s179_s7, [#allocation20]  }
  0x35   :  { %5644 = dma.done.wait [#allocation5], 128  }
  0x36   :  { %5645 = vsyncadd [#allocation5], 4294967168 }
  0x37   :  { %5646 = dma.done.wait [#allocation8], 640  }
  0x38   :  { %5647 = vsyncadd [#allocation8], 4294966656 }
  0x39   :  { %5648 = dma.done.wait [#allocation11], 544  }
  0x3a   :  { %5649 = vsyncadd [#allocation11], 4294966752 }
  0x3b   :  { %5650 = dma.done.wait [#allocation14], 48  }
  0x3c   :  { %5651 = vsyncadd [#allocation14], 4294967248 }
  0x3d   :  { %5652 = dma.done.wait [#allocation17], 784  }
  0x3e   :  { %5653 = vsyncadd [#allocation17], 4294966512 }
  0x3f   :  { %5654 = dma.done.wait [#allocation20], 16  }
  0x40   :  { %5655 = vsyncadd [#allocation20], 4294967280  ;;  %vm259_vm0 = vcmask 1043456   ;;  %vm234_vm1 = vcmask 31744   ;;  %vm316_vm2 = vcmask 64512   ;;  %s7188_s1 = sld [smem:[#allocation35_spill]] }
  0x41   :  { %s7189_s10 = sld [smem:[#allocation32_spill]]  ;;  %v230_v2 = vld [vmem:[#allocation4] sm:$0xff]  ;;  %vm494_vm3 = vcmask 130048   ;;  %s5674_s22 = smov 119   ;;  %v5675_v50 = vmov 8   ;;  %vm554_vm4 = vcmask 7168  }
  0x42   :  { %v317_v3 = vsel %vm316_vm2, %v230_v2, 0.0  ;;  %5060 = vset.pattern.permute.xlu2 %v5675_v50  ;;  %5061 = vset.pattern.permute.xlu1 %v5675_v50  ;;  %v5676_v60 = vmov 1.0   ;;  %s7192_s27 = sld [smem:[#allocation38_spill]]  ;;  %s5677_s26 = smov 111  }
  0x43   :  { %318 = vadd.xlane.f32.xlu0 %v317_v3  ;;  %s5680_s7 = smov 32   ;;  %s5681_s16 = smov 112  }
  0x44   :  { %5062 = vset.pattern.permute.xlu0 %v5675_v50  ;;  %s4705_s2 = sshll.u32 %s7167_s23, 4  ;;  %s5683_s28 = smov [#allocation22]   ;;  %s4706_s2 = int_to_ptr.hbm [resolvable:$true] %s4705_s2 }
  0x45   :  { %s4716_s30 = sshll.u32 %s5683_s28, 4  ;;  %s4717_s30 = int_to_ptr.vmem [resolvable:$true] %s4716_s30 }
  0x46   :  { %v233_v0 = vld [vmem:[%s7188_s1] sm:$0xf]  ;;  %s7190_s1 = sld [smem:[#allocation36_spill]] }
  0x47   :  { %v5860_v1 = vld [vmem:[%s7189_s10] sm:$0xff]  ;;  %4743 = vmatpush.msk.msra.mxu0 %vm259_vm0, %v233_v0  ;;  %5033 = vmatpush.msk.msra.mxu1 %vm259_vm0, %v233_v0  ;;  %v5870_v4 = vld [vmem:[%s7189_s10 + $0x8] sm:$0xff]  ;;  %v5875_v5 = vld [vmem:[%s7189_s10 + $0x38] sm:$0xff] }
  0x48   :  { %4744 = vmatmul.msk.f32.vlgmr.msra.gmra.mxu0 %vm234_vm1, %v5860_v1  ;;  %4751 = vmatmul.msk.f32.vlgmr.msra.gmra.mxu1 %vm234_vm1, %v5875_v5  ;;  %v5884_v6 = vld [vmem:[%s7189_s10 + $0x10] sm:$0xff]  ;;  %v5891_v7 = vld [vmem:[%s7189_s10 + $0x18] sm:$0xff]  ;;  %v5898_v8 = vld [vmem:[%s7189_s10 + $0x20] sm:$0xff] }
  0x49   :  { %v5905_v9 = vld [vmem:[%s7189_s10 + $0x28] sm:$0xff]  ;;  %v5912_v10 = vld [vmem:[%s7189_s10 + $0x30] sm:$0xff]  ;;  %s7191_s10 = sld [smem:[#allocation37_spill]] }
  0x4c   :  { %v5066_v13 = vld [vmem:[%s7190_s1] ss:$0 sm:$0xff] }
  0x4f   :  { %v503_v30 = vld [vmem:[%s7191_s10] sm:$0xf] }
  0x50   :  { %4745 = vmatmul.msk.f32.gmra.mxu0 %vm234_vm1, %v5870_v4 }
  0x58   :  { %4746 = vmatmul.msk.f32.gmra.mxu0 %vm234_vm1, %v5884_v6 }
  0x60   :  { %4747 = vmatmul.msk.f32.gmra.mxu0 %vm234_vm1, %v5891_v7 }
  0x68   :  { %4748 = vmatmul.msk.f32.gmra.mxu0 %vm234_vm1, %v5898_v8 }
  0x70   :  { %4749 = vmatmul.msk.f32.gmra.mxu0 %vm234_vm1, %v5905_v9 }
  0x78   :  { %4750 = vmatmul.msk.f32.gmra.mxu0 %vm234_vm1, %v5912_v10 }
  0xb6   :  { %v319_v11 = vpop.xlane.xlu0 %318 }
  0xb7   :  { %v320_v12 = vmax.f32 %v319_v11, 1e-06 }
  0xb9   :  { %5074 = vrcp.f32 %v320_v12 }
  0xbf   :  { %v5075_v14 = vpop.eup %5074 }
  0xc0   :  { %v322_v17 = vmul.f32 %v5075_v14, %v230_v2  ;;  %v6034_v14 = vld [vmem:[#allocation7] sm:$0xff] }
  0xc1   :  { %vm232_vm5 = vcmp.gt.f32.partialorder %v6034_v14, 0.0 }
  0xc5   :  { %v280_v15 = vpop.f32.mrf.mxu0  ;;  %v301_v24 = vpop.f32.mrf.mxu1 }
  0xc6   :  { %v308_v16 = vadd.f32 %v5066_v13, %v280_v15  ;;  %v315_v27 = vadd.f32 %v5066_v13, %v301_v24 }
  0xc8   :  { %341 = vmatpush.msrb.mxu1 %v308_v16 }
  0xc9   :  { %4752 = vmatmul.msk.f32.vlgmr.msrb.gmra.mxu1 %vm316_vm2, %v322_v17 }
  0xcd   :  { %v283_v18 = vpop.f32.mrf.mxu0 }
  0xce   :  { %v309_v19 = vadd.f32 %v5066_v13, %v283_v18 }
  0xd0   :  { %361 = vmatpush.msra.mxu3 %v309_v19 }
  0xd1   :  { %4753 = vmatmul.msk.f32.vlgmr.msra.gmra.mxu3 %vm316_vm2, %v322_v17 }
  0xd5   :  { %v286_v20 = vpop.f32.mrf.mxu0 }
  0xd6   :  { %v310_v21 = vadd.f32 %v5066_v13, %v286_v20 }
  0xd8   :  { %381 = vmatpush.msrb.mxu3 %v310_v21 }
  0xd9   :  { %4754 = vmatmul.msk.f32.vlgmr.msrb.gmra.mxu3 %vm316_vm2, %v322_v17 }
  0xdd   :  { %v289_v22 = vpop.f32.mrf.mxu0 }
  0xde   :  { %v311_v23 = vadd.f32 %v5066_v13, %v289_v22 }
  0xe0   :  { %401 = vmatpush.msra.mxu1 %v311_v23 }
  0xe1   :  { %4755 = vmatmul.msk.f32.vlgmr.msra.gmra.mxu1 %vm316_vm2, %v322_v17 }
  0xe5   :  { %v292_v25 = vpop.f32.mrf.mxu0 }
  0xe6   :  { %v312_v26 = vadd.f32 %v5066_v13, %v292_v25 }
  0xe8   :  { %421 = vmatpush.msra.mxu2 %v312_v26 }
  0xe9   :  { %4756 = vmatmul.msk.f32.vlgmr.msra.gmra.mxu2 %vm316_vm2, %v322_v17 }
  0xea   :  { %481 = vmatpush.msrb.mxu2 %v315_v27 }
  0xed   :  { %v295_v28 = vpop.f32.mrf.mxu0 }
  0xee   :  { %v313_v29 = vadd.f32 %v5066_v13, %v295_v28 }
  0xf0   :  { %441 = vmatpush.msra.mxu3 %v313_v29 }
  0xf1   :  { %4757 = vmatmul.msk.f32.vlgmr.msra.gmra.mxu3 %vm316_vm2, %v322_v17  ;;  %4759 = vmatmul.msk.f32.vlgmr.msrb.gmra.mxu2 %vm316_vm2, %v322_v17 }
  0xf2   :  { %4760 = vmatpush.msk.msrb.mxu3 %vm259_vm0, %v503_v30 }
  0xf5   :  { %v298_v31 = vpop.f32.mrf.mxu0 }
  0xf6   :  { %v314_v32 = vadd.f32 %v5066_v13, %v298_v31 }
  0xf8   :  { %461 = vmatpush.msrb.mxu1 %v314_v32 }
  0xf9   :  { %4758 = vmatmul.msk.f32.vlgmr.msrb.gmra.mxu1 %vm316_vm2, %v322_v17  ;;  %4761 = vmatmul.msk.f32.vlgmr.msrb.gmra.mxu3 %vm234_vm1, %v5860_v1 }
 0x101   :  { %4762 = vmatmul.msk.f32.gmra.mxu3 %vm234_vm1, %v5870_v4 }
 0x109   :  { %4763 = vmatmul.msk.f32.gmra.mxu3 %vm234_vm1, %v5884_v6 }
 0x111   :  { %4764 = vmatmul.msk.f32.gmra.mxu3 %vm234_vm1, %v5891_v7 }
 0x119   :  { %4765 = vmatmul.msk.f32.gmra.mxu3 %vm234_vm1, %v5898_v8 }
 0x121   :  { %4766 = vmatmul.msk.f32.gmra.mxu3 %vm234_vm1, %v5905_v9 }
 0x129   :  { %4767 = vmatmul.msk.f32.gmra.mxu3 %vm234_vm1, %v5912_v10 }
 0x131   :  { %4768 = vmatmul.msk.f32.gmra.mxu3 %vm234_vm1, %v5875_v5 }
 0x146   :  { %v343_v33 = vpop.f32.mrf.mxu1 }
 0x147   :  { %v5947_v34 = vmax.f32 %v343_v33, 0.0 }
 0x149   :  { %495 = vst.msk [vmem:[#allocation21] sm:$0xff] %vm494_vm3, %v5947_v34 }
 0x154   :  { %v363_v35 = vpop.f32.mrf.mxu3 }
 0x155   :  { %v5951_v36 = vmax.f32 %v363_v35, 0.0 }
 0x157   :  { %496 = vst.msk [vmem:[#allocation21 + $0x8] sm:$0xff] %vm494_vm3, %v5951_v36 }
 0x15c   :  { %v383_v37 = vpop.f32.mrf.mxu3 }
 0x15d   :  { %v5955_v38 = vmax.f32 %v383_v37, 0.0 }
 0x15e   :  { %v403_v39 = vpop.f32.mrf.mxu1 }
 0x15f   :  { %v5957_v40 = vmax.f32 %v403_v39, 0.0  ;;  %497 = vst.msk [vmem:[#allocation21 + $0x10] sm:$0xff] %vm494_vm3, %v5955_v38 }
 0x161   :  { %498 = vst.msk [vmem:[#allocation21 + $0x18] sm:$0xff] %vm494_vm3, %v5957_v40 }
 0x16c   :  { %v423_v41 = vpop.f32.mrf.mxu2 }
 0x16d   :  { %v5963_v42 = vmax.f32 %v423_v41, 0.0 }
 0x16f   :  { %499 = vst.msk [vmem:[#allocation21 + $0x20] sm:$0xff] %vm494_vm3, %v5963_v42 }
 0x174   :  { %v443_v43 = vpop.f32.mrf.mxu3  ;;  %v483_v44 = vpop.f32.mrf.mxu2 }
 0x175   :  { %v5967_v45 = vmax.f32 %v443_v43, 0.0  ;;  %v5969_v46 = vmax.f32 %v483_v44, 0.0 }
 0x176   :  { %v463_v47 = vpop.f32.mrf.mxu1 }
 0x177   :  { %500 = vst.msk [vmem:[#allocation21 + $0x28] sm:$0xff] %vm494_vm3, %v5967_v45  ;;  %v5973_v48 = vmax.f32 %v463_v47, 0.0 }
 0x178   :  { %502 = vst.msk [vmem:[#allocation21 + $0x38] sm:$0xff] %vm494_vm3, %v5969_v46 }
 0x179   :  { %501 = vst.msk [vmem:[#allocation21 + $0x30] sm:$0xff] %vm494_vm3, %v5973_v48 }
 0x17c   :  { %v527_v49 = vpop.f32.mrf.mxu3 }
 0x17d   :  { %552 = vrot.lane.b32.xlu0 %v527_v49, %s5674_s22 }
 0x184   :  { %v5980_v51 = vpop.f32.mrf.mxu3 }
 0x185   :  { %581 = vrot.lane.b32.xlu1 %v5980_v51, %s5674_s22 }
 0x18c   :  { %v5984_v52 = vpop.f32.mrf.mxu3 }
 0x18d   :  { %606 = vrot.lane.b32.xlu1 %v5984_v52, %s5674_s22  ;;  %981 = vmatpush.msrb.mxu0 %v5984_v52 }
 0x194   :  { %v536_v53 = vpop.f32.mrf.mxu3 }
 0x195   :  { %631 = vrot.lane.b32.xlu2 %v536_v53, %s5674_s22 }
 0x19c   :  { %v5990_v54 = vpop.f32.mrf.mxu3 }
 0x19d   :  { %656 = vrot.lane.b32.xlu2 %v5990_v54, %s5674_s22 }
 0x1a4   :  { %v5994_v55 = vpop.f32.mrf.mxu3 }
 0x1a5   :  { %756 = vperm.xlu2 %5060, %v527_v49   ;;  %681 = vrot.lane.b32.xlu0 %v5994_v55, %s5674_s22 }
 0x1a6   :  { %1050 = vmatpush.msra.mxu0 %v5994_v55 }
 0x1ac   :  { %v5999_v56 = vpop.f32.mrf.mxu3 }
 0x1ad   :  { %780 = vperm.xlu2 %5060, %v5999_v56   ;;  %706 = vrot.lane.b32.xlu1 %v5999_v56, %s5674_s22 }
 0x1b4   :  { %v6004_v57 = vpop.f32.mrf.mxu3 }
 0x1b5   :  { %768 = vperm.xlu1 %5061, %v536_v53   ;;  %731 = vrot.lane.b32.xlu2 %v6004_v57, %s5674_s22 }
 0x1ef   :  { %v553_v58 = vpop.permute.xlu0 %552  ;;  %v632_v59 = vpop.permute.xlu2 %631 }
 0x1f0   :  { %4769 = vmatpush.xpose.msk.msra.mxu1 %vm554_vm4, %v553_v58 }
 0x1f3   :  { %4770 = vmatmul.msk.f32.vlgmr.msra.gmra.mxu1 %vm554_vm4, %v5676_v60 }
 0x1f7   :  { %v582_v61 = vpop.permute.xlu1 %581  ;;  %v657_v62 = vpop.permute.xlu2 %656 }
 0x1f8   :  { %4771 = vmatpush.xpose.msk.msra.mxu2 %vm554_vm4, %v582_v61 }
 0x1fb   :  { %4772 = vmatmul.msk.f32.vlgmr.msra.gmra.mxu2 %vm554_vm4, %v5676_v60 }
 0x1fc   :  { %4775 = vmatpush.xpose.msk.msrb.mxu2 %vm554_vm4, %v632_v59 }
 0x1ff   :  { %v607_v63 = vpop.permute.xlu1 %606  ;;  %v757_v0 = vpop.permute.xlu2 %756 }
 0x200   :  { %4773 = vmatpush.xpose.msk.msrb.mxu1 %vm554_vm4, %v607_v63 }
 0x203   :  { %4776 = vmatmul.msk.f32.vlgmr.msrb.gmra.mxu2 %vm554_vm4, %v5676_v60  ;;  %4774 = vmatmul.msk.f32.vlgmr.msrb.gmra.mxu1 %vm554_vm4, %v5676_v60 }
 0x204   :  { %4777 = vmatpush.xpose.msk.msra.mxu1 %vm554_vm4, %v657_v62 }
 0x207   :  { %v781_v2 = vpop.permute.xlu2 %780 }
 0x20b   :  { %4778 = vmatmul.msk.f32.vlgmr.msra.gmra.mxu1 %vm554_vm4, %v5676_v60 }
 0x20f   :  { %v732_v3 = vpop.permute.xlu2 %731 }
 0x217   :  { %v682_v11 = vpop.permute.xlu0 %681 }
 0x218   :  { %4779 = vmatpush.xpose.msk.msra.mxu2 %vm554_vm4, %v682_v11 }
 0x21b   :  { %4780 = vmatmul.msk.f32.vlgmr.msra.gmra.mxu2 %vm554_vm4, %v5676_v60 }
 0x21c   :  { %4783 = vmatpush.xpose.msk.msrb.mxu2 %vm554_vm4, %v732_v3 }
 0x21f   :  { %v707_v12 = vpop.permute.xlu1 %706 }
 0x220   :  { %958 = vmatpush.msra.mxu2 %v5980_v51  ;;  %4781 = vmatpush.xpose.msk.msrb.mxu1 %vm554_vm4, %v707_v12 }
 0x223   :  { %4782 = vmatmul.msk.f32.vlgmr.msrb.gmra.mxu1 %vm554_vm4, %v5676_v60  ;;  %4784 = vmatmul.msk.f32.vlgmr.msrb.gmra.mxu2 %vm554_vm4, %v5676_v60 }
 0x224   :  { %935 = vmatpush.msra.mxu1 %v527_v49  ;;  %1027 = vmatpush.msrb.mxu2 %v5990_v54 }
 0x226   :  { %1004 = vmatpush.msrb.mxu1 %v536_v53 }
 0x227   :  { %v769_v21 = vpop.permute.xlu1 %768 }
 0x270   :  { %v577_v13 = vpop.f32.mrf.mxu1 }
 0x271   :  { %v787_v15 = vadd.f32 %v757_v0, %v577_v13 }
 0x273   :  { %v803_v16 = vmul.f32 0.2, %v787_v15  ;;  %vm795_vm6 = vcmp.gt.f32.partialorder %v787_v15, 0.0 }
 0x275   :  { %v811_v17 = vsel %vm795_vm6, %v787_v15, %v803_v16 }
 0x276   :  { %v821_v18 = vsel %vm232_vm5, %v811_v17, -9e+15 }
 0x277   :  { %v829_v19 = vsel %vm316_vm2, %v821_v18, -inf }
 0x278   :  { %830 = vmax.xlane.f32.xlu1 %v829_v19 }
 0x27e   :  { %v602_v20 = vpop.f32.mrf.mxu2 }
 0x280   :  { %v6042_v27 = vpop.f32.mrf.mxu1 }
 0x286   :  { %v652_v22 = vpop.f32.mrf.mxu2 }
 0x287   :  { %v790_v23 = vadd.f32 %v769_v21, %v652_v22 }
 0x288   :  { %v677_v29 = vpop.f32.mrf.mxu1 }
 0x289   :  { %v806_v24 = vmul.f32 0.2, %v790_v23  ;;  %vm798_vm7 = vcmp.gt.f32.partialorder %v790_v23, 0.0 }
 0x28b   :  { %v814_v25 = vsel %vm798_vm7, %v790_v23, %v806_v24 }
 0x28c   :  { %v824_v26 = vsel %vm232_vm5, %v814_v25, -9e+15 }
 0x28d   :  { %v838_v28 = vsel %vm316_vm2, %v824_v26, -inf }
 0x28e   :  { %839 = vmax.xlane.f32.xlu0 %v838_v28 }
 0x29e   :  { %v6064_v24 = vpop.f32.mrf.mxu2 }
 0x2a0   :  { %v727_v30 = vpop.f32.mrf.mxu1 }
 0x2a1   :  { %v793_v31 = vadd.f32 %v781_v2, %v727_v30 }
 0x2a3   :  { %v809_v32 = vmul.f32 0.2, %v793_v31  ;;  %vm801_vm8 = vcmp.gt.f32.partialorder %v793_v31, 0.0 }
 0x2a5   :  { %v817_v33 = vsel %vm801_vm8, %v793_v31, %v809_v32 }
 0x2a6   :  { %v827_v35 = vsel %vm232_vm5, %v817_v33, -9e+15  ;;  %v752_v31 = vpop.f32.mrf.mxu2 }
 0x2a7   :  { %v847_v37 = vsel %vm316_vm2, %v827_v35, -inf }
 0x2a8   :  { %848 = vmax.xlane.f32.xlu2 %v847_v37 }
 0x2eb   :  { %v831_v39 = vpop.xlane.xlu1 %830 }
 0x2ec   :  { %v853_v41 = vsub.f32 %v821_v18, %v831_v39 }
 0x2ee   :  { %v861_v43 = vmul.f32 1.442695, %v853_v41 }
 0x2f0   :  { %5076 = vpow2.f32 %v861_v43 }
 0x2f6   :  { %v5077_v44 = vpop.eup %5076 }
 0x2f7   :  { %v877_v47 = vsel %vm316_vm2, %v5077_v44, 0.0 }
 0x2f8   :  { %878 = vadd.xlane.f32.xlu1 %v877_v47 }
 0x301   :  { %v840_v49 = vpop.xlane.xlu0 %839 }
 0x302   :  { %v856_v50 = vsub.f32 %v824_v26, %v840_v49 }
 0x304   :  { %v867_v53 = vmul.f32 1.442695, %v856_v50 }
 0x306   :  { %5078 = vpow2.f32 %v867_v53 }
 0x30c   :  { %v5079_v58 = vpop.eup %5078 }
 0x30d   :  { %v886_v59 = vsel %vm316_vm2, %v5079_v58, 0.0 }
 0x30e   :  { %887 = vadd.xlane.f32.xlu0 %v886_v59 }
 0x311   :  { %760 = vperm.xlu1 %5061, %v5980_v51  }
 0x31b   :  { %v849_v61 = vpop.xlane.xlu2 %848 }
 0x31c   :  { %v859_v62 = vsub.f32 %v827_v35, %v849_v61 }
 0x31e   :  { %v873_v63 = vmul.f32 1.442695, %v859_v62 }
 0x320   :  { %5080 = vpow2.f32 %v873_v63 }
 0x322   :  { %772 = vperm.xlu0 %5062, %v5990_v54  }
 0x326   :  { %v5081_v0 = vpop.eup %5080 }
 0x327   :  { %v895_v2 = vsel %vm316_vm2, %v5081_v0, 0.0 }
 0x328   :  { %896 = vadd.xlane.f32.xlu2 %v895_v2 }
 0x340   :  { %784 = vperm.xlu2 %5060, %v6004_v57  }
 0x36b   :  { %v879_v3 = vpop.xlane.xlu1 %878 }
 0x36c   :  { %5082 = vrcp.f32 %v879_v3 }
 0x372   :  { %v5083_v11 = vpop.eup %5082 }
 0x373   :  { %v909_v12 = vmul.f32 %v5083_v11, %v5077_v44 }
 0x375   :  { %4785 = vmatmul.msk.f32.vlgmr.msra.gmra.mxu1 %vm316_vm2, %v909_v12 }
 0x376   :  { %1073 = vmatpush.msra.mxu1 %v5999_v56  ;;  %v504_v56 = vld [vmem:[%s7191_s10 + $0x4] sm:$0xf] }
 0x381   :  { %v888_v51 = vpop.xlane.xlu0 %887 }
 0x382   :  { %5084 = vrcp.f32 %v888_v51 }
 0x383   :  { %v761_v13 = vpop.permute.xlu1 %760 }
 0x384   :  { %v788_v15 = vadd.f32 %v761_v13, %v602_v20 }
 0x386   :  { %v804_v16 = vmul.f32 0.2, %v788_v15  ;;  %vm796_vm9 = vcmp.gt.f32.partialorder %v788_v15, 0.0 }
 0x388   :  { %v5085_v54 = vpop.eup %5084  ;;  %v812_v17 = vsel %vm796_vm9, %v788_v15, %v804_v16 }
 0x389   :  { %v912_v18 = vmul.f32 %v5085_v54, %v5079_v58  ;;  %v822_v19 = vsel %vm232_vm5, %v812_v17, -9e+15 }
 0x38a   :  { %v832_v21 = vsel %vm316_vm2, %v822_v19, -inf }
 0x38b   :  { %4788 = vmatmul.msk.f32.vlgmr.msrb.gmra.mxu1 %vm316_vm2, %v912_v18  ;;  %833 = vmax.xlane.f32.xlu1 %v832_v21 }
 0x38c   :  { %4809 = vmatpush.msk.msrb.mxu1 %vm259_vm0, %v504_v56 }
 0x394   :  { %v773_v20 = vpop.permute.xlu0 %772 }
 0x395   :  { %v791_v22 = vadd.f32 %v773_v20, %v677_v29 }
 0x397   :  { %v807_v23 = vmul.f32 0.2, %v791_v22  ;;  %vm799_vm10 = vcmp.gt.f32.partialorder %v791_v22, 0.0 }
 0x399   :  { %v815_v25 = vsel %vm799_vm10, %v791_v22, %v807_v23 }
 0x39a   :  { %v825_v26 = vsel %vm232_vm5, %v815_v25, -9e+15 }
 0x39b   :  { %v897_v28 = vpop.xlane.xlu2 %896  ;;  %v841_v30 = vsel %vm316_vm2, %v825_v26, -inf }
 0x39c   :  { %5086 = vrcp.f32 %v897_v28  ;;  %842 = vmax.xlane.f32.xlu2 %v841_v30 }
 0x3a2   :  { %v5087_v32 = vpop.eup %5086 }
 0x3a3   :  { %v915_v33 = vmul.f32 %v5087_v32, %v5081_v0  ;;  %v785_v35 = vpop.permute.xlu2 %784 }
 0x3a4   :  { %v794_v37 = vadd.f32 %v785_v35, %v752_v31 }
 0x3a5   :  { %4791 = vmatmul.msk.f32.vlgmr.msra.gmra.mxu1 %vm316_vm2, %v915_v33 }
 0x3a6   :  { %v810_v29 = vmul.f32 0.2, %v794_v37  ;;  %vm802_vm11 = vcmp.gt.f32.partialorder %v794_v37, 0.0 }
 0x3a8   :  { %v818_v39 = vsel %vm802_vm11, %v794_v37, %v810_v29 }
 0x3a9   :  { %v828_v41 = vsel %vm232_vm5, %v818_v39, -9e+15 }
 0x3aa   :  { %v850_v43 = vsel %vm316_vm2, %v828_v41, -inf }
 0x3ab   :  { %851 = vmax.xlane.f32.xlu0 %v850_v43 }
 0x3ad   :  { %4810 = vmatmul.msk.f32.vlgmr.msrb.gmra.mxu1 %vm234_vm1, %v5860_v1 }
 0x3b5   :  { %4811 = vmatmul.msk.f32.gmra.mxu1 %vm234_vm1, %v5870_v4 }
 0x3bd   :  { %4812 = vmatmul.msk.f32.gmra.mxu1 %vm234_vm1, %v5884_v6 }
 0x3c5   :  { %4813 = vmatmul.msk.f32.gmra.mxu1 %vm234_vm1, %v5891_v7 }
 0x3cd   :  { %4814 = vmatmul.msk.f32.gmra.mxu1 %vm234_vm1, %v5898_v8 }
 0x3d5   :  { %4815 = vmatmul.msk.f32.gmra.mxu1 %vm234_vm1, %v5905_v9 }
 0x3dd   :  { %4816 = vmatmul.msk.f32.gmra.mxu1 %vm234_vm1, %v5912_v10 }
 0x3e5   :  { %4817 = vmatmul.msk.f32.gmra.mxu1 %vm234_vm1, %v5875_v5 }
 0x3f2   :  { %v6090_v8 = vpop.f32.mrf.mxu1 }
 0x3f3   :  { %vm1101_vm11 = vcmp.gt.f32.partialorder %v6090_v8, 0.0 }
 0x3fe   :  { %v834_v1 = vpop.xlane.xlu1 %833 }
 0x3ff   :  { %v854_v4 = vsub.f32 %v822_v19, %v834_v1 }
 0x401   :  { %v863_v44 = vmul.f32 1.442695, %v854_v4 }
 0x403   :  { %5088 = vpow2.f32 %v863_v44 }
 0x408   :  { %v6092_v53 = vpop.f32.mrf.mxu1 }
 0x409   :  { %v5089_v6 = vpop.eup %5088 }
 0x40a   :  { %v880_v47 = vsel %vm316_vm2, %v5089_v6, 0.0 }
 0x40b   :  { %881 = vadd.xlane.f32.xlu1 %v880_v47 }
 0x40f   :  { %v843_v7 = vpop.xlane.xlu2 %842 }
 0x410   :  { %v857_v49 = vsub.f32 %v825_v26, %v843_v7 }
 0x412   :  { %v869_v50 = vmul.f32 1.442695, %v857_v49 }
 0x414   :  { %5090 = vpow2.f32 %v869_v50 }
 0x41a   :  { %v5091_v9 = vpop.eup %5090 }
 0x41b   :  { %v889_v10 = vsel %vm316_vm2, %v5091_v9, 0.0 }
 0x41c   :  { %890 = vadd.xlane.f32.xlu2 %v889_v10 }
 0x41e   :  { %v852_v5 = vpop.xlane.xlu0 %851 }
 0x41f   :  { %v860_v58 = vsub.f32 %v828_v41, %v852_v5 }
 0x421   :  { %v875_v59 = vmul.f32 1.442695, %v860_v58 }
 0x422   :  { %v6095_v61 = vpop.f32.mrf.mxu1 }
 0x423   :  { %5092 = vpow2.f32 %v875_v59 }
 0x429   :  { %v5093_v62 = vpop.eup %5092 }
 0x42a   :  { %v6097_v63 = vpop.f32.mrf.mxu1  ;;  %v898_v0 = vsel %vm316_vm2, %v5093_v62, 0.0 }
 0x42b   :  { %899 = vadd.xlane.f32.xlu1 %v898_v0 }
 0x432   :  { %v6100_v2 = vpop.f32.mrf.mxu1 }
 0x434   :  { %1267 = vrot.lane.b32.xlu2 %v6097_v63, %s5674_s22 }
 0x43a   :  { %v6104_v3 = vpop.f32.mrf.mxu1 }
 0x43b   :  { %1317 = vrot.lane.b32.xlu0 %v6104_v3, %s5674_s22 }
 0x442   :  { %v6108_v11 = vpop.f32.mrf.mxu1 }
 0x443   :  { %1342 = vrot.lane.b32.xlu2 %v6108_v11, %s5674_s22 }
 0x444   :  { %1292 = vrot.lane.b32.xlu1 %v6100_v2, %s5674_s22 }
 0x44a   :  { %v6114_v12 = vpop.f32.mrf.mxu1 }
 0x44b   :  { %1367 = vrot.lane.b32.xlu0 %v6114_v12, %s5674_s22 }
 0x452   :  { %v6118_v51 = vpop.f32.mrf.mxu1 }
 0x453   :  { %1392 = vrot.lane.b32.xlu1 %v6118_v51, %s5674_s22 }
 0x45a   :  { %v6122_v13 = vpop.f32.mrf.mxu1 }
 0x45b   :  { %764 = vperm.xlu1 %5061, %v5984_v52   ;;  %1417 = vrot.lane.b32.xlu2 %v6122_v13, %s5674_s22 }
 0x462   :  { %v6127_v15 = vpop.f32.mrf.mxu1 }
 0x463   :  { %1442 = vrot.lane.b32.xlu0 %v6127_v15, %s5674_s22  ;;  %776 = vperm.xlu2 %5060, %v5994_v55  }
 0x46b   :  { %1467 = vperm.xlu0 %5062, %v6097_v63   ;;  %1471 = vperm.xlu2 %5060, %v6100_v2  }
 0x473   :  { %1475 = vperm.xlu0 %5062, %v6104_v3   ;;  %1479 = vperm.xlu2 %5060, %v6108_v11  }
 0x47b   :  { %1483 = vperm.xlu2 %5060, %v6114_v12  }
 0x47e   :  { %v882_v52 = vpop.xlane.xlu1 %881 }
 0x47f   :  { %5094 = vrcp.f32 %v882_v52 }
 0x483   :  { %1487 = vperm.xlu2 %5060, %v6118_v51  }
 0x485   :  { %v5095_v16 = vpop.eup %5094 }
 0x486   :  { %v910_v54 = vmul.f32 %v5095_v16, %v5089_v6 }
 0x488   :  { %4786 = vmatmul.msk.f32.vlgmr.msra.gmra.mxu2 %vm316_vm2, %v910_v54 }
 0x489   :  { %1096 = vmatpush.msra.mxu2 %v6004_v57 }
 0x48f   :  { %v891_v55 = vpop.xlane.xlu2 %890 }
 0x490   :  { %5096 = vrcp.f32 %v891_v55 }
 0x496   :  { %v5097_v17 = vpop.eup %5096 }
 0x497   :  { %v913_v18 = vmul.f32 %v5097_v17, %v5091_v9  ;;  %v1268_v19 = vpop.permute.xlu2 %1267 }
 0x499   :  { %4789 = vmatmul.msk.f32.vlgmr.msrb.gmra.mxu2 %vm316_vm2, %v913_v18 }
 0x49a   :  { %4818 = vmatpush.xpose.msk.msrb.mxu2 %vm554_vm4, %v1268_v19 }
 0x49e   :  { %v900_v21 = vpop.xlane.xlu1 %899 }
 0x49f   :  { %5098 = vrcp.f32 %v900_v21  ;;  %v1343_v22 = vpop.permute.xlu2 %1342 }
 0x4a5   :  { %v5099_v56 = vpop.eup %5098 }
 0x4a6   :  { %v916_v20 = vmul.f32 %v5099_v56, %v5093_v62 }
 0x4a8   :  { %4792 = vmatmul.msk.f32.vlgmr.msra.gmra.mxu2 %vm316_vm2, %v916_v20 }
 0x4ad   :  { %v1318_v23 = vpop.permute.xlu0 %1317 }
 0x4ae   :  { %4822 = vmatpush.xpose.msk.msra.mxu2 %vm554_vm4, %v1318_v23 }
 0x4b0   :  { %4819 = vmatmul.msk.f32.vlgmr.msrb.gmra.mxu2 %vm554_vm4, %v5676_v60 }
 0x4b5   :  { %v1418_v57 = vpop.permute.xlu2 %1417 }
 0x4b6   :  { %v1293_v25 = vpop.permute.xlu1 %1292 }
 0x4b7   :  { %4820 = vmatpush.xpose.msk.msra.mxu3 %vm554_vm4, %v1293_v25 }
 0x4b8   :  { %4823 = vmatmul.msk.f32.vlgmr.msra.gmra.mxu2 %vm554_vm4, %v5676_v60 }
 0x4ba   :  { %4821 = vmatmul.msk.f32.vlgmr.msra.gmra.mxu3 %vm554_vm4, %v5676_v60 }
 0x4bb   :  { %4824 = vmatpush.xpose.msk.msrb.mxu3 %vm554_vm4, %v1343_v22 }
 0x4bd   :  { %v1368_v26 = vpop.permute.xlu0 %1367  ;;  %v777_v28 = vpop.permute.xlu2 %776 }
 0x4be   :  { %v792_v30 = vadd.f32 %v777_v28, %v6064_v24  ;;  %4826 = vmatpush.xpose.msk.msrb.mxu2 %vm554_vm4, %v1368_v26 }
 0x4c0   :  { %v808_v31 = vmul.f32 0.2, %v792_v30  ;;  %vm800_vm12 = vcmp.gt.f32.partialorder %v792_v30, 0.0 }
 0x4c1   :  { %4827 = vmatmul.msk.f32.vlgmr.msrb.gmra.mxu2 %vm554_vm4, %v5676_v60 }
 0x4c2   :  { %4830 = vmatpush.xpose.msk.msra.mxu2 %vm554_vm4, %v1418_v57  ;;  %4825 = vmatmul.msk.f32.vlgmr.msrb.gmra.mxu3 %vm554_vm4, %v5676_v60  ;;  %v816_v32 = vsel %vm800_vm12, %v792_v30, %v808_v31 }
 0x4c3   :  { %v6162_v33 = vsel %vm232_vm5, %v816_v32, -9e+15 }
 0x4c4   :  { %v844_v24 = vsel %vm316_vm2, %v6162_v33, -inf }
 0x4c5   :  { %v1393_v35 = vpop.permute.xlu1 %1392  ;;  %845 = vmax.xlane.f32.xlu0 %v844_v24  ;;  %v1472_v47 = vpop.permute.xlu2 %1471 }
 0x4c6   :  { %1644 = vmatpush.msrb.mxu2 %v6097_v63  ;;  %4828 = vmatpush.xpose.msk.msra.mxu3 %vm554_vm4, %v1393_v35 }
 0x4c9   :  { %4831 = vmatmul.msk.f32.vlgmr.msra.gmra.mxu2 %vm554_vm4, %v5676_v60 }
 0x4ca   :  { %1690 = vmatpush.msra.mxu2 %v6104_v3  ;;  %4829 = vmatmul.msk.f32.vlgmr.msra.gmra.mxu3 %vm554_vm4, %v5676_v60 }
 0x4cd   :  { %v765_v37 = vpop.permute.xlu1 %764  ;;  %v1480_v5 = vpop.permute.xlu2 %1479 }
 0x4ce   :  { %v789_v29 = vadd.f32 %v765_v37, %v6042_v27 }
 0x4d0   :  { %v805_v39 = vmul.f32 0.2, %v789_v29  ;;  %vm797_vm13 = vcmp.gt.f32.partialorder %v789_v29, 0.0 }
 0x4d2   :  { %v813_v41 = vsel %vm797_vm13, %v789_v29, %v805_v39 }
 0x4d3   :  { %v823_v43 = vsel %vm232_vm5, %v813_v41, -9e+15 }
 0x4d4   :  { %v835_v1 = vsel %vm316_vm2, %v823_v43, -inf }
 0x4d5   :  { %836 = vmax.xlane.f32.xlu1 %v835_v1  ;;  %v1443_v4 = vpop.permute.xlu0 %1442  ;;  %v1484_v0 = vpop.permute.xlu2 %1483 }
 0x4d6   :  { %4832 = vmatpush.xpose.msk.msrb.mxu3 %vm554_vm4, %v1443_v4 }
 0x4d9   :  { %4833 = vmatmul.msk.f32.vlgmr.msrb.gmra.mxu3 %vm554_vm4, %v5676_v60 }
 0x4da   :  { %1667 = vmatpush.msra.mxu3 %v6100_v2 }
 0x4dc   :  { %1713 = vmatpush.msrb.mxu3 %v6108_v11 }
 0x4dd   :  { %v1468_v7 = vpop.permute.xlu0 %1467  ;;  %v1488_v57 = vpop.permute.xlu2 %1487 }
 0x4e5   :  { %v1476_v30 = vpop.permute.xlu0 %1475 }
 0x4ee   :  { %1491 = vperm.xlu1 %5061, %v6122_v13  }
 0x4f6   :  { %1495 = vperm.xlu1 %5061, %v6127_v15  }
 0x50b   :  { %v6183_v27 = vpop.f32.mrf.mxu2 }
 0x50c   :  { %vm1102_vm12 = vcmp.gt.f32.partialorder %v6183_v27, 0.0 }
 0x51c   :  { %v6185_v44 = vpop.f32.mrf.mxu2 }
 0x52b   :  { %v6187_v6 = vpop.f32.mrf.mxu2 }
 0x533   :  { %v1288_v49 = vpop.f32.mrf.mxu2 }
 0x534   :  { %v1498_v50 = vadd.f32 %v1468_v7, %v1288_v49 }
 0x536   :  { %v1514_v9 = vmul.f32 0.2, %v1498_v50  ;;  %vm1506_vm14 = vcmp.gt.f32.partialorder %v1498_v50, 0.0 }
 0x538   :  { %v1522_v10 = vsel %vm1506_vm14, %v1498_v50, %v1514_v9  ;;  %v846_v1 = vpop.xlane.xlu0 %845  ;;  %vm1104_vm14 = vcmp.gt.f32.partialorder %v6092_v53, 0.0 }
 0x539   :  { %v6191_v58 = vsel %vm232_vm5, %v1522_v10, -9e+15  ;;  %v858_v7 = vsub.f32 %v6162_v33, %v846_v1 }
 0x53a   :  { %v1538_v59 = vsel %vm316_vm2, %v6191_v58, -inf }
 0x53b   :  { %1539 = vmax.xlane.f32.xlu2 %v1538_v59  ;;  %v1338_v62 = vpop.f32.mrf.mxu2  ;;  %v871_v10 = vmul.f32 1.442695, %v858_v7 }
 0x53c   :  { %v1500_v41 = vadd.f32 %v1476_v30, %v1338_v62 }
 0x53d   :  { %v1313_v63 = vpop.f32.mrf.mxu3 }
 0x53e   :  { %v1499_v26 = vadd.f32 %v1472_v47, %v1313_v63  ;;  %v1516_v47 = vmul.f32 0.2, %v1500_v41  ;;  %vm1508_vm8 = vcmp.gt.f32.partialorder %v1500_v41, 0.0 }
 0x540   :  { %v1515_v32 = vmul.f32 0.2, %v1499_v26  ;;  %vm1507_vm7 = vcmp.gt.f32.partialorder %v1499_v26, 0.0  ;;  %v1524_v9 = vsel %vm1508_vm8, %v1500_v41, %v1516_v47 }
 0x541   :  { %v1532_v62 = vsel %vm232_vm5, %v1524_v9, -9e+15 }
 0x544   :  { %v1388_v2 = vpop.f32.mrf.mxu2 }
 0x545   :  { %v1502_v3 = vadd.f32 %v1484_v0, %v1388_v2  ;;  %v1363_v11 = vpop.f32.mrf.mxu3  ;;  %v1544_v0 = vsel %vm316_vm2, %v1532_v62, -inf }
 0x546   :  { %v1501_v52 = vadd.f32 %v1480_v5, %v1363_v11 }
 0x547   :  { %v1518_v16 = vmul.f32 0.2, %v1502_v3  ;;  %vm1510_vm15 = vcmp.gt.f32.partialorder %v1502_v3, 0.0 }
 0x548   :  { %v1517_v54 = vmul.f32 0.2, %v1501_v52  ;;  %v837_v55 = vpop.xlane.xlu1 %836  ;;  %vm1509_vm0 = vcmp.gt.f32.partialorder %v1501_v52, 0.0 }
 0x549   :  { %v855_v17 = vsub.f32 %v823_v43, %v837_v55  ;;  %v1526_v18 = vsel %vm1510_vm15, %v1502_v3, %v1518_v16  ;;  %v1523_v43 = vsel %vm1507_vm7, %v1499_v26, %v1515_v32  ;;  %vm1105_vm15 = vcmp.gt.f32.partialorder %v6185_v44, 0.0 }
 0x54a   :  { %v6197_v19 = vsel %vm232_vm5, %v1526_v18, -9e+15  ;;  %v1525_v21 = vsel %vm1509_vm0, %v1501_v52, %v1517_v54  ;;  %v1531_v4 = vsel %vm232_vm5, %v1523_v43, -9e+15  ;;  %vm1108_vm7 = vcmp.gt.f32.partialorder %v6187_v6, 0.0 }
 0x54b   :  { %v865_v56 = vmul.f32 1.442695, %v855_v17  ;;  %v1550_v20 = vsel %vm316_vm2, %v6197_v19, -inf  ;;  %v6203_v22 = vsel %vm232_vm5, %v1525_v21, -9e+15  ;;  %v1541_v49 = vsel %vm316_vm2, %v1531_v4, -inf }
 0x54c   :  { %1551 = vmax.xlane.f32.xlu2 %v1550_v20  ;;  %v1547_v23 = vsel %vm316_vm2, %v6203_v22, -inf  ;;  %v1438_v50 = vpop.f32.mrf.mxu2 }
 0x54d   :  { %5100 = vpow2.f32 %v865_v56  ;;  %v1413_v25 = vpop.f32.mrf.mxu3  ;;  %1548 = vmax.xlane.f32.xlu1 %v1547_v23 }
 0x54e   :  { %v1503_v28 = vadd.f32 %v1488_v57, %v1413_v25  ;;  %5102 = vpow2.f32 %v871_v10 }
 0x550   :  { %v1519_v31 = vmul.f32 0.2, %v1503_v28  ;;  %vm1511_vm6 = vcmp.gt.f32.partialorder %v1503_v28, 0.0 }
 0x552   :  { %v1527_v24 = vsel %vm1511_vm6, %v1503_v28, %v1519_v31  ;;  %vm1107_vm6 = vcmp.gt.f32.partialorder %v6095_v61, 0.0 }
 0x553   :  { %v6207_v35 = vpop.eup %5100  ;;  %v1535_v37 = vsel %vm232_vm5, %v1527_v24, -9e+15 }
 0x554   :  { %v883_v29 = vsel %vm316_vm2, %v6207_v35, 0.0  ;;  %v1553_v39 = vsel %vm316_vm2, %v1535_v37, -inf  ;;  %v6224_v16 = vpop.eup %5102 }
 0x555   :  { %884 = vadd.xlane.f32.xlu0 %v883_v29  ;;  %1554 = vmax.xlane.f32.xlu2 %v1553_v39  ;;  %v892_v17 = vsel %vm316_vm2, %v6224_v16, 0.0 }
 0x55c   :  { %v1463_v33 = vpop.f32.mrf.mxu3 }
 0x55d   :  { %1542 = vmax.xlane.f32.xlu0 %v1541_v49 }
 0x560   :  { %v1492_v5 = vpop.permute.xlu1 %1491 }
 0x561   :  { %v1504_v59 = vadd.f32 %v1492_v5, %v1438_v50 }
 0x563   :  { %v1520_v63 = vmul.f32 0.2, %v1504_v59  ;;  %vm1512_vm9 = vcmp.gt.f32.partialorder %v1504_v59, 0.0 }
 0x565   :  { %1545 = vmax.xlane.f32.xlu0 %v1544_v0  ;;  %v1528_v2 = vsel %vm1512_vm9, %v1504_v59, %v1520_v63 }
 0x566   :  { %v1536_v3 = vsel %vm232_vm5, %v1528_v2, -9e+15 }
 0x567   :  { %v1556_v11 = vsel %vm316_vm2, %v1536_v3, -inf }
 0x568   :  { %v1496_v52 = vpop.permute.xlu1 %1495  ;;  %1557 = vmax.xlane.f32.xlu2 %v1556_v11 }
 0x569   :  { %v1505_v54 = vadd.f32 %v1496_v52, %v1463_v33 }
 0x56b   :  { %v1521_v55 = vmul.f32 0.2, %v1505_v54  ;;  %vm1513_vm10 = vcmp.gt.f32.partialorder %v1505_v54, 0.0 }
 0x56d   :  { %893 = vadd.xlane.f32.xlu0 %v892_v17  ;;  %v1529_v18 = vsel %vm1513_vm10, %v1505_v54, %v1521_v55  ;;  %v1110_v17 = vmin.f32 %v6183_v27, 0.0 }
 0x56e   :  { %v6230_v21 = vsel %vm232_vm5, %v1529_v18, -9e+15 }
 0x56f   :  { %v1559_v56 = vsel %vm316_vm2, %v6230_v21, -inf }
 0x570   :  { %1560 = vmax.xlane.f32.xlu2 %v1559_v56 }
 0x5ae   :  { %v1540_v20 = vpop.xlane.xlu2 %1539 }
 0x5af   :  { %v1562_v23 = vsub.f32 %v6191_v58, %v1540_v20 }
 0x5b1   :  { %v1570_v57 = vmul.f32 1.442695, %v1562_v23 }
 0x5b3   :  { %5104 = vpow2.f32 %v1570_v57 }
 0x5b9   :  { %v6235_v25 = vpop.eup %5104 }
 0x5ba   :  { %v1586_v26 = vsel %vm316_vm2, %v6235_v25, 0.0 }
 0x5bb   :  { %1587 = vadd.xlane.f32.xlu0 %v1586_v26  ;;  %v1119_v26 = vmul.f32 1.442695, %v1110_v17 }
 0x5bf   :  { %v1552_v28 = vpop.xlane.xlu2 %1551 }
 0x5c0   :  { %v1549_v30 = vpop.xlane.xlu1 %1548 }
 0x5c1   :  { %v1565_v31 = vsub.f32 %v6203_v22, %v1549_v30  ;;  %v505_v22 = vld [vmem:[%s7192_s27] sm:$0xff] }
 0x5c3   :  { %v1576_v32 = vmul.f32 1.442695, %v1565_v31 }
 0x5c5   :  { %5106 = vpow2.f32 %v1576_v32 }
 0x5c8   :  { %v885_v24 = vpop.xlane.xlu0 %884  ;;  %v1555_v29 = vpop.xlane.xlu2 %1554 }
 0x5c9   :  { %5108 = vrcp.f32 %v885_v24  ;;  %v1567_v39 = vsub.f32 %v1535_v37, %v1555_v29 }
 0x5cb   :  { %v6240_v41 = vpop.eup %5106  ;;  %v1580_v58 = vmul.f32 1.442695, %v1567_v39 }
 0x5cc   :  { %v1595_v43 = vsel %vm316_vm2, %v6240_v41, 0.0 }
 0x5cd   :  { %5110 = vpow2.f32 %v1580_v58  ;;  %1596 = vadd.xlane.f32.xlu2 %v1595_v43 }
 0x5cf   :  { %v5109_v1 = vpop.eup %5108 }
 0x5d0   :  { %v1543_v47 = vpop.xlane.xlu0 %1542  ;;  %v911_v7 = vmul.f32 %v5109_v1, %v6207_v35  ;;  %v1566_v35 = vsub.f32 %v6197_v19, %v1552_v28 }
 0x5d1   :  { %v1563_v49 = vsub.f32 %v1531_v4, %v1543_v47  ;;  %v1109_v4 = vmin.f32 %v6090_v8, 0.0 }
 0x5d2   :  { %4787 = vmatmul.msk.f32.vlgmr.msrb.gmra.mxu0 %vm316_vm2, %v911_v7  ;;  %v1578_v52 = vmul.f32 1.442695, %v1566_v35  ;;  %v1113_v35 = vmin.f32 %v6185_v44, 0.0 }
 0x5d3   :  { %v6249_v37 = vpop.eup %5110  ;;  %v1572_v50 = vmul.f32 1.442695, %v1563_v49  ;;  %1188 = vmatpush.msrb.mxu0 %v505_v22  ;;  %v1117_v54 = vmul.f32 1.442695, %v1109_v4  ;;  %v1112_v22 = vmin.f32 %v6092_v53, 0.0 }
 0x5d4   :  { %v1601_v9 = vsel %vm316_vm2, %v6249_v37, 0.0  ;;  %v1125_v4 = vmul.f32 1.442695, %v1113_v35 }
 0x5d5   :  { %5112 = vpow2.f32 %v1572_v50  ;;  %1602 = vadd.xlane.f32.xlu1 %v1601_v9 }
 0x5d8   :  { %v1546_v10 = vpop.xlane.xlu0 %1545 }
 0x5d9   :  { %v1564_v5 = vsub.f32 %v1532_v62, %v1546_v10  ;;  %v1123_v10 = vmul.f32 1.442695, %v1112_v22  ;;  %v506_v22 = vld [vmem:[%s7192_s27 + $0x8] sm:$0xff] }
 0x5db   :  { %v6253_v59 = vpop.eup %5112  ;;  %v1574_v63 = vmul.f32 1.442695, %v1564_v5  ;;  %v1558_v0 = vpop.xlane.xlu2 %1557 }
 0x5dc   :  { %v1568_v2 = vsub.f32 %v1536_v3, %v1558_v0  ;;  %v1589_v33 = vsel %vm316_vm2, %v6253_v59, 0.0 }
 0x5dd   :  { %5114 = vpow2.f32 %v1574_v63  ;;  %1590 = vadd.xlane.f32.xlu0 %v1589_v33 }
 0x5de   :  { %v1582_v11 = vmul.f32 1.442695, %v1568_v2 }
 0x5e0   :  { %5116 = vpow2.f32 %v1582_v11  ;;  %v894_v55 = vpop.xlane.xlu0 %893 }
 0x5e1   :  { %5118 = vrcp.f32 %v894_v55 }
 0x5e2   :  { %5120 = vpow2.f32 %v1578_v52 }
 0x5e3   :  { %v6259_v62 = vpop.eup %5114  ;;  %v1561_v19 = vpop.xlane.xlu2 %1560  ;;  %5122 = vpow2.f32 %v1117_v54 }
 0x5e4   :  { %v1569_v3 = vsub.f32 %v6230_v21, %v1561_v19  ;;  %v1592_v18 = vsel %vm316_vm2, %v6259_v62, 0.0 }
 0x5e5   :  { %1593 = vadd.xlane.f32.xlu0 %v1592_v18 }
 0x5e6   :  { %v6265_v56 = vpop.eup %5116  ;;  %v1584_v23 = vmul.f32 1.442695, %v1569_v3 }
 0x5e7   :  { %v5119_v20 = vpop.eup %5118  ;;  %v1604_v57 = vsel %vm316_vm2, %v6265_v56, 0.0 }
 0x5e8   :  { %v914_v28 = vmul.f32 %v5119_v20, %v6224_v16  ;;  %1605 = vadd.xlane.f32.xlu2 %v1604_v57  ;;  %v6270_v30 = vpop.eup %5120  ;;  %5124 = vpow2.f32 %v1584_v23  ;;  %v1115_v23 = vmin.f32 %v6095_v61, 0.0 }
 0x5e9   :  { %v5123_v31 = vpop.eup %5122  ;;  %5126 = vpow2.f32 %v1119_v26  ;;  %v1598_v21 = vsel %vm316_vm2, %v6270_v30, 0.0 }
 0x5ea   :  { %4790 = vmatmul.msk.f32.vlgmr.msra.gmra.mxu0 %vm316_vm2, %v914_v28  ;;  %v4793_v32 = vadd.f32 -1.0, %v5123_v31 }
 0x5eb   :  { %1897 = vmatpush.msra.mxu0 %v506_v22 }
 0x5ec   :  { %v1141_v29 = vsel %vm1101_vm11, %v6090_v8, %v4793_v32 }
 0x5ed   :  { %1599 = vadd.xlane.f32.xlu0 %v1598_v21 }
 0x5ee   :  { %v6276_v24 = vpop.eup %5124 }
 0x5ef   :  { %v5127_v16 = vpop.eup %5126  ;;  %v1607_v39 = vsel %vm316_vm2, %v6276_v24, 0.0 }
 0x5f0   :  { %v4794_v58 = vadd.f32 -1.0, %v5127_v16 }
 0x5f2   :  { %4801 = vmatmul.msk.f32.vlgmr.msrb.gmra.mxu0 %vm316_vm2, %v1141_v29  ;;  %v1142_v43 = vsel %vm1102_vm12, %v6183_v27, %v4794_v58 }
 0x5f5   :  { %1608 = vadd.xlane.f32.xlu0 %v1607_v39 }
 0x5fa   :  { %4802 = vmatmul.msk.f32.gmra.mxu0 %vm316_vm2, %v1142_v43 }
 0x62e   :  { %v1588_v1 = vpop.xlane.xlu0 %1587 }
 0x62f   :  { %5128 = vrcp.f32 %v1588_v1 }
 0x635   :  { %v5129_v47 = vpop.eup %5128 }
 0x636   :  { %v1618_v7 = vmul.f32 %v5129_v47, %v6235_v25 }
 0x638   :  { %4834 = vmatmul.msk.f32.vlgmr.msrb.gmra.mxu2 %vm316_vm2, %v1618_v7 }
 0x639   :  { %1736 = vmatpush.msrb.mxu2 %v6114_v12 }
 0x640   :  { %v1597_v27 = vpop.xlane.xlu2 %1596 }
 0x648   :  { %v1603_v2 = vpop.xlane.xlu1 %1602 }
 0x64f   :  { %v983_v8 = vpop.f32.mrf.mxu0 }
 0x650   :  { %v1111_v49 = vmin.f32 %v983_v8, 0.0  ;;  %v1591_v50 = vpop.xlane.xlu0 %1590  ;;  %vm1103_vm13 = vcmp.gt.f32.partialorder %v983_v8, 0.0 }
 0x651   :  { %5130 = vrcp.f32 %v1591_v50 }
 0x652   :  { %v1121_v9 = vmul.f32 1.442695, %v1111_v49 }
 0x654   :  { %5132 = vpow2.f32 %v1121_v9 }
 0x655   :  { %5134 = vrcp.f32 %v1597_v27 }
 0x656   :  { %5136 = vpow2.f32 %v1123_v10 }
 0x657   :  { %v5131_v5 = vpop.eup %5130 }
 0x658   :  { %v1619_v25 = vmul.f32 %v5131_v5, %v6253_v59  ;;  %v1594_v63 = vpop.xlane.xlu0 %1593 }
 0x659   :  { %5138 = vrcp.f32 %v1594_v63 }
 0x65a   :  { %v5133_v12 = vpop.eup %5132  ;;  %4835 = vmatmul.msk.f32.vlgmr.msra.gmra.mxu3 %vm316_vm2, %v1619_v25  ;;  %5140 = vrcp.f32 %v1603_v2 }
 0x65b   :  { %1759 = vmatpush.msra.mxu3 %v6118_v51  ;;  %v4795_v0 = vadd.f32 -1.0, %v5133_v12  ;;  %v5135_v33 = vpop.eup %5134  ;;  %5142 = vpow2.f32 %v1125_v4  ;;  %v1606_v51 = vpop.xlane.xlu2 %1605 }
 0x65c   :  { %v5137_v52 = vpop.eup %5136  ;;  %v1621_v59 = vmul.f32 %v5135_v33, %v6240_v41 }
 0x65d   :  { %v1143_v11 = vsel %vm1103_vm13, %v983_v8, %v4795_v0  ;;  %v4796_v17 = vadd.f32 -1.0, %v5137_v52 }
 0x65e   :  { %4803 = vmatmul.msk.f32.gmra.mxu0 %vm316_vm2, %v1143_v11 }
 0x65f   :  { %v5139_v54 = vpop.eup %5138  ;;  %v1144_v18 = vsel %vm1104_vm14, %v6092_v53, %v4796_v17  ;;  %v1129_v53 = vmul.f32 1.442695, %v1115_v23 }
 0x660   :  { %v1620_v55 = vmul.f32 %v5139_v54, %v6259_v62  ;;  %v1600_v19 = vpop.xlane.xlu0 %1599  ;;  %v5141_v3 = vpop.eup %5140 }
 0x661   :  { %5144 = vrcp.f32 %v1600_v19  ;;  %v5143_v41 = vpop.eup %5142  ;;  %v1623_v57 = vmul.f32 %v5141_v3, %v6249_v37 }
 0x662   :  { %4836 = vmatmul.msk.f32.vlgmr.msra.gmra.mxu2 %vm316_vm2, %v1620_v55  ;;  %4837 = vmatmul.msk.f32.vlgmr.msrb.gmra.mxu3 %vm316_vm2, %v1621_v59  ;;  %5146 = vrcp.f32 %v1606_v51  ;;  %v4797_v28 = vadd.f32 -1.0, %v5143_v41 }
 0x663   :  { %1782 = vmatpush.msra.mxu2 %v6122_v13  ;;  %1805 = vmatpush.msrb.mxu3 %v6127_v15 }
 0x664   :  { %v1145_v32 = vsel %vm1105_vm15, %v6185_v44, %v4797_v28 }
 0x666   :  { %4804 = vmatmul.msk.f32.gmra.mxu0 %vm316_vm2, %v1144_v18 }
 0x667   :  { %v5145_v62 = vpop.eup %5144  ;;  %v1052_v20 = vpop.f32.mrf.mxu0 }
 0x668   :  { %v1622_v13 = vmul.f32 %v5145_v62, %v6270_v30  ;;  %v1114_v26 = vmin.f32 %v1052_v20, 0.0  ;;  %v1609_v15 = vpop.xlane.xlu0 %1608  ;;  %v5147_v21 = vpop.eup %5146  ;;  %v1116_v30 = vmin.f32 %v6187_v6, 0.0  ;;  %vm1106_vm0 = vcmp.gt.f32.partialorder %v1052_v20, 0.0 }
 0x669   :  { %5148 = vrcp.f32 %v1609_v15  ;;  %v1624_v29 = vmul.f32 %v5147_v21, %v6265_v56 }
 0x66a   :  { %v1127_v31 = vmul.f32 1.442695, %v1114_v26  ;;  %4838 = vmatmul.msk.f32.vlgmr.msrb.gmra.mxu2 %vm316_vm2, %v1622_v13  ;;  %4839 = vmatmul.msk.f32.vlgmr.msra.gmra.mxu3 %vm316_vm2, %v1623_v57  ;;  %v1131_v43 = vmul.f32 1.442695, %v1116_v30 }
 0x66c   :  { %5150 = vpow2.f32 %v1127_v31 }
 0x66d   :  { %5152 = vpow2.f32 %v1129_v53 }
 0x66e   :  { %4805 = vmatmul.msk.f32.gmra.mxu0 %vm316_vm2, %v1145_v32  ;;  %5154 = vpow2.f32 %v1131_v43 }
 0x66f   :  { %v5149_v37 = vpop.eup %5148  ;;  %v1190_v23 = vpop.f32.mrf.mxu0 }
 0x670   :  { %v1625_v16 = vmul.f32 %v5149_v37, %v6276_v24 }
 0x672   :  { %v5151_v39 = vpop.eup %5150  ;;  %4840 = vmatmul.msk.f32.vlgmr.msra.gmra.mxu2 %vm316_vm2, %v1624_v29  ;;  %4841 = vmatmul.msk.f32.vlgmr.msrb.gmra.mxu3 %vm316_vm2, %v1625_v16 }
 0x673   :  { %v4798_v58 = vadd.f32 -1.0, %v5151_v39  ;;  %v5153_v44 = vpop.eup %5152 }
 0x674   :  { %v4799_v47 = vadd.f32 -1.0, %v5153_v44  ;;  %v5155_v7 = vpop.eup %5154 }
 0x675   :  { %v1146_v1 = vsel %vm1106_vm0, %v1052_v20, %v4798_v58  ;;  %v4800_v24 = vadd.f32 -1.0, %v5155_v7 }
 0x676   :  { %4806 = vmatmul.msk.f32.gmra.mxu0 %vm316_vm2, %v1146_v1  ;;  %v1147_v56 = vsel %vm1107_vm6, %v6095_v61, %v4799_v47 }
 0x677   :  { %v1148_v8 = vsel %vm1108_vm7, %v6187_v6, %v4800_v24  ;;  %v1193_v37 = vpop.f32.mrf.mxu0 }
 0x67e   :  { %4807 = vmatmul.msk.f32.gmra.mxu0 %vm316_vm2, %v1147_v56 }
 0x686   :  { %4808 = vmatmul.msk.f32.gmra.mxu0 %vm316_vm2, %v1148_v8 }
 0x6bb   :  { %v1646_v49 = vpop.f32.mrf.mxu2 }
 0x6bc   :  { %v1818_v50 = vmin.f32 %v1646_v49, 0.0  ;;  %vm1810_vm8 = vcmp.gt.f32.partialorder %v1646_v49, 0.0 }
 0x6be   :  { %v1826_v9 = vmul.f32 1.442695, %v1818_v50 }
 0x6c0   :  { %5156 = vpow2.f32 %v1826_v9 }
 0x6c6   :  { %v5157_v61 = vpop.eup %5156 }
 0x6c7   :  { %v4842_v10 = vadd.f32 -1.0, %v5157_v61 }
 0x6c9   :  { %v1850_v27 = vsel %vm1810_vm8, %v1646_v49, %v4842_v10 }
 0x6ca   :  { %4850 = vmatmul.msk.f32.vlgmr.msra.gmra.mxu0 %vm316_vm2, %v1850_v27 }
 0x6db   :  { %v1196_v43 = vpop.f32.mrf.mxu0 }
 0x6dd   :  { %v1669_v5 = vpop.f32.mrf.mxu3 }
 0x6de   :  { %v1819_v35 = vmin.f32 %v1669_v5, 0.0  ;;  %vm1811_vm9 = vcmp.gt.f32.partialorder %v1669_v5, 0.0 }
 0x6e0   :  { %v1828_v6 = vmul.f32 1.442695, %v1819_v35 }
 0x6e2   :  { %5158 = vpow2.f32 %v1828_v6  ;;  %v5678_v6 = vmov 16  }
 0x6e3   :  { %v1199_v56 = vpop.f32.mrf.mxu0  ;;  %5063 = vset.pattern.permute.xlu1 %v5678_v6  ;;  %5064 = vset.pattern.permute.xlu0 %v5678_v6 }
 0x6e4   :  { %5065 = vset.pattern.permute.xlu2 %v5678_v6 }
 0x6e5   :  { %v1692_v25 = vpop.f32.mrf.mxu2  ;;  %v1715_v63 = vpop.f32.mrf.mxu3 }
 0x6e6   :  { %v1820_v12 = vmin.f32 %v1692_v25, 0.0  ;;  %v1821_v0 = vmin.f32 %v1715_v63, 0.0  ;;  %vm1812_vm10 = vcmp.gt.f32.partialorder %v1692_v25, 0.0  ;;  %vm1813_vm11 = vcmp.gt.f32.partialorder %v1715_v63, 0.0 }
 0x6e8   :  { %v5159_v4 = vpop.eup %5158  ;;  %v1830_v2 = vmul.f32 1.442695, %v1820_v12  ;;  %v1832_v11 = vmul.f32 1.442695, %v1821_v0 }
 0x6e9   :  { %v4843_v33 = vadd.f32 -1.0, %v5159_v4 }
 0x6ea   :  { %5160 = vpow2.f32 %v1830_v2 }
 0x6eb   :  { %v1851_v52 = vsel %vm1811_vm9, %v1669_v5, %v4843_v33  ;;  %5162 = vpow2.f32 %v1832_v11  ;;  %v1202_v8 = vpop.f32.mrf.mxu0 }
 0x6ec   :  { %4851 = vmatmul.msk.f32.gmra.mxu0 %vm316_vm2, %v1851_v52 }
 0x6ed   :  { %v1738_v54 = vpop.f32.mrf.mxu2  ;;  %v1761_v51 = vpop.f32.mrf.mxu3 }
 0x6ee   :  { %v1822_v59 = vmin.f32 %v1738_v54, 0.0  ;;  %v1823_v41 = vmin.f32 %v1761_v51, 0.0  ;;  %vm1814_vm12 = vcmp.gt.f32.partialorder %v1738_v54, 0.0  ;;  %vm1815_vm13 = vcmp.gt.f32.partialorder %v1761_v51, 0.0 }
 0x6f0   :  { %v5161_v55 = vpop.eup %5160  ;;  %v1834_v17 = vmul.f32 1.442695, %v1822_v59  ;;  %v1836_v20 = vmul.f32 1.442695, %v1823_v41 }
 0x6f1   :  { %v4844_v19 = vadd.f32 -1.0, %v5161_v55  ;;  %v5163_v18 = vpop.eup %5162 }
 0x6f2   :  { %5164 = vpow2.f32 %v1834_v17  ;;  %v4845_v62 = vadd.f32 -1.0, %v5163_v18 }
 0x6f3   :  { %v1852_v3 = vsel %vm1812_vm10, %v1692_v25, %v4844_v19  ;;  %5166 = vpow2.f32 %v1836_v20  ;;  %v1205_v22 = vpop.f32.mrf.mxu0 }
 0x6f4   :  { %4852 = vmatmul.msk.f32.gmra.mxu0 %vm316_vm2, %v1852_v3  ;;  %v1853_v13 = vsel %vm1813_vm11, %v1715_v63, %v4845_v62 }
 0x6f5   :  { %v1784_v57 = vpop.f32.mrf.mxu2  ;;  %v1807_v53 = vpop.f32.mrf.mxu3 }
 0x6f6   :  { %v1824_v15 = vmin.f32 %v1784_v57, 0.0  ;;  %v1825_v30 = vmin.f32 %v1807_v53, 0.0  ;;  %vm1816_vm14 = vcmp.gt.f32.partialorder %v1784_v57, 0.0  ;;  %vm1817_vm15 = vcmp.gt.f32.partialorder %v1807_v53, 0.0 }
 0x6f8   :  { %v5165_v26 = vpop.eup %5164  ;;  %v1838_v31 = vmul.f32 1.442695, %v1824_v15  ;;  %v1840_v16 = vmul.f32 1.442695, %v1825_v30 }
 0x6f9   :  { %v4846_v28 = vadd.f32 -1.0, %v5165_v26  ;;  %v5167_v32 = vpop.eup %5166 }
 0x6fa   :  { %5168 = vpow2.f32 %v1838_v31  ;;  %v4847_v29 = vadd.f32 -1.0, %v5167_v32 }
 0x6fb   :  { %v1854_v21 = vsel %vm1814_vm12, %v1738_v54, %v4846_v28  ;;  %5170 = vpow2.f32 %v1840_v16  ;;  %v1208_v49 = vpop.f32.mrf.mxu0 }
 0x6fc   :  { %4853 = vmatmul.msk.f32.gmra.mxu0 %vm316_vm2, %v1853_v13  ;;  %v1855_v39 = vsel %vm1815_vm13, %v1761_v51, %v4847_v29 }
 0x700   :  { %v5169_v58 = vpop.eup %5168 }
 0x701   :  { %v4848_v1 = vadd.f32 -1.0, %v5169_v58  ;;  %v5171_v47 = vpop.eup %5170 }
 0x702   :  { %v4849_v7 = vadd.f32 -1.0, %v5171_v47 }
 0x703   :  { %v1856_v44 = vsel %vm1816_vm14, %v1784_v57, %v4848_v1  ;;  %v1211_v50 = vpop.f32.mrf.mxu0 }
 0x704   :  { %4854 = vmatmul.msk.f32.gmra.mxu0 %vm316_vm2, %v1854_v21  ;;  %v1857_v24 = vsel %vm1817_vm15, %v1807_v53, %v4849_v7 }
 0x70c   :  { %4855 = vmatmul.msk.f32.gmra.mxu0 %vm316_vm2, %v1855_v39 }
 0x714   :  { %4856 = vmatmul.msk.f32.gmra.mxu0 %vm316_vm2, %v1856_v44 }
 0x71c   :  { %4857 = vmatmul.msk.f32.gmra.mxu0 %vm316_vm2, %v1857_v24 }
 0x747   :  { %v1899_v9 = vpop.f32.mrf.mxu0 }
 0x748   :  { %v1923_v61 = vadd.f32 %v1899_v9, %v1190_v23 }
 0x74a   :  { %1932 = vrot.lane.b32.xlu1 %v1923_v61, %s5677_s26 }
 0x769   :  { %v1902_v10 = vpop.f32.mrf.mxu0 }
 0x76a   :  { %v1924_v27 = vadd.f32 %v1902_v10, %v1193_v37 }
 0x76c   :  { %1957 = vrot.lane.b32.xlu2 %v1924_v27, %s5677_s26 }
 0x771   :  { %v1905_v5 = vpop.f32.mrf.mxu0 }
 0x772   :  { %v1925_v35 = vadd.f32 %v1905_v5, %v1196_v43 }
 0x774   :  { %1982 = vrot.lane.b32.xlu0 %v1925_v35, %s5677_s26 }
 0x779   :  { %v1908_v25 = vpop.f32.mrf.mxu0 }
 0x77a   :  { %v1926_v63 = vadd.f32 %v1908_v25, %v1199_v56 }
 0x77c   :  { %2007 = vrot.lane.b32.xlu0 %v1926_v63, %s5677_s26 }
 0x781   :  { %v1911_v12 = vpop.f32.mrf.mxu0 }
 0x782   :  { %v1927_v0 = vadd.f32 %v1911_v12, %v1202_v8 }
 0x784   :  { %2032 = vrot.lane.b32.xlu2 %v1927_v0, %s5677_s26 }
 0x789   :  { %v1914_v4 = vpop.f32.mrf.mxu0 }
 0x78a   :  { %v1928_v2 = vadd.f32 %v1914_v4, %v1205_v22 }
 0x78c   :  { %2057 = vrot.lane.b32.xlu1 %v1928_v2, %s5677_s26 }
 0x791   :  { %v1917_v33 = vpop.f32.mrf.mxu0 }
 0x792   :  { %v6334_v11 = vadd.f32 %v1917_v33, %v1208_v49 }
 0x794   :  { %2132 = vperm.xlu1 %5063, %v1923_v61   ;;  %2082 = vrot.lane.b32.xlu0 %v6334_v11, %s5677_s26 }
 0x799   :  { %v1920_v52 = vpop.f32.mrf.mxu0 }
 0x79a   :  { %v6337_v54 = vadd.f32 %v1920_v52, %v1211_v50 }
 0x79c   :  { %2144 = vperm.xlu1 %5063, %v1926_v63   ;;  %2136 = vperm.xlu0 %5064, %v1924_v27  }
 0x79d   :  { %2107 = vrot.lane.b32.xlu2 %v6337_v54, %s5677_s26  ;;  %s5682_s26 = smov [#allocation21]  }
 0x79e   :  { %s4703_s14 = sshll.u32 %s5682_s26, 4  ;;  %s4704_s14 = int_to_ptr.vmem [resolvable:$true] %s4703_s14 }
 0x79f   :  { %4711 = dma.vmem_to_hbm [thread:$0]  %s4704_s14, 1024, %s4706_s2, [#allocation6], %s5662_s8, %s5662_s8, %s5663_s4  }
 0x7a4   :  { %2152 = vperm.xlu1 %5063, %v1928_v2  }
 0x7a5   :  { %2140 = vperm.xlu2 %5065, %v1925_v35  }
 0x7ad   :  { %2148 = vperm.xlu2 %5065, %v1927_v0  }
 0x7b5   :  { %2156 = vperm.xlu2 %5065, %v6334_v11  }
 0x7bc   :  { %v1933_v59 = vpop.permute.xlu1 %1932 }
 0x7bd   :  { %2160 = vperm.xlu2 %5065, %v6337_v54   ;;  %4858 = vmatpush.xpose.msk.msra.mxu1 %vm554_vm4, %v1933_v59 }
 0x7c0   :  { %4859 = vmatmul.msk.f32.vlgmr.msra.gmra.mxu1 %vm554_vm4, %v5676_v60 }
 0x7c6   :  { %v1958_v55 = vpop.permute.xlu2 %1957 }
 0x7c7   :  { %4860 = vmatpush.xpose.msk.msrb.mxu2 %vm554_vm4, %v1958_v55 }
 0x7ca   :  { %4861 = vmatmul.msk.f32.vlgmr.msrb.gmra.mxu2 %vm554_vm4, %v5676_v60 }
 0x7de   :  { %v2033_v19 = vpop.permute.xlu2 %2032 }
 0x7df   :  { %4866 = vmatpush.xpose.msk.msra.mxu2 %vm554_vm4, %v2033_v19 }
 0x7e2   :  { %4867 = vmatmul.msk.f32.vlgmr.msra.gmra.mxu2 %vm554_vm4, %v5676_v60 }
 0x7e6   :  { %v1983_v17 = vpop.permute.xlu0 %1982 }
 0x7e7   :  { %4862 = vmatpush.xpose.msk.msra.mxu3 %vm554_vm4, %v1983_v17 }
 0x7ea   :  { %4863 = vmatmul.msk.f32.vlgmr.msra.gmra.mxu3 %vm554_vm4, %v5676_v60 }
 0x7ee   :  { %v2008_v51 = vpop.permute.xlu0 %2007 }
 0x7ef   :  { %4864 = vmatpush.xpose.msk.msrb.mxu1 %vm554_vm4, %v2008_v51 }
 0x7f2   :  { %4865 = vmatmul.msk.f32.vlgmr.msrb.gmra.mxu1 %vm554_vm4, %v5676_v60 }
 0x7f7   :  { %v2108_v3 = vpop.permute.xlu2 %2107 }
 0x7f8   :  { %4872 = vmatpush.xpose.msk.msrb.mxu2 %vm554_vm4, %v2108_v3 }
 0x7fb   :  { %4873 = vmatmul.msk.f32.vlgmr.msrb.gmra.mxu2 %vm554_vm4, %v5676_v60 }
 0x7fc   :  { %2355 = vmatpush.msra.mxu2 %v1925_v35 }
 0x7fe   :  { %2424 = vmatpush.msrb.mxu2 %v1928_v2  ;;  %v2058_v18 = vpop.permute.xlu1 %2057 }
 0x7ff   :  { %4868 = vmatpush.xpose.msk.msrb.mxu3 %vm554_vm4, %v2058_v18  ;;  %v2141_v30 = vpop.permute.xlu2 %2140 }
 0x802   :  { %4869 = vmatmul.msk.f32.vlgmr.msrb.gmra.mxu3 %vm554_vm4, %v5676_v60 }
 0x803   :  { %2309 = vmatpush.msra.mxu3 %v1923_v61 }
 0x805   :  { %2378 = vmatpush.msrb.mxu3 %v1926_v63 }
 0x806   :  { %v2083_v41 = vpop.permute.xlu0 %2082  ;;  %v2133_v62 = vpop.permute.xlu1 %2132 }
 0x807   :  { %4870 = vmatpush.xpose.msk.msra.mxu1 %vm554_vm4, %v2083_v41  ;;  %v2149_v29 = vpop.permute.xlu2 %2148 }
 0x80a   :  { %4871 = vmatmul.msk.f32.vlgmr.msra.gmra.mxu1 %vm554_vm4, %v5676_v60 }
 0x80b   :  { %2332 = vmatpush.msrb.mxu1 %v1924_v27 }
 0x80d   :  { %2401 = vmatpush.msra.mxu1 %v1927_v0 }
 0x80e   :  { %v2137_v28 = vpop.permute.xlu0 %2136  ;;  %v2145_v7 = vpop.permute.xlu1 %2144 }
 0x80f   :  { %v2157_v61 = vpop.permute.xlu2 %2156 }
 0x816   :  { %v2153_v2 = vpop.permute.xlu1 %2152 }
 0x817   :  { %v2161_v6 = vpop.permute.xlu2 %2160 }
 0x83d   :  { %v1953_v20 = vpop.f32.mrf.mxu1 }
 0x83e   :  { %v2163_v23 = vadd.f32 %v2133_v62, %v1953_v20 }
 0x840   :  { %v2179_v57 = vmul.f32 0.2, %v2163_v23  ;;  %vm2171_vm0 = vcmp.gt.f32.partialorder %v2163_v23, 0.0 }
 0x842   :  { %v2187_v13 = vsel %vm2171_vm0, %v2163_v23, %v2179_v57 }
 0x843   :  { %v6368_v26 = vsel %vm232_vm5, %v2187_v13, -9e+15 }
 0x844   :  { %v2203_v15 = vsel %vm316_vm2, %v6368_v26, -inf }
 0x845   :  { %2204 = vmax.xlane.f32.xlu0 %v2203_v15 }
 0x84d   :  { %v1978_v31 = vpop.f32.mrf.mxu2 }
 0x84e   :  { %v2164_v53 = vadd.f32 %v2137_v28, %v1978_v31 }
 0x850   :  { %v2180_v21 = vmul.f32 0.2, %v2164_v53  ;;  %vm2172_vm4 = vcmp.gt.f32.partialorder %v2164_v53, 0.0 }
 0x852   :  { %v2188_v60 = vsel %vm2172_vm4, %v2164_v53, %v2180_v21 }
 0x853   :  { %v6374_v32 = vsel %vm232_vm5, %v2188_v60, -9e+15 }
 0x854   :  { %v2206_v37 = vsel %vm316_vm2, %v6374_v32, -inf }
 0x855   :  { %2207 = vmax.xlane.f32.xlu1 %v2206_v37 }
 0x865   :  { %v2053_v16 = vpop.f32.mrf.mxu2 }
 0x866   :  { %v2167_v39 = vadd.f32 %v2149_v29, %v2053_v16 }
 0x868   :  { %v2183_v58 = vmul.f32 0.2, %v2167_v39  ;;  %vm2175_vm6 = vcmp.gt.f32.partialorder %v2167_v39, 0.0 }
 0x86a   :  { %v2191_v43 = vsel %vm2175_vm6, %v2167_v39, %v2183_v58 }
 0x86b   :  { %v6380_v1 = vsel %vm232_vm5, %v2191_v43, -9e+15 }
 0x86c   :  { %v2215_v44 = vsel %vm316_vm2, %v6380_v1, -inf }
 0x86d   :  { %v2003_v47 = vpop.f32.mrf.mxu3  ;;  %2216 = vmax.xlane.f32.xlu1 %v2215_v44 }
 0x86e   :  { %v2165_v56 = vadd.f32 %v2141_v30, %v2003_v47 }
 0x86f   :  { %v2028_v24 = vpop.f32.mrf.mxu1 }
 0x870   :  { %v2181_v8 = vmul.f32 0.2, %v2165_v56  ;;  %v2166_v22 = vadd.f32 %v2145_v7, %v2028_v24  ;;  %vm2173_vm7 = vcmp.gt.f32.partialorder %v2165_v56, 0.0 }
 0x872   :  { %v2182_v49 = vmul.f32 0.2, %v2166_v22  ;;  %v2189_v50 = vsel %vm2173_vm7, %v2165_v56, %v2181_v8  ;;  %vm2174_vm8 = vcmp.gt.f32.partialorder %v2166_v22, 0.0 }
 0x873   :  { %v2197_v9 = vsel %vm232_vm5, %v2189_v50, -9e+15 }
 0x874   :  { %v2209_v10 = vsel %vm316_vm2, %v2197_v9, -inf  ;;  %v2190_v27 = vsel %vm2174_vm8, %v2166_v22, %v2182_v49 }
 0x875   :  { %2210 = vmax.xlane.f32.xlu2 %v2209_v10  ;;  %v2198_v5 = vsel %vm232_vm5, %v2190_v27, -9e+15 }
 0x876   :  { %v2212_v35 = vsel %vm316_vm2, %v2198_v5, -inf }
 0x877   :  { %2213 = vmax.xlane.f32.xlu0 %v2212_v35 }
 0x87e   :  { %v2128_v25 = vpop.f32.mrf.mxu2 }
 0x87f   :  { %v2170_v63 = vadd.f32 %v2161_v6, %v2128_v25 }
 0x881   :  { %v2186_v12 = vmul.f32 0.2, %v2170_v63  ;;  %vm2178_vm9 = vcmp.gt.f32.partialorder %v2170_v63, 0.0 }
 0x883   :  { %v2194_v0 = vsel %vm2178_vm9, %v2170_v63, %v2186_v12 }
 0x884   :  { %v2202_v4 = vsel %vm232_vm5, %v2194_v0, -9e+15 }
 0x885   :  { %v2078_v33 = vpop.f32.mrf.mxu3  ;;  %v2224_v52 = vsel %vm316_vm2, %v2202_v4, -inf }
 0x886   :  { %v2168_v59 = vadd.f32 %v2153_v2, %v2078_v33  ;;  %2225 = vmax.xlane.f32.xlu2 %v2224_v52 }
 0x887   :  { %v2103_v55 = vpop.f32.mrf.mxu1 }
 0x888   :  { %v2184_v19 = vmul.f32 0.2, %v2168_v59  ;;  %v2169_v17 = vadd.f32 %v2157_v61, %v2103_v55  ;;  %vm2176_vm10 = vcmp.gt.f32.partialorder %v2168_v59, 0.0 }
 0x88a   :  { %v2185_v51 = vmul.f32 0.2, %v2169_v17  ;;  %v2192_v3 = vsel %vm2176_vm10, %v2168_v59, %v2184_v19  ;;  %vm2177_vm11 = vcmp.gt.f32.partialorder %v2169_v17, 0.0 }
 0x88b   :  { %v2200_v18 = vsel %vm232_vm5, %v2192_v3, -9e+15 }
 0x88c   :  { %v2218_v41 = vsel %vm316_vm2, %v2200_v18, -inf  ;;  %v2193_v62 = vsel %vm2177_vm11, %v2169_v17, %v2185_v51 }
 0x88d   :  { %2219 = vmax.xlane.f32.xlu0 %v2218_v41  ;;  %v2201_v20 = vsel %vm232_vm5, %v2193_v62, -9e+15 }
 0x88e   :  { %v2221_v23 = vsel %vm316_vm2, %v2201_v20, -inf }
 0x88f   :  { %2222 = vmax.xlane.f32.xlu1 %v2221_v23 }
 0x8b8   :  { %v2205_v57 = vpop.xlane.xlu0 %2204 }
 0x8b9   :  { %v2227_v13 = vsub.f32 %v6368_v26, %v2205_v57 }
 0x8bb   :  { %v2235_v15 = vmul.f32 1.442695, %v2227_v13 }
 0x8bd   :  { %5172 = vpow2.f32 %v2235_v15 }
 0x8c3   :  { %v5173_v28 = vpop.eup %5172 }
 0x8c4   :  { %v2251_v31 = vsel %vm316_vm2, %v5173_v28, 0.0 }
 0x8c5   :  { %2252 = vadd.xlane.f32.xlu0 %v2251_v31 }
 0x8c8   :  { %v2208_v53 = vpop.xlane.xlu1 %2207 }
 0x8c9   :  { %v2228_v21 = vsub.f32 %v6374_v32, %v2208_v53 }
 0x8cb   :  { %v2237_v60 = vmul.f32 1.442695, %v2228_v21 }
 0x8cd   :  { %5174 = vpow2.f32 %v2237_v60 }
 0x8d3   :  { %v5175_v37 = vpop.eup %5174 }
 0x8d4   :  { %v2254_v14 = vsel %vm316_vm2, %v5175_v37, 0.0 }
 0x8d5   :  { %2255 = vadd.xlane.f32.xlu1 %v2254_v14 }
 0x8e0   :  { %v2217_v30 = vpop.xlane.xlu1 %2216 }
 0x8e1   :  { %v2231_v29 = vsub.f32 %v6380_v1, %v2217_v30 }
 0x8e3   :  { %v2243_v16 = vmul.f32 1.442695, %v2231_v29  ;;  %v6420_v29 = vld [vmem:[#allocation10 + $0x8] sm:$0xff] }
 0x8e4   :  { %3029 = vmatpush.msrb.mxu0 %v6420_v29 }
 0x8e5   :  { %5176 = vpow2.f32 %v2243_v16 }
 0x8e8   :  { %v2211_v26 = vpop.xlane.xlu2 %2210 }
 0x8e9   :  { %v2229_v39 = vsub.f32 %v2197_v9, %v2211_v26 }
 0x8ea   :  { %v2214_v58 = vpop.xlane.xlu0 %2213 }
 0x8eb   :  { %v5177_v43 = vpop.eup %5176  ;;  %v2239_v44 = vmul.f32 1.442695, %v2229_v39  ;;  %v2230_v47 = vsub.f32 %v2198_v5, %v2214_v58  ;;  %v6424_v58 = vld [vmem:[#allocation10] sm:$0xff] }
 0x8ec   :  { %v2263_v56 = vsel %vm316_vm2, %v5177_v43, 0.0  ;;  %3030 = vmatpush.msrb.mxu0 %v6424_v58 }
 0x8ed   :  { %5178 = vpow2.f32 %v2239_v44  ;;  %v2241_v32 = vmul.f32 1.442695, %v2230_v47  ;;  %2264 = vadd.xlane.f32.xlu1 %v2263_v56  ;;  %v6430_v44 = vld [vmem:[%s7155_s11] sm:$0xff] }
 0x8ee   :  { %3163 = vmatpush.msra.mxu0 %v6420_v29 }
 0x8ef   :  { %5180 = vpow2.f32 %v2241_v32 }
 0x8f0   :  { %3164 = vmatpush.msra.mxu0 %v6424_v58 }
 0x8f3   :  { %v5179_v7 = vpop.eup %5178 }
 0x8f4   :  { %v2257_v24 = vsel %vm316_vm2, %v5179_v7, 0.0 }
 0x8f5   :  { %v5181_v8 = vpop.eup %5180  ;;  %2258 = vadd.xlane.f32.xlu0 %v2257_v24  ;;  %v2724_v24 = vld [vmem:[#allocation9 + $0x8] sm:$0xff] }
 0x8f6   :  { %v2260_v1 = vsel %vm316_vm2, %v5181_v8, 0.0 }
 0x8f7   :  { %2261 = vadd.xlane.f32.xlu2 %v2260_v1  ;;  %v6441_v1 = vld [vmem:[#allocation10 + $0x18] sm:$0xff] }
 0x8f9   :  { %v2226_v22 = vpop.xlane.xlu2 %2225 }
 0x8fa   :  { %v2234_v49 = vsub.f32 %v2202_v4, %v2226_v22  ;;  %v2723_v22 = vld [vmem:[#allocation9] sm:$0xff] }
 0x8fc   :  { %v2249_v50 = vmul.f32 1.442695, %v2234_v49  ;;  %v2725_v49 = vld [vmem:[#allocation9 + $0x10] sm:$0xff] }
 0x8fe   :  { %5182 = vpow2.f32 %v2249_v50 }
 0x900   :  { %v2220_v9 = vpop.xlane.xlu0 %2219 }
 0x901   :  { %v2232_v61 = vsub.f32 %v2200_v18, %v2220_v9  ;;  %v6444_v9 = vld [vmem:[#allocation10 + $0x10] sm:$0xff] }
 0x902   :  { %v2223_v10 = vpop.xlane.xlu1 %2222 }
 0x903   :  { %v2245_v27 = vmul.f32 1.442695, %v2232_v61  ;;  %v2233_v5 = vsub.f32 %v2201_v20, %v2223_v10  ;;  %v6450_v10 = vld [vmem:[%s7155_s11 + $0x8] sm:$0xff]  ;;  %s5679_s11 = smov 96  }
 0x904   :  { %v5183_v35 = vpop.eup %5182 }
 0x905   :  { %5184 = vpow2.f32 %v2245_v27  ;;  %v2247_v6 = vmul.f32 1.442695, %v2233_v5  ;;  %v2272_v25 = vsel %vm316_vm2, %v5183_v35, 0.0 }
 0x906   :  { %2273 = vadd.xlane.f32.xlu1 %v2272_v25 }
 0x907   :  { %5186 = vpow2.f32 %v2247_v6 }
 0x90b   :  { %v5185_v63 = vpop.eup %5184 }
 0x90c   :  { %v2266_v12 = vsel %vm316_vm2, %v5185_v63, 0.0 }
 0x90d   :  { %v5187_v0 = vpop.eup %5186  ;;  %2267 = vadd.xlane.f32.xlu0 %v2266_v12 }
 0x90e   :  { %v2269_v4 = vsel %vm316_vm2, %v5187_v0, 0.0 }
 0x90f   :  { %2270 = vadd.xlane.f32.xlu2 %v2269_v4 }
 0x938   :  { %v2253_v2 = vpop.xlane.xlu0 %2252 }
 0x939   :  { %5188 = vrcp.f32 %v2253_v2 }
 0x93f   :  { %v5189_v33 = vpop.eup %5188 }
 0x940   :  { %v2283_v52 = vmul.f32 %v5189_v33, %v5173_v28 }
 0x942   :  { %4874 = vmatmul.msk.f32.vlgmr.msra.gmra.mxu3 %vm316_vm2, %v2283_v52 }
 0x943   :  { %2447 = vmatpush.msra.mxu3 %v6334_v11 }
 0x948   :  { %v2256_v59 = vpop.xlane.xlu1 %2255 }
 0x949   :  { %5190 = vrcp.f32 %v2256_v59 }
 0x94f   :  { %v5191_v55 = vpop.eup %5190 }
 0x950   :  { %v2284_v19 = vmul.f32 %v5191_v55, %v5175_v37 }
 0x952   :  { %4875 = vmatmul.msk.f32.vlgmr.msrb.gmra.mxu1 %vm316_vm2, %v2284_v19 }
 0x953   :  { %2470 = vmatpush.msrb.mxu1 %v6337_v54 }
 0x960   :  { %v2265_v17 = vpop.xlane.xlu1 %2264 }
 0x961   :  { %5192 = vrcp.f32 %v2265_v17 }
 0x967   :  { %v5193_v51 = vpop.eup %5192 }
 0x968   :  { %v2287_v3 = vmul.f32 %v5193_v51, %v5177_v43  ;;  %v2259_v18 = vpop.xlane.xlu0 %2258 }
 0x969   :  { %5194 = vrcp.f32 %v2259_v18 }
 0x96a   :  { %4878 = vmatmul.msk.f32.vlgmr.msra.gmra.mxu1 %vm316_vm2, %v2287_v3  ;;  %v2262_v41 = vpop.xlane.xlu2 %2261 }
 0x96b   :  { %5196 = vrcp.f32 %v2262_v41  ;;  %2886 = vmatpush.msra.mxu1 %v6420_v29 }
 0x96d   :  { %2887 = vmatpush.msra.mxu1 %v6424_v58 }
 0x96f   :  { %v5195_v62 = vpop.eup %5194 }
 0x970   :  { %v2285_v11 = vmul.f32 %v5195_v62, %v5179_v7 }
 0x971   :  { %v5197_v20 = vpop.eup %5196 }
 0x972   :  { %v2286_v23 = vmul.f32 %v5197_v20, %v5181_v8  ;;  %4876 = vmatmul.msk.f32.vlgmr.msra.gmra.mxu2 %vm316_vm2, %v2285_v11  ;;  %v2726_v8 = vld [vmem:[#allocation9 + $0x18] sm:$0xff] }
 0x973   :  { %2773 = vmatpush.msra.mxu2 %v2724_v24 }
 0x974   :  { %4877 = vmatmul.msk.f32.vlgmr.msrb.gmra.mxu3 %vm316_vm2, %v2286_v23 }
 0x975   :  { %2825 = vmatpush.msrb.mxu3 %v2726_v8  ;;  %2774 = vmatpush.msra.mxu2 %v2723_v22 }
 0x977   :  { %2826 = vmatpush.msrb.mxu3 %v2725_v49 }
 0x979   :  { %v2274_v57 = vpop.xlane.xlu1 %2273 }
 0x97a   :  { %5198 = vrcp.f32 %v2274_v57 }
 0x980   :  { %v5199_v54 = vpop.eup %5198  ;;  %v2268_v13 = vpop.xlane.xlu0 %2267 }
 0x981   :  { %v2290_v15 = vmul.f32 %v5199_v54, %v5183_v35  ;;  %5200 = vrcp.f32 %v2268_v13 }
 0x982   :  { %v2271_v28 = vpop.xlane.xlu2 %2270 }
 0x983   :  { %4881 = vmatmul.msk.f32.vlgmr.msrb.gmra.mxu1 %vm316_vm2, %v2290_v15  ;;  %5202 = vrcp.f32 %v2271_v28 }
 0x984   :  { %2959 = vmatpush.msrb.mxu1 %v6441_v1 }
 0x986   :  { %2960 = vmatpush.msrb.mxu1 %v6444_v9 }
 0x987   :  { %v5201_v31 = vpop.eup %5200 }
 0x988   :  { %v2288_v53 = vmul.f32 %v5201_v31, %v5185_v63 }
 0x989   :  { %v5203_v21 = vpop.eup %5202 }
 0x98a   :  { %v2289_v60 = vmul.f32 %v5203_v21, %v5187_v0  ;;  %4879 = vmatmul.msk.f32.vlgmr.msrb.gmra.mxu2 %vm316_vm2, %v2288_v53 }
 0x98b   :  { %4915 = vmatmul.msk.f32.vlgmr.msra.gmra.mxu1 %vm494_vm3, %v6430_v44  ;;  %3833 = vmatpush.msrb.mxu2 %v6420_v29 }
 0x98c   :  { %4880 = vmatmul.msk.f32.vlgmr.msra.gmra.mxu3 %vm316_vm2, %v2289_v60  ;;  %3096 = vmatpush.msra.mxu1 %v6441_v1 }
 0x98d   :  { %3900 = vmatpush.msra.mxu3 %v6441_v1  ;;  %3834 = vmatpush.msrb.mxu2 %v6424_v58 }
 0x98e   :  { %3097 = vmatpush.msra.mxu1 %v6444_v9 }
 0x98f   :  { %3901 = vmatpush.msra.mxu3 %v6444_v9 }
 0x993   :  { %4917 = vmatmul.msk.f32.vlgmr.msrb.gmra.mxu1 %vm494_vm3, %v6450_v10 }
 0x994   :  { %3230 = vmatpush.msrb.mxu1 %v6441_v1 }
 0x996   :  { %3231 = vmatpush.msrb.mxu1 %v6444_v9 }
 0x9c5   :  { %v2311_v37 = vpop.f32.mrf.mxu3 }
 0x9c6   :  { %v2483_v14 = vmin.f32 %v2311_v37, 0.0  ;;  %vm2475_vm2 = vcmp.gt.f32.partialorder %v2311_v37, 0.0 }
 0x9c8   :  { %v2491_v30 = vmul.f32 1.442695, %v2483_v14 }
 0x9ca   :  { %5204 = vpow2.f32 %v2491_v30 }
 0x9cf   :  { %v2334_v16 = vpop.f32.mrf.mxu1 }
 0x9d0   :  { %v5205_v26 = vpop.eup %5204  ;;  %v2484_v39 = vmin.f32 %v2334_v16, 0.0  ;;  %vm2476_vm5 = vcmp.gt.f32.partialorder %v2334_v16, 0.0 }
 0x9d1   :  { %v4882_v43 = vadd.f32 -1.0, %v5205_v26 }
 0x9d2   :  { %v2493_v47 = vmul.f32 1.442695, %v2484_v39 }
 0x9d3   :  { %v6436_v56 = vsel %vm2475_vm2, %v2311_v37, %v4882_v43 }
 0x9d4   :  { %v2523_v32 = vadd.f32 %v6436_v56, %v5947_v34  ;;  %5206 = vpow2.f32 %v2493_v47 }
 0x9d6   :  { %v4890_v7 = vmul.f32 -1.442695, %v2523_v32 }
 0x9d8   :  { %5208 = vpow2.f32 %v4890_v7 }
 0x9da   :  { %v5207_v50 = vpop.eup %5206 }
 0x9db   :  { %v4883_v61 = vadd.f32 -1.0, %v5207_v50 }
 0x9dd   :  { %v6456_v27 = vsel %vm2476_vm5, %v2334_v16, %v4883_v61 }
 0x9de   :  { %v5209_v5 = vpop.eup %5208  ;;  %v2524_v35 = vadd.f32 %v6456_v27, %v5951_v36 }
 0x9df   :  { %v2555_v6 = vadd.f32 1.0, %v5209_v5 }
 0x9e0   :  { %v4891_v25 = vmul.f32 -1.442695, %v2524_v35 }
 0x9e1   :  { %5210 = vrcp.f32 %v2555_v6  ;;  %v2574_v55 = vand.u32 2147483648, %v2555_v6  ;;  %v2572_v17 = vand.u32 2147483647, %v2555_v6  ;;  %vm2568_vm13 = vweird.f32 %v2555_v6 }
 0x9e2   :  { %5212 = vpow2.f32 %v4891_v25 }
 0x9e3   :  { %v2575_v3 = vor.u32 1.1754944e-38, %v2574_v55  ;;  %vm2573_vm15 = vcmp.eq.f32.partialorder %v2572_v17, 8.507059e+37 }
 0x9e7   :  { %v5211_v63 = vpop.eup %5210  ;;  %v2403_v12 = vpop.f32.mrf.mxu1 }
 0x9e8   :  { %v5213_v0 = vpop.eup %5212  ;;  %v2564_v4 = vmul.f32 %v5211_v63, %v2555_v6  ;;  %v2487_v2 = vmin.f32 %v2403_v12, 0.0  ;;  %vm2569_vm12 = vweird.f32 %v5211_v63  ;;  %vm2479_vm0 = vcmp.gt.f32.partialorder %v2403_v12, 0.0 }
 0x9e9   :  { %v2556_v33 = vadd.f32 1.0, %v5213_v0  ;;  %vm2570_vm14 = vmor %vm2568_vm13, %vm2569_vm12 }
 0x9ea   :  { %v2565_v52 = vsub.f32 1.0, %v2564_v4  ;;  %v2499_v59 = vmul.f32 1.442695, %v2487_v2 }
 0x9eb   :  { %5214 = vrcp.f32 %v2556_v33  ;;  %v2587_v28 = vand.u32 2147483647, %v2556_v33  ;;  %v2589_v31 = vand.u32 2147483648, %v2556_v33  ;;  %vm2583_vm6 = vweird.f32 %v2556_v33 }
 0x9ec   :  { %v2566_v19 = vmul.f32 %v5211_v63, %v2565_v52  ;;  %5216 = vpow2.f32 %v2499_v59 }
 0x9ed   :  { %v2590_v43 = vor.u32 1.1754944e-38, %v2589_v31  ;;  %vm2588_vm8 = vcmp.eq.f32.partialorder %v2587_v28, 8.507059e+37 }
 0x9ee   :  { %v2567_v51 = vadd.f32 %v5211_v63, %v2566_v19 }
 0x9f0   :  { %v2571_v18 = vsel %vm2570_vm14, %v5211_v63, %v2567_v51 }
 0x9f1   :  { %v5215_v41 = vpop.eup %5214  ;;  %v2576_v62 = vsel %vm2573_vm15, %v2575_v3, %v2571_v18 }
 0x9f2   :  { %v5217_v11 = vpop.eup %5216  ;;  %v2691_v20 = vsub.f32 1.0, %v2576_v62  ;;  %v2579_v23 = vmul.f32 %v5215_v41, %v2556_v33  ;;  %v2683_v54 = vmul.f32 %v2576_v62, %v6436_v56  ;;  %vm2584_vm4 = vweird.f32 %v5215_v41 }
 0x9f3   :  { %v4886_v57 = vadd.f32 -1.0, %v5217_v11  ;;  %vm2585_vm7 = vmor %vm2583_vm6, %vm2584_vm4 }
 0x9f4   :  { %v2699_v13 = vmul.f32 %v2691_v20, %v5947_v34  ;;  %v2580_v15 = vsub.f32 1.0, %v2579_v23 }
 0x9f5   :  { %v6468_v53 = vsel %vm2479_vm0, %v2403_v12, %v4886_v57  ;;  %v2357_v21 = vpop.f32.mrf.mxu2 }
 0x9f6   :  { %v6470_v60 = vadd.f32 %v2699_v13, %v2683_v54  ;;  %v2581_v37 = vmul.f32 %v5215_v41, %v2580_v15  ;;  %v2527_v14 = vadd.f32 %v6468_v53, %v5963_v42  ;;  %v2485_v30 = vmin.f32 %v2357_v21, 0.0 }
 0x9f7   :  { %v2380_v16 = vpop.f32.mrf.mxu3  ;;  %vm2477_vm9 = vcmp.gt.f32.partialorder %v2357_v21, 0.0 }
 0x9f8   :  { %2715 = vst.msk [vmem:[#allocation22] sm:$0xff] %vm494_vm3, %v6470_v60  ;;  %v2582_v34 = vadd.f32 %v5215_v41, %v2581_v37  ;;  %v4894_v26 = vmul.f32 -1.442695, %v2527_v14  ;;  %v2486_v39 = vmin.f32 %v2380_v16, 0.0  ;;  %4898 = vmatmul.msk.f32.vlgmr.msra.gmra.mxu2 %vm494_vm3, %v6470_v60  ;;  %4906 = vmatmul.msk.f32.vlgmr.msrb.gmra.mxu3 %vm494_vm3, %v6470_v60  ;;  %v2495_v47 = vmul.f32 1.442695, %v2485_v30 }
 0x9f9   :  { %vm2478_vm10 = vcmp.gt.f32.partialorder %v2380_v16, 0.0 }
 0x9fa   :  { %v2586_v56 = vsel %vm2585_vm7, %v5215_v41, %v2582_v34  ;;  %5218 = vpow2.f32 %v4894_v26  ;;  %v2497_v32 = vmul.f32 1.442695, %v2486_v39 }
 0x9fb   :  { %v2591_v7 = vsel %vm2588_vm8, %v2590_v43, %v2586_v56  ;;  %5220 = vpow2.f32 %v2495_v47 }
 0x9fc   :  { %v2692_v24 = vsub.f32 1.0, %v2591_v7  ;;  %5222 = vpow2.f32 %v2497_v32  ;;  %v2684_v8 = vmul.f32 %v2591_v7, %v6456_v27 }
 0x9fe   :  { %v2700_v22 = vmul.f32 %v2692_v24, %v5951_v36 }
 0xa00   :  { %v5219_v49 = vpop.eup %5218  ;;  %v2472_v50 = vpop.f32.mrf.mxu1  ;;  %v6482_v61 = vadd.f32 %v2700_v22, %v2684_v8 }
 0xa01   :  { %v5221_v5 = vpop.eup %5220  ;;  %v2559_v35 = vadd.f32 1.0, %v5219_v49  ;;  %v2490_v6 = vmin.f32 %v2472_v50, 0.0  ;;  %vm2482_vm11 = vcmp.gt.f32.partialorder %v2472_v50, 0.0 }
 0xa02   :  { %v5223_v25 = vpop.eup %5222  ;;  %v4884_v63 = vadd.f32 -1.0, %v5221_v5  ;;  %2716 = vst.msk [vmem:[#allocation22 + $0x8] sm:$0xff] %vm494_vm3, %v6482_v61  ;;  %4899 = vmatmul.msk.f32.gmra.mxu2 %vm494_vm3, %v6482_v61  ;;  %4907 = vmatmul.msk.f32.gmra.mxu3 %vm494_vm3, %v6482_v61 }
 0xa03   :  { %5224 = vrcp.f32 %v2559_v35  ;;  %v4885_v27 = vadd.f32 -1.0, %v5223_v25  ;;  %v2505_v12 = vmul.f32 1.442695, %v2490_v6  ;;  %v2634_v51 = vand.u32 2147483648, %v2559_v35 }
 0xa04   :  { %v6490_v36 = vsel %vm2477_vm9, %v2357_v21, %v4884_v63  ;;  %v2632_v62 = vand.u32 2147483647, %v2559_v35  ;;  %vm2628_vm5 = vweird.f32 %v2559_v35 }
 0xa05   :  { %v2525_v0 = vadd.f32 %v6490_v36, %v5955_v38  ;;  %v6494_v4 = vsel %vm2478_vm10, %v2380_v16, %v4885_v27  ;;  %5226 = vpow2.f32 %v2505_v12  ;;  %v2635_v21 = vor.u32 1.1754944e-38, %v2634_v51 }
 0xa06   :  { %v2526_v33 = vadd.f32 %v6494_v4, %v5957_v40  ;;  %vm2633_vm13 = vcmp.eq.f32.partialorder %v2632_v62, 8.507059e+37 }
 0xa07   :  { %v4892_v2 = vmul.f32 -1.442695, %v2525_v0 }
 0xa08   :  { %v4893_v59 = vmul.f32 -1.442695, %v2526_v33 }
 0xa09   :  { %v5225_v52 = vpop.eup %5224  ;;  %5228 = vpow2.f32 %v4892_v2 }
 0xa0a   :  { %v2624_v55 = vmul.f32 %v5225_v52, %v2559_v35  ;;  %5230 = vpow2.f32 %v4893_v59  ;;  %vm2629_vm2 = vweird.f32 %v5225_v52 }
 0xa0b   :  { %v5227_v19 = vpop.eup %5226  ;;  %vm2630_vm12 = vmor %vm2628_vm5, %vm2629_vm2 }
 0xa0c   :  { %v2625_v17 = vsub.f32 1.0, %v2624_v55  ;;  %v4889_v3 = vadd.f32 -1.0, %v5227_v19 }
 0xa0d   :  { %v2426_v18 = vpop.f32.mrf.mxu2 }
 0xa0e   :  { %v2626_v41 = vmul.f32 %v5225_v52, %v2625_v17  ;;  %v2488_v11 = vmin.f32 %v2426_v18, 0.0  ;;  %v6498_v23 = vsel %vm2482_vm11, %v2472_v50, %v4889_v3  ;;  %vm2480_vm14 = vcmp.gt.f32.partialorder %v2426_v18, 0.0 }
 0xa0f   :  { %v5229_v20 = vpop.eup %5228  ;;  %v6500_v57 = vpop.f32.mrf.mxu3  ;;  %v2530_v15 = vadd.f32 %v6498_v23, %v5969_v46 }
 0xa10   :  { %v2627_v54 = vadd.f32 %v5225_v52, %v2626_v41  ;;  %v2557_v13 = vadd.f32 1.0, %v5229_v20  ;;  %v2501_v28 = vmul.f32 1.442695, %v2488_v11  ;;  %v5231_v31 = vpop.eup %5230  ;;  %v2489_v14 = vmin.f32 %v6500_v57, 0.0 }
 0xa11   :  { %v2558_v16 = vadd.f32 1.0, %v5231_v31  ;;  %v4897_v34 = vmul.f32 -1.442695, %v2530_v15  ;;  %vm2481_vm8 = vcmp.gt.f32.partialorder %v6500_v57, 0.0 }
 0xa12   :  { %v2631_v37 = vsel %vm2630_vm12, %v5225_v52, %v2627_v54  ;;  %5232 = vrcp.f32 %v2557_v13  ;;  %v2503_v43 = vmul.f32 1.442695, %v2489_v14  ;;  %v2604_v8 = vand.u32 2147483648, %v2557_v13 }
 0xa13   :  { %v2636_v30 = vsel %vm2633_vm13, %v2635_v21, %v2631_v37  ;;  %5234 = vpow2.f32 %v2501_v28  ;;  %v2602_v35 = vand.u32 2147483647, %v2557_v13  ;;  %vm2598_vm0 = vweird.f32 %v2557_v13 }
 0xa14   :  { %v2695_v26 = vsub.f32 1.0, %v2636_v30  ;;  %5236 = vrcp.f32 %v2558_v16  ;;  %v2687_v39 = vmul.f32 %v2636_v30, %v6468_v53  ;;  %v2605_v27 = vor.u32 1.1754944e-38, %v2604_v8 }
 0xa15   :  { %5238 = vpow2.f32 %v4897_v34  ;;  %v2617_v33 = vand.u32 2147483647, %v2558_v16  ;;  %v2619_v52 = vand.u32 2147483648, %v2558_v16  ;;  %vm2603_vm7 = vcmp.eq.f32.partialorder %v2602_v35, 8.507059e+37 }
 0xa16   :  { %v2703_v47 = vmul.f32 %v2695_v26, %v5963_v42  ;;  %5240 = vpow2.f32 %v2503_v43  ;;  %vm2613_vm9 = vweird.f32 %v2558_v16 }
 0xa17   :  { %v2620_v41 = vor.u32 1.1754944e-38, %v2619_v52  ;;  %vm2618_vm11 = vcmp.eq.f32.partialorder %v2617_v33, 8.507059e+37 }
 0xa18   :  { %v5233_v56 = vpop.eup %5232  ;;  %v6507_v32 = vadd.f32 %v2703_v47, %v2687_v39 }
 0xa19   :  { %v2594_v7 = vmul.f32 %v5233_v56, %v2557_v13  ;;  %v5235_v24 = vpop.eup %5234  ;;  %vm2599_vm15 = vweird.f32 %v5233_v56 }
 0xa1a   :  { %2719 = vst.msk [vmem:[#allocation22 + $0x20] sm:$0xff] %vm494_vm3, %v6507_v32  ;;  %v5237_v22 = vpop.eup %5236  ;;  %v4887_v50 = vadd.f32 -1.0, %v5235_v24  ;;  %vm2600_vm4 = vmor %vm2598_vm0, %vm2599_vm15 }
 0xa1b   :  { %v2595_v49 = vsub.f32 1.0, %v2594_v7  ;;  %v5239_v5 = vpop.eup %5238  ;;  %v2609_v53 = vmul.f32 %v5237_v22, %v2558_v16  ;;  %vm2614_vm6 = vweird.f32 %v5237_v22 }
 0xa1c   :  { %v2562_v42 = vadd.f32 1.0, %v5239_v5  ;;  %v6511_v25 = vsel %vm2480_vm14, %v2426_v18, %v4887_v50  ;;  %v5241_v63 = vpop.eup %5240  ;;  %vm2615_vm10 = vmor %vm2613_vm9, %vm2614_vm6 }
 0xa1d   :  { %v2596_v6 = vmul.f32 %v5233_v56, %v2595_v49  ;;  %v2610_v12 = vsub.f32 1.0, %v2609_v53  ;;  %v2528_v0 = vadd.f32 %v6511_v25, %v5967_v45  ;;  %v4888_v19 = vadd.f32 -1.0, %v5241_v63 }
 0xa1e   :  { %5242 = vrcp.f32 %v2562_v42  ;;  %v2679_v26 = vand.u32 2147483648, %v2562_v42  ;;  %vm2673_vm5 = vweird.f32 %v2562_v42 }
 0xa1f   :  { %v2597_v2 = vadd.f32 %v5233_v56, %v2596_v6  ;;  %v2611_v59 = vmul.f32 %v5237_v22, %v2610_v12  ;;  %v4895_v55 = vmul.f32 -1.442695, %v2528_v0  ;;  %v6517_v62 = vsel %vm2481_vm8, %v6500_v57, %v4888_v19 }
 0xa20   :  { %v2529_v20 = vadd.f32 %v6517_v62, %v5973_v48 }
 0xa21   :  { %v2601_v17 = vsel %vm2600_vm4, %v5233_v56, %v2597_v2  ;;  %v2612_v3 = vadd.f32 %v5237_v22, %v2611_v59  ;;  %5244 = vpow2.f32 %v4895_v55 }
 0xa22   :  { %v2606_v51 = vsel %vm2603_vm7, %v2605_v27, %v2601_v17  ;;  %v4896_v37 = vmul.f32 -1.442695, %v2529_v20 }
 0xa23   :  { %v2693_v18 = vsub.f32 1.0, %v2606_v51  ;;  %v2616_v11 = vsel %vm2615_vm10, %v5237_v22, %v2612_v3  ;;  %v2685_v13 = vmul.f32 %v2606_v51, %v6490_v36  ;;  %v2677_v36 = vand.u32 2147483647, %v2562_v42 }
 0xa24   :  { %v5243_v54 = vpop.eup %5242  ;;  %v2621_v15 = vsel %vm2618_vm11, %v2620_v41, %v2616_v11  ;;  %5246 = vpow2.f32 %v4896_v37 }
 0xa25   :  { %v2701_v28 = vmul.f32 %v2693_v18, %v5955_v38  ;;  %v2694_v31 = vsub.f32 1.0, %v2621_v15  ;;  %v2669_v21 = vmul.f32 %v5243_v54, %v2562_v42  ;;  %v2686_v57 = vmul.f32 %v2621_v15, %v6494_v4  ;;  %v2889_v15 = vpop.f32.mrf.mxu1 }
 0xa26   :  { %vm2674_vm2 = vweird.f32 %v5243_v54  ;;  %vm2678_vm13 = vcmp.eq.f32.partialorder %v2677_v36, 8.507059e+37 }
 0xa27   :  { %v6523_v14 = vadd.f32 %v2701_v28, %v2685_v13  ;;  %v5245_v30 = vpop.eup %5244  ;;  %v2670_v16 = vsub.f32 1.0, %v2669_v21  ;;  %v2702_v34 = vmul.f32 %v2694_v31, %v5957_v40  ;;  %vm2675_vm12 = vmor %vm2673_vm5, %vm2674_vm2  ;;  %v2680_v40 = vor.u32 1.1754944e-38, %v2679_v26  ;;  %v6595_v26 = vld [vmem:[#allocation12 + $0x1] ss:$0 sm:$0xff] }
 0xa28   :  { %v2560_v39 = vadd.f32 1.0, %v5245_v30 }
 0xa29   :  { %2717 = vst.msk [vmem:[#allocation22 + $0x10] sm:$0xff] %vm494_vm3, %v6523_v14  ;;  %4900 = vmatmul.msk.f32.gmra.mxu2 %vm494_vm3, %v6523_v14  ;;  %4908 = vmatmul.msk.f32.gmra.mxu3 %vm494_vm3, %v6523_v14  ;;  %v2671_v38 = vmul.f32 %v5243_v54, %v2670_v16  ;;  %v6533_v43 = vadd.f32 %v2702_v34, %v2686_v57 }
 0xa2a   :  { %5248 = vrcp.f32 %v2560_v39  ;;  %v5247_v56 = vpop.eup %5246  ;;  %v2649_v53 = vand.u32 2147483648, %v2560_v39  ;;  %v2647_v63 = vand.u32 2147483647, %v2560_v39  ;;  %vm2643_vm15 = vweird.f32 %v2560_v39 }
 0xa2b   :  { %v2672_v4 = vadd.f32 %v5243_v54, %v2671_v38  ;;  %2718 = vst.msk [vmem:[#allocation22 + $0x18] sm:$0xff] %vm494_vm3, %v6533_v43  ;;  %v2561_v8 = vadd.f32 1.0, %v5247_v56 }
 0xa2c   :  { %v2650_v0 = vor.u32 1.1754944e-38, %v2649_v53  ;;  %vm2648_vm4 = vcmp.eq.f32.partialorder %v2647_v63, 8.507059e+37  ;;  %v6599_v63 = vld [vmem:[#allocation13] ss:$0 sm:$0xff] }
 0xa2d   :  { %v2676_v47 = vsel %vm2675_vm12, %v5243_v54, %v2672_v4  ;;  %5250 = vrcp.f32 %v2561_v8  ;;  %v2664_v59 = vand.u32 2147483648, %v2561_v8  ;;  %v2662_v19 = vand.u32 2147483647, %v2561_v8 }
 0xa2e   :  { %v2681_v7 = vsel %vm2678_vm13, %v2680_v40, %v2676_v47  ;;  %vm2658_vm7 = vweird.f32 %v2561_v8 }
 0xa2f   :  { %v2698_v24 = vsub.f32 1.0, %v2681_v7  ;;  %v2690_v50 = vmul.f32 %v2681_v7, %v6498_v23  ;;  %v2665_v18 = vor.u32 1.1754944e-38, %v2664_v59  ;;  %vm2663_vm9 = vcmp.eq.f32.partialorder %v2662_v19, 8.507059e+37 }
 0xa30   :  { %v5249_v22 = vpop.eup %5248 }
 0xa31   :  { %4901 = vmatmul.msk.f32.gmra.mxu2 %vm494_vm3, %v6533_v43  ;;  %4909 = vmatmul.msk.f32.gmra.mxu3 %vm494_vm3, %v6533_v43  ;;  %v2639_v49 = vmul.f32 %v5249_v22, %v2560_v39  ;;  %v2706_v5 = vmul.f32 %v2698_v24, %v5969_v46  ;;  %vm2644_vm14 = vweird.f32 %v5249_v22 }
 0xa32   :  { %vm2645_vm0 = vmor %vm2643_vm15, %vm2644_vm14 }
 0xa33   :  { %v2640_v35 = vsub.f32 1.0, %v2639_v49  ;;  %v6543_v6 = vadd.f32 %v2706_v5, %v2690_v50  ;;  %v5251_v27 = vpop.eup %5250 }
 0xa34   :  { %v2654_v2 = vmul.f32 %v5251_v27, %v2561_v8  ;;  %vm2659_vm6 = vweird.f32 %v5251_v27 }
 0xa35   :  { %v2641_v42 = vmul.f32 %v5249_v22, %v2640_v35  ;;  %2722 = vst.msk [vmem:[#allocation22 + $0x38] sm:$0xff] %vm494_vm3, %v6543_v6  ;;  %vm2660_vm8 = vmor %vm2658_vm7, %vm2659_vm6 }
 0xa36   :  { %v2655_v33 = vsub.f32 1.0, %v2654_v2 }
 0xa37   :  { %v2642_v12 = vadd.f32 %v5249_v22, %v2641_v42 }
 0xa38   :  { %v2656_v55 = vmul.f32 %v5251_v27, %v2655_v33 }
 0xa39   :  { %4902 = vmatmul.msk.f32.gmra.mxu2 %vm494_vm3, %v6507_v32  ;;  %4910 = vmatmul.msk.f32.gmra.mxu3 %vm494_vm3, %v6507_v32  ;;  %v2646_v46 = vsel %vm2645_vm0, %v5249_v22, %v2642_v12  ;;  %v6603_v12 = vld [vmem:[#allocation12] ss:$0 sm:$0xff] }
 0xa3a   :  { %v2651_v23 = vsel %vm2648_vm4, %v2650_v0, %v2646_v46  ;;  %v2657_v3 = vadd.f32 %v5251_v27, %v2656_v55 }
 0xa3b   :  { %v2696_v52 = vsub.f32 1.0, %v2651_v23  ;;  %v2688_v17 = vmul.f32 %v2651_v23, %v6511_v25 }
 0xa3c   :  { %v2661_v11 = vsel %vm2660_vm8, %v5251_v27, %v2657_v3  ;;  %v2890_v27 = vadd.f32 %v6599_v63, %v2889_v15 }
 0xa3d   :  { %v2704_v51 = vmul.f32 %v2696_v52, %v5967_v45  ;;  %v2666_v20 = vsel %vm2663_vm9, %v2665_v18, %v2661_v11 }
 0xa3e   :  { %v2697_v25 = vsub.f32 1.0, %v2666_v20  ;;  %v2689_v45 = vmul.f32 %v2666_v20, %v6517_v62  ;;  %v6575_v62 = vld [vmem:[#allocation13 + $0x1] ss:$0 sm:$0xff] }
 0xa3f   :  { %v6553_v41 = vadd.f32 %v2704_v51, %v2688_v17 }
 0xa40   :  { %v2705_v54 = vmul.f32 %v2697_v25, %v5973_v48  ;;  %v2962_v48 = vpop.f32.mrf.mxu1 }
 0xa41   :  { %2720 = vst.msk [vmem:[#allocation22 + $0x28] sm:$0xff] %vm494_vm3, %v6553_v41  ;;  %4903 = vmatmul.msk.f32.gmra.mxu2 %vm494_vm3, %v6553_v41  ;;  %4911 = vmatmul.msk.f32.gmra.mxu3 %vm494_vm3, %v6553_v41  ;;  %v2963_v28 = vadd.f32 %v6575_v62, %v2962_v48 }
 0xa42   :  { %v6563_v13 = vadd.f32 %v2705_v54, %v2689_v45 }
 0xa43   :  { %2986 = vrot.lane.b32.xlu0 %v2963_v28, %s5679_s11 }
 0xa44   :  { %2721 = vst.msk [vmem:[#allocation22 + $0x30] sm:$0xff] %vm494_vm3, %v6563_v13 }
 0xa49   :  { %4904 = vmatmul.msk.f32.gmra.mxu2 %vm494_vm3, %v6563_v13  ;;  %4912 = vmatmul.msk.f32.gmra.mxu3 %vm494_vm3, %v6563_v13 }
 0xa4b   :  { %3002 = vrot.lane.b32.xlu0 %v6450_v10, %s5665_s0 }
 0xa51   :  { %4905 = vmatmul.msk.f32.gmra.mxu2 %vm494_vm3, %v6543_v6  ;;  %4913 = vmatmul.msk.f32.gmra.mxu3 %vm494_vm3, %v6543_v6 }
 0xa7b   :  { %v6581_v31 = vpop.f32.mrf.mxu3  ;;  %v2776_v0 = vpop.f32.mrf.mxu2 }
 0xa7c   :  { %v2803_v2 = vadd.f32 %v6603_v12, %v2776_v0 }
 0xa7e   :  { %v2892_v46 = vadd.f32 %v2890_v27, %v2803_v2 }
 0xa80   :  { %v4916_v23 = vmul.f32 -1.442695, %v2892_v46 }
 0xa85   :  { %v6583_v21 = vpop.f32.mrf.mxu3 }
 0xaac   :  { %v6585_v37 = vpop.f32.mrf.mxu3 }
 0xab4   :  { %v6587_v30 = vpop.f32.mrf.mxu3 }
 0xab5   :  { %v2987_v35 = vpop.permute.xlu0 %2986 }
 0xabc   :  { %v6589_v57 = vpop.f32.mrf.mxu3 }
 0xac4   :  { %v6591_v16 = vpop.f32.mrf.mxu3 }
 0xacc   :  { %v6593_v34 = vpop.f32.mrf.mxu3 }
 0xad4   :  { %v2849_v39 = vpop.f32.mrf.mxu3 }
 0xad5   :  { %v2862_v38 = vadd.f32 %v6595_v26, %v2849_v39  ;;  %v3003_v39 = vpop.permute.xlu0 %3002 }
 0xad7   :  { %v2965_v10 = vadd.f32 %v2963_v28, %v2862_v38 }
 0xad9   :  { %v4918_v36 = vmul.f32 -1.442695, %v2965_v10 }
 0xadb   :  { %5252 = vpow2.f32 %v4918_v36 }
 0xae1   :  { %v5253_v4 = vpop.eup %5252 }
 0xae2   :  { %v2969_v40 = vadd.f32 1.0, %v5253_v4 }
 0xae4   :  { %5254 = vrcp.f32 %v2969_v40  ;;  %v2981_v24 = vand.u32 2147483648, %v2969_v40  ;;  %v2979_v22 = vand.u32 2147483647, %v2969_v40  ;;  %vm2975_vm11 = vweird.f32 %v2969_v40 }
 0xae5   :  { %5256 = vpow2.f32 %v4916_v23 }
 0xae6   :  { %v2982_v50 = vor.u32 1.1754944e-38, %v2981_v24  ;;  %vm2980_vm5 = vcmp.eq.f32.partialorder %v2979_v22, 8.507059e+37 }
 0xaea   :  { %v5255_v47 = vpop.eup %5254 }
 0xaeb   :  { %v2971_v56 = vmul.f32 %v5255_v47, %v2969_v40  ;;  %vm2976_vm10 = vweird.f32 %v5255_v47  ;;  %v5257_v33 = vpop.eup %5256 }
 0xaec   :  { %vm2977_vm2 = vmor %vm2975_vm11, %vm2976_vm10  ;;  %v2896_v52 = vadd.f32 1.0, %v5257_v33 }
 0xaed   :  { %v2972_v7 = vsub.f32 1.0, %v2971_v56 }
 0xaee   :  { %5258 = vrcp.f32 %v2896_v52  ;;  %v2908_v11 = vand.u32 2147483648, %v2896_v52  ;;  %vm2902_vm13 = vweird.f32 %v2896_v52  ;;  %v2906_v20 = vand.u32 2147483647, %v2896_v52 }
 0xaef   :  { %v2973_v8 = vmul.f32 %v5255_v47, %v2972_v7 }
 0xaf0   :  { %v2909_v45 = vor.u32 1.1754944e-38, %v2908_v11  ;;  %vm2907_vm15 = vcmp.eq.f32.partialorder %v2906_v20, 8.507059e+37 }
 0xaf1   :  { %v2974_v49 = vadd.f32 %v5255_v47, %v2973_v8 }
 0xaf3   :  { %v2978_v5 = vsel %vm2977_vm2, %v5255_v47, %v2974_v49 }
 0xaf4   :  { %v2983_v53 = vsel %vm2980_vm5, %v2982_v50, %v2978_v5  ;;  %v5259_v59 = vpop.eup %5258 }
 0xaf5   :  { %v2989_v42 = vmul.f32 %v2987_v35, %v2983_v53  ;;  %v2898_v55 = vmul.f32 %v5259_v59, %v2896_v52  ;;  %vm2903_vm12 = vweird.f32 %v5259_v59  ;;  %v3005_v36 = vmul.f32 %v3003_v39, %v2983_v53 }
 0xaf6   :  { %vm2904_vm14 = vmor %vm2902_vm13, %vm2903_vm12 }
 0xaf7   :  { %2991 = vrot.lane.b32.xlu2 %v2989_v42, %s5680_s7  ;;  %v2899_v19 = vsub.f32 1.0, %v2898_v55 }
 0xaf9   :  { %v2900_v17 = vmul.f32 %v5259_v59, %v2899_v19 }
 0xafb   :  { %v2901_v18 = vadd.f32 %v5259_v59, %v2900_v17 }
 0xafd   :  { %v2905_v25 = vsel %vm2904_vm14, %v5259_v59, %v2901_v18 }
 0xafe   :  { %v2910_v54 = vsel %vm2907_vm15, %v2909_v45, %v2905_v25 }
 0xaff   :  { %2913 = vrot.lane.b32.xlu2 %v2890_v27, %s5679_s11  ;;  %v2923_v22 = vsub.f32 1.0, %v2910_v54  ;;  %v2861_v27 = vadd.f32 %v6595_v26, %v6593_v34 }
 0xb51   :  { %v2992_v51 = vpop.permute.xlu2 %2991 }
 0xb52   :  { %v2994_v3 = vadd.f32 %v2992_v51, %v2862_v38  ;;  %v2996_v38 = vsub.f32 1.0, %v2983_v53 }
 0xb54   :  { %5260 = vtanh.f32 %v2994_v3 }
 0xb59   :  { %v2914_v15 = vpop.permute.xlu2 %2913 }
 0xb5a   :  { %v5261_v48 = vpop.eup %5260  ;;  %v2916_v28 = vmul.f32 %v2914_v15, %v2910_v54 }
 0xb5b   :  { %2998 = vrot.lane.b32.xlu1 %v5261_v48, %s5681_s16 }
 0xb5c   :  { %2918 = vrot.lane.b32.xlu0 %v2916_v28, %s5680_s7 }
 0xbcd   :  { %v2999_v10 = vpop.permute.xlu1 %2998 }
 0xbce   :  { %v3001_v4 = vmul.f32 %v2999_v10, %v2996_v38  ;;  %v2919_v40 = vpop.permute.xlu0 %2918 }
 0xbcf   :  { %v2921_v47 = vadd.f32 %v2919_v40, %v2803_v2 }
 0xbd0   :  { %v6608_v56 = vadd.f32 %v3005_v36, %v3001_v4 }
 0xbd1   :  { %5262 = vtanh.f32 %v2921_v47 }
 0xbd2   :  { %3008 = vrot.lane.b32.xlu1 %v6608_v56, %s5681_s16 }
 0xbd7   :  { %v5263_v7 = vpop.eup %5262 }
 0xbd8   :  { %2925 = vrot.lane.b32.xlu2 %v5263_v7, %s5681_s16 }
 0xbda   :  { %2929 = vrot.lane.b32.xlu1 %v6430_v44, %s5665_s0 }
 0xc32   :  { %v2926_v8 = vpop.permute.xlu2 %2925 }
 0xc33   :  { %v2928_v50 = vmul.f32 %v2926_v8, %v2923_v22 }
 0xc44   :  { %v3009_v24 = vpop.permute.xlu1 %3008 }
 0xc45   :  { %3012 = vst.msk [vmem:[#allocation3 + $0x38] sm:$0xff] %vm494_vm3, %v3009_v24  ;;  %4921 = vmatmul.msk.f32.vlgmr.msra.gmra.mxu1 %vm494_vm3, %v3009_v24 }
 0xc46   :  { %3364 = vmatpush.msra.mxu1 %v6441_v1 }
 0xc48   :  { %3365 = vmatpush.msra.mxu1 %v6444_v9 }
 0xc4c   :  { %v2930_v49 = vpop.permute.xlu1 %2929 }
 0xc4d   :  { %v2932_v5 = vmul.f32 %v2930_v49, %v2910_v54  ;;  %v2779_v54 = vpop.f32.mrf.mxu2 }
 0xc4e   :  { %v2804_v15 = vadd.f32 %v6603_v12, %v2779_v54 }
 0xc4f   :  { %v6619_v35 = vadd.f32 %v2932_v5, %v2928_v50 }
 0xc51   :  { %2935 = vrot.lane.b32.xlu0 %v6619_v35, %s5681_s16 }
 0xcc2   :  { %v3099_v44 = vpop.f32.mrf.mxu1 }
 0xcc3   :  { %v3100_v53 = vadd.f32 %v6575_v62, %v3099_v44  ;;  %v2936_v42 = vpop.permute.xlu0 %2935 }
 0xcc4   :  { %2938 = vst.msk [vmem:[#allocation2] sm:$0xff] %vm494_vm3, %v2936_v42  ;;  %4919 = vmatmul.msk.f32.vlgmr.msrb.gmra.mxu0 %vm494_vm3, %v2936_v42 }
 0xcc5   :  { %3123 = vrot.lane.b32.xlu2 %v3100_v53, %s5679_s11  ;;  %3297 = vmatpush.msrb.mxu0 %v6420_v29  ;;  %v3102_v0 = vadd.f32 %v3100_v53, %v2861_v27 }
 0xcc7   :  { %3298 = vmatpush.msrb.mxu0 %v6424_v58  ;;  %v4922_v2 = vmul.f32 -1.442695, %v3102_v0 }
 0xcc9   :  { %5264 = vpow2.f32 %v4922_v2 }
 0xccf   :  { %v5265_v46 = vpop.eup %5264 }
 0xcd0   :  { %v3106_v23 = vadd.f32 1.0, %v5265_v46 }
 0xcd2   :  { %5266 = vrcp.f32 %v3106_v23  ;;  %v3118_v17 = vand.u32 2147483648, %v3106_v23  ;;  %vm3112_vm4 = vweird.f32 %v3106_v23  ;;  %v3116_v51 = vand.u32 2147483647, %v3106_v23 }
 0xcd4   :  { %v3119_v18 = vor.u32 1.1754944e-38, %v3118_v17  ;;  %vm3117_vm7 = vcmp.eq.f32.partialorder %v3116_v51, 8.507059e+37 }
 0xcd8   :  { %v5267_v33 = vpop.eup %5266 }
 0xcd9   :  { %v3108_v52 = vmul.f32 %v5267_v33, %v3106_v23  ;;  %vm3113_vm0 = vweird.f32 %v5267_v33 }
 0xcda   :  { %vm3114_vm6 = vmor %vm3112_vm4, %vm3113_vm0 }
 0xcdb   :  { %v3109_v59 = vsub.f32 1.0, %v3108_v52 }
 0xcdd   :  { %v3110_v55 = vmul.f32 %v5267_v33, %v3109_v59 }
 0xcdf   :  { %v3111_v19 = vadd.f32 %v5267_v33, %v3110_v55 }
 0xce1   :  { %v3115_v3 = vsel %vm3114_vm6, %v5267_v33, %v3111_v19 }
 0xce2   :  { %v3120_v34 = vsel %vm3117_vm7, %v3119_v18, %v3115_v3 }
 0xce3   :  { %v3139_v2 = vmul.f32 %v3120_v34, %v6608_v56 }
 0xd1f   :  { %v3124_v11 = vpop.permute.xlu2 %3123 }
 0xd20   :  { %v3126_v20 = vmul.f32 %v3124_v11, %v3120_v34  ;;  %v2860_v11 = vadd.f32 %v6595_v26, %v6591_v16 }
 0xd22   :  { %3128 = vrot.lane.b32.xlu1 %v3126_v20, %s5680_s7 }
 0xd41   :  { %v3032_v25 = vpop.f32.mrf.mxu0 }
 0xd42   :  { %v3033_v45 = vadd.f32 %v6599_v63, %v3032_v25 }
 0xd44   :  { %3056 = vrot.lane.b32.xlu2 %v3033_v45, %s5679_s11  ;;  %v3035_v48 = vadd.f32 %v3033_v45, %v2804_v15 }
 0xd46   :  { %v4920_v28 = vmul.f32 -1.442695, %v3035_v48 }
 0xd48   :  { %5268 = vpow2.f32 %v4920_v28 }
 0xd4e   :  { %v5269_v39 = vpop.eup %5268 }
 0xd4f   :  { %v3039_v38 = vadd.f32 1.0, %v5269_v39 }
 0xd51   :  { %5270 = vrcp.f32 %v3039_v38  ;;  %v3051_v22 = vand.u32 2147483648, %v3039_v38  ;;  %vm3045_vm9 = vweird.f32 %v3039_v38  ;;  %v3049_v49 = vand.u32 2147483647, %v3039_v38 }
 0xd53   :  { %v3052_v5 = vor.u32 1.1754944e-38, %v3051_v22  ;;  %vm3050_vm11 = vcmp.eq.f32.partialorder %v3049_v49, 8.507059e+37 }
 0xd57   :  { %v5271_v10 = vpop.eup %5270 }
 0xd58   :  { %v3041_v36 = vmul.f32 %v5271_v10, %v3039_v38  ;;  %vm3046_vm8 = vweird.f32 %v5271_v10 }
 0xd59   :  { %vm3047_vm10 = vmor %vm3045_vm9, %vm3046_vm8 }
 0xd5a   :  { %v3042_v40 = vsub.f32 1.0, %v3041_v36 }
 0xd5c   :  { %v3043_v7 = vmul.f32 %v5271_v10, %v3042_v40 }
 0xd5e   :  { %v3044_v24 = vadd.f32 %v5271_v10, %v3043_v7 }
 0xd60   :  { %v3048_v50 = vsel %vm3047_vm10, %v5271_v10, %v3044_v24 }
 0xd61   :  { %v3053_v53 = vsel %vm3050_vm11, %v3052_v5, %v3048_v50 }
 0xd62   :  { %v3066_v55 = vsub.f32 1.0, %v3053_v53  ;;  %v3072_v17 = vmul.f32 %v3053_v53, %v6619_v35 }
 0xd94   :  { %v3129_v4 = vpop.permute.xlu1 %3128 }
 0xd95   :  { %v3131_v47 = vadd.f32 %v3129_v4, %v2861_v27  ;;  %v3133_v27 = vsub.f32 1.0, %v3120_v34 }
 0xd97   :  { %5272 = vtanh.f32 %v3131_v47  ;;  %v2782_v47 = vpop.f32.mrf.mxu2 }
 0xd98   :  { %v2805_v7 = vadd.f32 %v6603_v12, %v2782_v47 }
 0xd9d   :  { %v5273_v8 = vpop.eup %5272 }
 0xd9e   :  { %3135 = vrot.lane.b32.xlu0 %v5273_v8, %s5681_s16  ;;  %v3057_v44 = vpop.permute.xlu2 %3056 }
 0xd9f   :  { %v3059_v42 = vmul.f32 %v3057_v44, %v3053_v53 }
 0xda6   :  { %3061 = vrot.lane.b32.xlu0 %v3059_v42, %s5680_s7 }
 0xe10   :  { %v3136_v0 = vpop.permute.xlu0 %3135 }
 0xe11   :  { %v3138_v46 = vmul.f32 %v3136_v0, %v3133_v27 }
 0xe13   :  { %v6638_v23 = vadd.f32 %v3139_v2, %v3138_v46 }
 0xe15   :  { %3142 = vrot.lane.b32.xlu1 %v6638_v23, %s5681_s16 }
 0xe18   :  { %v3062_v33 = vpop.permute.xlu0 %3061 }
 0xe19   :  { %v3064_v52 = vadd.f32 %v3062_v33, %v2804_v15 }
 0xe1b   :  { %5274 = vtanh.f32 %v3064_v52 }
 0xe21   :  { %v5275_v59 = vpop.eup %5274 }
 0xe22   :  { %3068 = vrot.lane.b32.xlu2 %v5275_v59, %s5681_s16 }
 0xe7c   :  { %v3069_v19 = vpop.permute.xlu2 %3068 }
 0xe7d   :  { %v3071_v51 = vmul.f32 %v3069_v19, %v3066_v55 }
 0xe7f   :  { %v6644_v3 = vadd.f32 %v3072_v17, %v3071_v51 }
 0xe81   :  { %3075 = vrot.lane.b32.xlu1 %v6644_v3, %s5681_s16 }
 0xe87   :  { %v3143_v56 = vpop.permute.xlu1 %3142 }
 0xe88   :  { %3146 = vst.msk [vmem:[#allocation3 + $0x30] sm:$0xff] %vm494_vm3, %v3143_v56  ;;  %4925 = vmatmul.msk.f32.vlgmr.msrb.gmra.mxu1 %vm494_vm3, %v3143_v56 }
 0xe89   :  { %3498 = vmatpush.msrb.mxu1 %v6441_v1 }
 0xe8b   :  { %3499 = vmatpush.msrb.mxu1 %v6444_v9 }
 0xef3   :  { %v3076_v18 = vpop.permute.xlu1 %3075 }
 0xef4   :  { %3079 = vst.msk [vmem:[#allocation2 + $0x8] sm:$0xff] %vm494_vm3, %v3076_v18  ;;  %4923 = vmatmul.msk.f32.vlgmr.msra.gmra.mxu0 %vm494_vm3, %v3076_v18 }
 0xef5   :  { %3431 = vmatpush.msra.mxu0 %v6420_v29 }
 0xef7   :  { %3432 = vmatpush.msra.mxu0 %v6424_v58 }
 0xf05   :  { %v3233_v35 = vpop.f32.mrf.mxu1 }
 0xf06   :  { %v3234_v34 = vadd.f32 %v6575_v62, %v3233_v35 }
 0xf08   :  { %3257 = vrot.lane.b32.xlu0 %v3234_v34, %s5679_s11  ;;  %v3236_v1 = vadd.f32 %v3234_v34, %v2860_v11 }
 0xf0a   :  { %v4926_v20 = vmul.f32 -1.442695, %v3236_v1 }
 0xf0c   :  { %5276 = vpow2.f32 %v4926_v20 }
 0xf12   :  { %v5277_v9 = vpop.eup %5276 }
 0xf13   :  { %v3240_v25 = vadd.f32 1.0, %v5277_v9 }
 0xf15   :  { %5278 = vrcp.f32 %v3240_v25  ;;  %v3252_v39 = vand.u32 2147483648, %v3240_v25  ;;  %vm3246_vm5 = vweird.f32 %v3240_v25  ;;  %v3250_v16 = vand.u32 2147483647, %v3240_v25 }
 0xf17   :  { %v3253_v10 = vor.u32 1.1754944e-38, %v3252_v39  ;;  %vm3251_vm13 = vcmp.eq.f32.partialorder %v3250_v16, 8.507059e+37  ;;  %v6689_v16 = vld [vmem:[#allocation10 + $0x8] sm:$0xff] }
 0xf1b   :  { %v5279_v45 = vpop.eup %5278 }
 0xf1c   :  { %v3242_v54 = vmul.f32 %v5279_v45, %v3240_v25  ;;  %vm3247_vm2 = vweird.f32 %v5279_v45  ;;  %v6674_v25 = vld [vmem:[#allocation10 + $0x18] sm:$0xff] }
 0xf1d   :  { %vm3248_vm12 = vmor %vm3246_vm5, %vm3247_vm2 }
 0xf1e   :  { %v3243_v15 = vsub.f32 1.0, %v3242_v54 }
 0xf20   :  { %v3244_v29 = vmul.f32 %v5279_v45, %v3243_v15 }
 0xf22   :  { %v3245_v28 = vadd.f32 %v5279_v45, %v3244_v29 }
 0xf24   :  { %v3249_v38 = vsel %vm3248_vm12, %v5279_v45, %v3245_v28 }
 0xf25   :  { %v3254_v36 = vsel %vm3251_vm13, %v3253_v10, %v3249_v38  ;;  %v2859_v38 = vadd.f32 %v6595_v26, %v6589_v57 }
 0xf26   :  { %v3267_v51 = vsub.f32 1.0, %v3254_v36  ;;  %v3273_v18 = vmul.f32 %v3254_v36, %v6638_v23  ;;  %v6677_v23 = vld [vmem:[#allocation10 + $0x10] sm:$0xff] }
 0xf71   :  { %v3166_v48 = vpop.f32.mrf.mxu0 }
 0xf72   :  { %v3167_v58 = vadd.f32 %v6599_v63, %v3166_v48 }
 0xf74   :  { %3190 = vrot.lane.b32.xlu0 %v3167_v58, %s5679_s11  ;;  %v3169_v24 = vadd.f32 %v3167_v58, %v2805_v7 }
 0xf76   :  { %v4924_v8 = vmul.f32 -1.442695, %v3169_v24 }
 0xf78   :  { %5280 = vpow2.f32 %v4924_v8 }
 0xf7a   :  { %v3258_v4 = vpop.permute.xlu0 %3257 }
 0xf7b   :  { %v3260_v40 = vmul.f32 %v3258_v4, %v3254_v36 }
 0xf7d   :  { %3262 = vrot.lane.b32.xlu2 %v3260_v40, %s5680_s7 }
 0xf7e   :  { %v5281_v22 = vpop.eup %5280 }
 0xf7f   :  { %v3173_v49 = vadd.f32 1.0, %v5281_v22 }
 0xf81   :  { %5282 = vrcp.f32 %v3173_v49  ;;  %v3185_v46 = vand.u32 2147483648, %v3173_v49  ;;  %vm3179_vm15 = vweird.f32 %v3173_v49  ;;  %v3183_v33 = vand.u32 2147483647, %v3173_v49 }
 0xf83   :  { %v3186_v59 = vor.u32 1.1754944e-38, %v3185_v46  ;;  %vm3184_vm4 = vcmp.eq.f32.partialorder %v3183_v33, 8.507059e+37 }
 0xf87   :  { %v5283_v50 = vpop.eup %5282 }
 0xf88   :  { %v3175_v5 = vmul.f32 %v5283_v50, %v3173_v49  ;;  %vm3180_vm14 = vweird.f32 %v5283_v50 }
 0xf89   :  { %vm3181_vm0 = vmor %vm3179_vm15, %vm3180_vm14 }
 0xf8a   :  { %v3176_v53 = vsub.f32 1.0, %v3175_v5 }
 0xf8c   :  { %v3177_v27 = vmul.f32 %v5283_v50, %v3176_v53 }
 0xf8e   :  { %v3178_v0 = vadd.f32 %v5283_v50, %v3177_v27 }
 0xf90   :  { %v3182_v52 = vsel %vm3181_vm0, %v5283_v50, %v3178_v0 }
 0xf91   :  { %v3187_v55 = vsel %vm3184_vm4, %v3186_v59, %v3182_v52 }
 0xf92   :  { %v3200_v45 = vsub.f32 1.0, %v3187_v55  ;;  %v3206_v15 = vmul.f32 %v3187_v55, %v6644_v3  ;;  %v6692_v3 = vld [vmem:[#allocation10] sm:$0xff] }
 0xfd7   :  { %v3263_v44 = vpop.permute.xlu2 %3262 }
 0xfd8   :  { %v3265_v42 = vadd.f32 %v3263_v44, %v2860_v11 }
 0xfda   :  { %5284 = vtanh.f32 %v3265_v42 }
 0xfe0   :  { %v5285_v2 = vpop.eup %5284 }
 0xfe1   :  { %3269 = vrot.lane.b32.xlu1 %v5285_v2, %s5681_s16  ;;  %v2785_v2 = vpop.f32.mrf.mxu2 }
 0xfe2   :  { %v2806_v46 = vadd.f32 %v6603_v12, %v2785_v2 }
 0xfe6   :  { %v3191_v19 = vpop.permute.xlu0 %3190 }
 0xfe7   :  { %v3193_v17 = vmul.f32 %v3191_v19, %v3187_v55 }
 0xfe9   :  { %3195 = vrot.lane.b32.xlu1 %v3193_v17, %s5680_s7 }
0x1053   :  { %v3270_v56 = vpop.permute.xlu1 %3269 }
0x1054   :  { %v3272_v35 = vmul.f32 %v3270_v56, %v3267_v51 }
0x1056   :  { %v6667_v34 = vadd.f32 %v3273_v18, %v3272_v35 }
0x1058   :  { %3276 = vrot.lane.b32.xlu2 %v6667_v34, %s5681_s16 }
0x105b   :  { %v3196_v11 = vpop.permute.xlu1 %3195 }
0x105c   :  { %v3198_v1 = vadd.f32 %v3196_v11, %v2805_v7 }
0x105e   :  { %5286 = vtanh.f32 %v3198_v1 }
0x1064   :  { %v5287_v20 = vpop.eup %5286 }
0x1065   :  { %3202 = vrot.lane.b32.xlu0 %v5287_v20, %s5681_s16 }
0x10b2   :  { %v3277_v9 = vpop.permute.xlu2 %3276 }
0x10b3   :  { %3280 = vst.msk [vmem:[#allocation3 + $0x28] sm:$0xff] %vm494_vm3, %v3277_v9  ;;  %4929 = vmatmul.msk.f32.vlgmr.msra.gmra.mxu1 %vm494_vm3, %v3277_v9 }
0x10b4   :  { %3632 = vmatpush.msra.mxu1 %v6674_v25 }
0x10b6   :  { %3633 = vmatpush.msra.mxu1 %v6677_v23 }
0x10d7   :  { %v3203_v54 = vpop.permute.xlu0 %3202 }
0x10d8   :  { %v3205_v29 = vmul.f32 %v3203_v54, %v3200_v45 }
0x10da   :  { %v6681_v48 = vadd.f32 %v3206_v15, %v3205_v29 }
0x10dc   :  { %3209 = vrot.lane.b32.xlu2 %v6681_v48, %s5681_s16 }
0x1130   :  { %v3367_v58 = vpop.f32.mrf.mxu1 }
0x1131   :  { %v3368_v28 = vadd.f32 %v6575_v62, %v3367_v58 }
0x1133   :  { %3391 = vrot.lane.b32.xlu1 %v3368_v28, %s5679_s11  ;;  %v3370_v10 = vadd.f32 %v3368_v28, %v2859_v38 }
0x1135   :  { %v4930_v36 = vmul.f32 -1.442695, %v3370_v10 }
0x1136   :  { %v3210_v39 = vpop.permute.xlu2 %3209 }
0x1137   :  { %3213 = vst.msk [vmem:[#allocation2 + $0x10] sm:$0xff] %vm494_vm3, %v3210_v39  ;;  %4927 = vmatmul.msk.f32.vlgmr.msrb.gmra.mxu0 %vm494_vm3, %v3210_v39  ;;  %5288 = vpow2.f32 %v4930_v36 }
0x1138   :  { %3565 = vmatpush.msrb.mxu0 %v6689_v16 }
0x113a   :  { %3566 = vmatpush.msrb.mxu0 %v6692_v3 }
0x113d   :  { %v5289_v4 = vpop.eup %5288 }
0x113e   :  { %v3374_v40 = vadd.f32 1.0, %v5289_v4 }
0x1140   :  { %5290 = vrcp.f32 %v3374_v40  ;;  %v3386_v49 = vand.u32 2147483648, %v3374_v40  ;;  %vm3380_vm7 = vweird.f32 %v3374_v40  ;;  %v3384_v50 = vand.u32 2147483647, %v3374_v40 }
0x1142   :  { %v3387_v44 = vor.u32 1.1754944e-38, %v3386_v49  ;;  %vm3385_vm9 = vcmp.eq.f32.partialorder %v3384_v50, 8.507059e+37 }
0x1146   :  { %v5291_v47 = vpop.eup %5290 }
0x1147   :  { %v3376_v7 = vmul.f32 %v5291_v47, %v3374_v40  ;;  %vm3381_vm6 = vweird.f32 %v5291_v47 }
0x1148   :  { %vm3382_vm8 = vmor %vm3380_vm7, %vm3381_vm6 }
0x1149   :  { %v3377_v24 = vsub.f32 1.0, %v3376_v7 }
0x114b   :  { %v3378_v8 = vmul.f32 %v5291_v47, %v3377_v24 }
0x114d   :  { %v3379_v22 = vadd.f32 %v5291_v47, %v3378_v8 }
0x114f   :  { %v3383_v5 = vsel %vm3382_vm8, %v5291_v47, %v3379_v22 }
0x1150   :  { %v3388_v57 = vsel %vm3385_vm9, %v3387_v44, %v3383_v5 }
0x1151   :  { %v3401_v28 = vsub.f32 1.0, %v3388_v57 }
0x11a5   :  { %v3392_v53 = vpop.permute.xlu1 %3391 }
0x11a6   :  { %v3394_v42 = vmul.f32 %v3392_v53, %v3388_v57 }
0x11a8   :  { %3396 = vrot.lane.b32.xlu0 %v3394_v42, %s5680_s7 }
0x11b4   :  { %v3300_v27 = vpop.f32.mrf.mxu0 }
0x11b5   :  { %v3301_v0 = vadd.f32 %v6599_v63, %v3300_v27 }
0x11b7   :  { %3324 = vrot.lane.b32.xlu1 %v3301_v0, %s5679_s11  ;;  %v3303_v33 = vadd.f32 %v3301_v0, %v2806_v46 }
0x11b9   :  { %v4928_v52 = vmul.f32 -1.442695, %v3303_v33 }
0x11bb   :  { %5292 = vpow2.f32 %v4928_v52 }
0x11c1   :  { %v5293_v59 = vpop.eup %5292 }
0x11c2   :  { %v3307_v55 = vadd.f32 1.0, %v5293_v59 }
0x11c4   :  { %5294 = vrcp.f32 %v3307_v55  ;;  %v3319_v20 = vand.u32 2147483648, %v3307_v55  ;;  %vm3313_vm11 = vweird.f32 %v3307_v55  ;;  %v3317_v9 = vand.u32 2147483647, %v3307_v55 }
0x11c6   :  { %v3320_v54 = vor.u32 1.1754944e-38, %v3319_v20  ;;  %vm3318_vm5 = vcmp.eq.f32.partialorder %v3317_v9, 8.507059e+37 }
0x11ca   :  { %v5295_v19 = vpop.eup %5294 }
0x11cb   :  { %v3309_v17 = vmul.f32 %v5295_v19, %v3307_v55  ;;  %vm3314_vm10 = vweird.f32 %v5295_v19 }
0x11cc   :  { %vm3315_vm2 = vmor %vm3313_vm11, %vm3314_vm10 }
0x11cd   :  { %v3310_v56 = vsub.f32 1.0, %v3309_v17 }
0x11cf   :  { %v3311_v35 = vmul.f32 %v5295_v19, %v3310_v56 }
0x11d1   :  { %v3312_v11 = vadd.f32 %v5295_v19, %v3311_v35 }
0x11d3   :  { %v3316_v45 = vsel %vm3315_vm2, %v5295_v19, %v3312_v11 }
0x11d4   :  { %v3321_v15 = vsel %vm3318_vm5, %v3320_v54, %v3316_v45 }
0x11d5   :  { %v3340_v8 = vmul.f32 %v3321_v15, %v6681_v48 }
0x121a   :  { %v3397_v51 = vpop.permute.xlu0 %3396 }
0x121b   :  { %v3399_v18 = vadd.f32 %v3397_v51, %v2859_v38  ;;  %v3407_v38 = vmul.f32 %v3388_v57, %v6667_v34  ;;  %v3334_v34 = vsub.f32 1.0, %v3321_v15  ;;  %v2788_v51 = vpop.f32.mrf.mxu2 }
0x121c   :  { %v2807_v56 = vadd.f32 %v6603_v12, %v2788_v51 }
0x121d   :  { %5296 = vtanh.f32 %v3399_v18 }
0x1223   :  { %v5297_v1 = vpop.eup %5296 }
0x1224   :  { %3403 = vrot.lane.b32.xlu2 %v5297_v1, %s5681_s16 }
0x1229   :  { %v3325_v29 = vpop.permute.xlu1 %3324 }
0x122a   :  { %v3327_v58 = vmul.f32 %v3325_v29, %v3321_v15 }
0x122c   :  { %3329 = vrot.lane.b32.xlu2 %v3327_v58, %s5680_s7 }
0x127e   :  { %v3404_v39 = vpop.permute.xlu2 %3403 }
0x127f   :  { %v3406_v10 = vmul.f32 %v3404_v39, %v3401_v28 }
0x1281   :  { %v6704_v36 = vadd.f32 %v3407_v38, %v3406_v10 }
0x1283   :  { %3410 = vrot.lane.b32.xlu0 %v6704_v36, %s5681_s16 }
0x1286   :  { %v3330_v4 = vpop.permute.xlu2 %3329 }
0x1287   :  { %v3332_v40 = vadd.f32 %v3330_v4, %v2806_v46 }
0x1289   :  { %5298 = vtanh.f32 %v3332_v40 }
0x128f   :  { %v5299_v47 = vpop.eup %5298 }
0x1290   :  { %3336 = vrot.lane.b32.xlu1 %v5299_v47, %s5681_s16 }
0x12f5   :  { %v3411_v7 = vpop.permute.xlu0 %3410 }
0x12f6   :  { %3414 = vst.msk [vmem:[#allocation3 + $0x20] sm:$0xff] %vm494_vm3, %v3411_v7  ;;  %4933 = vmatmul.msk.f32.vlgmr.msrb.gmra.mxu1 %vm494_vm3, %v3411_v7 }
0x12f7   :  { %3766 = vmatpush.msrb.mxu1 %v6674_v25  ;;  %v2858_v25 = vadd.f32 %v6595_v26, %v6587_v30 }
0x12f9   :  { %3767 = vmatpush.msrb.mxu1 %v6677_v23 }
0x1302   :  { %v3337_v24 = vpop.permute.xlu1 %3336 }
0x1303   :  { %v3339_v22 = vmul.f32 %v3337_v24, %v3334_v34 }
0x1305   :  { %v6714_v49 = vadd.f32 %v3340_v8, %v3339_v22 }
0x1307   :  { %3343 = vrot.lane.b32.xlu0 %v6714_v49, %s5681_s16 }
0x1373   :  { %v3501_v50 = vpop.f32.mrf.mxu1 }
0x1374   :  { %v3502_v5 = vadd.f32 %v6575_v62, %v3501_v50 }
0x1376   :  { %3525 = vrot.lane.b32.xlu2 %v3502_v5, %s5679_s11  ;;  %v3504_v23 = vadd.f32 %v3502_v5, %v2858_v25 }
0x1378   :  { %v4934_v48 = vmul.f32 -1.442695, %v3504_v23 }
0x1379   :  { %v3344_v44 = vpop.permute.xlu0 %3343 }
0x137a   :  { %3347 = vst.msk [vmem:[#allocation2 + $0x18] sm:$0xff] %vm494_vm3, %v3344_v44  ;;  %4931 = vmatmul.msk.f32.vlgmr.msra.gmra.mxu0 %vm494_vm3, %v3344_v44  ;;  %5300 = vpow2.f32 %v4934_v48 }
0x137b   :  { %3699 = vmatpush.msra.mxu0 %v6689_v16 }
0x137d   :  { %3700 = vmatpush.msra.mxu0 %v6692_v3 }
0x1380   :  { %v5301_v57 = vpop.eup %5300 }
0x1381   :  { %v3508_v53 = vadd.f32 1.0, %v5301_v57 }
0x1383   :  { %5302 = vrcp.f32 %v3508_v53  ;;  %v3520_v33 = vand.u32 2147483648, %v3508_v53  ;;  %vm3514_vm13 = vweird.f32 %v3508_v53  ;;  %v3518_v16 = vand.u32 2147483647, %v3508_v53 }
0x1385   :  { %v3521_v52 = vor.u32 1.1754944e-38, %v3520_v33  ;;  %vm3519_vm15 = vcmp.eq.f32.partialorder %v3518_v16, 8.507059e+37 }
0x1389   :  { %v5303_v42 = vpop.eup %5302 }
0x138a   :  { %v3510_v27 = vmul.f32 %v5303_v42, %v3508_v53  ;;  %vm3515_vm12 = vweird.f32 %v5303_v42 }
0x138b   :  { %vm3516_vm14 = vmor %vm3514_vm13, %vm3515_vm12 }
0x138c   :  { %v3511_v0 = vsub.f32 1.0, %v3510_v27 }
0x138e   :  { %v3512_v2 = vmul.f32 %v5303_v42, %v3511_v0 }
0x1390   :  { %v3513_v46 = vadd.f32 %v5303_v42, %v3512_v2 }
0x1392   :  { %v3517_v3 = vsel %vm3516_vm14, %v5303_v42, %v3513_v46 }
0x1393   :  { %v3522_v30 = vsel %vm3519_vm15, %v3521_v52, %v3517_v3 }
0x1394   :  { %v3535_v34 = vsub.f32 1.0, %v3522_v30  ;;  %v3541_v8 = vmul.f32 %v3522_v30, %v6704_v36 }
0x13d0   :  { %v3526_v59 = vpop.permute.xlu2 %3525 }
0x13d1   :  { %v3528_v55 = vmul.f32 %v3526_v59, %v3522_v30 }
0x13d3   :  { %3530 = vrot.lane.b32.xlu1 %v3528_v55, %s5680_s7 }
0x13f7   :  { %v3434_v19 = vpop.f32.mrf.mxu0 }
0x13f8   :  { %v3435_v17 = vadd.f32 %v6599_v63, %v3434_v19 }
0x13fa   :  { %3458 = vrot.lane.b32.xlu2 %v3435_v17, %s5679_s11  ;;  %v3437_v18 = vadd.f32 %v3435_v17, %v2807_v56 }
0x13fc   :  { %v4932_v35 = vmul.f32 -1.442695, %v3437_v18 }
0x13fe   :  { %5304 = vpow2.f32 %v4932_v35 }
0x1404   :  { %v5305_v11 = vpop.eup %5304 }
0x1405   :  { %v3441_v1 = vadd.f32 1.0, %v5305_v11 }
0x1407   :  { %5306 = vrcp.f32 %v3441_v1  ;;  %v3453_v39 = vand.u32 2147483648, %v3441_v1  ;;  %vm3447_vm4 = vweird.f32 %v3441_v1  ;;  %v3451_v38 = vand.u32 2147483647, %v3441_v1 }
0x1409   :  { %v3454_v4 = vor.u32 1.1754944e-38, %v3453_v39  ;;  %vm3452_vm7 = vcmp.eq.f32.partialorder %v3451_v38, 8.507059e+37 }
0x140d   :  { %v5307_v20 = vpop.eup %5306 }
0x140e   :  { %v3443_v9 = vmul.f32 %v5307_v20, %v3441_v1  ;;  %vm3448_vm0 = vweird.f32 %v5307_v20  ;;  %v2791_v1 = vpop.f32.mrf.mxu2 }
0x140f   :  { %vm3449_vm6 = vmor %vm3447_vm4, %vm3448_vm0 }
0x1410   :  { %v3444_v54 = vsub.f32 1.0, %v3443_v9 }
0x1412   :  { %v3445_v29 = vmul.f32 %v5307_v20, %v3444_v54 }
0x1414   :  { %v3446_v58 = vadd.f32 %v5307_v20, %v3445_v29 }
0x1416   :  { %v3450_v10 = vsel %vm3449_vm6, %v5307_v20, %v3446_v58  ;;  %v2808_v20 = vadd.f32 %v6603_v12, %v2791_v1 }
0x1417   :  { %v3455_v40 = vsel %vm3452_vm7, %v3454_v4, %v3450_v10 }
0x1418   :  { %v3468_v23 = vsub.f32 1.0, %v3455_v40  ;;  %v3474_v57 = vmul.f32 %v3455_v40, %v6714_v49  ;;  %v2857_v49 = vadd.f32 %v6595_v26, %v6585_v37 }
0x1445   :  { %v3531_v45 = vpop.permute.xlu1 %3530 }
0x1446   :  { %v3533_v15 = vadd.f32 %v3531_v45, %v2858_v25 }
0x1448   :  { %5308 = vtanh.f32 %v3533_v15 }
0x144e   :  { %v5309_v28 = vpop.eup %5308 }
0x144f   :  { %3537 = vrot.lane.b32.xlu0 %v5309_v28, %s5681_s16 }
0x1454   :  { %v3459_v47 = vpop.permute.xlu2 %3458 }
0x1455   :  { %v3461_v7 = vmul.f32 %v3459_v47, %v3455_v40 }
0x1457   :  { %3463 = vrot.lane.b32.xlu0 %v3461_v7, %s5680_s7 }
0x14c1   :  { %v3538_v24 = vpop.permute.xlu0 %3537 }
0x14c2   :  { %v3540_v22 = vmul.f32 %v3538_v24, %v3535_v34 }
0x14c4   :  { %v6733_v50 = vadd.f32 %v3541_v8, %v3540_v22 }
0x14c6   :  { %3544 = vrot.lane.b32.xlu1 %v6733_v50, %s5681_s16 }
0x14c9   :  { %v3464_v5 = vpop.permute.xlu0 %3463 }
0x14ca   :  { %v3466_v44 = vadd.f32 %v3464_v5, %v2807_v56 }
0x14cc   :  { %5310 = vtanh.f32 %v3466_v44 }
0x14d2   :  { %v5311_v25 = vpop.eup %5310 }
0x14d3   :  { %3470 = vrot.lane.b32.xlu2 %v5311_v25, %s5681_s16 }
0x152d   :  { %v3471_v48 = vpop.permute.xlu2 %3470 }
0x152e   :  { %v3473_v53 = vmul.f32 %v3471_v48, %v3468_v23 }
0x1530   :  { %v6739_v42 = vadd.f32 %v3474_v57, %v3473_v53 }
0x1532   :  { %3477 = vrot.lane.b32.xlu1 %v6739_v42, %s5681_s16 }
0x1538   :  { %v3545_v36 = vpop.permute.xlu1 %3544 }
0x1539   :  { %3548 = vst.msk [vmem:[#allocation3 + $0x18] sm:$0xff] %vm494_vm3, %v3545_v36  ;;  %4937 = vmatmul.msk.f32.vlgmr.msra.gmra.mxu1 %vm494_vm3, %v3545_v36 }
0x15a4   :  { %v3478_v27 = vpop.permute.xlu1 %3477 }
0x15a5   :  { %3481 = vst.msk [vmem:[#allocation2 + $0x20] sm:$0xff] %vm494_vm3, %v3478_v27  ;;  %4935 = vmatmul.msk.f32.vlgmr.msrb.gmra.mxu0 %vm494_vm3, %v3478_v27 }
0x15b6   :  { %v3635_v0 = vpop.f32.mrf.mxu1 }
0x15b7   :  { %v3636_v2 = vadd.f32 %v6575_v62, %v3635_v0 }
0x15b9   :  { %3659 = vrot.lane.b32.xlu0 %v3636_v2, %s5679_s11  ;;  %v3638_v46 = vadd.f32 %v3636_v2, %v2857_v49 }
0x15bb   :  { %v4938_v33 = vmul.f32 -1.442695, %v3638_v46  ;;  %v3967_v46 = vld [vmem:[%s7156_s12 + $0x8] sm:$0xff] }
0x15bc   :  { %4010 = vmatpush.msrb.mxu0 %v3967_v46 }
0x15bd   :  { %5312 = vpow2.f32 %v4938_v33  ;;  %v3966_v33 = vld [vmem:[%s7156_s12] sm:$0xff] }
0x15be   :  { %4011 = vmatpush.msrb.mxu0 %v3966_v33 }
0x15c3   :  { %v5313_v16 = vpop.eup %5312 }
0x15c4   :  { %v3642_v3 = vadd.f32 1.0, %v5313_v16 }
0x15c6   :  { %5314 = vrcp.f32 %v3642_v3  ;;  %v3654_v62 = vand.u32 2147483648, %v3642_v3  ;;  %vm3648_vm9 = vweird.f32 %v3642_v3  ;;  %v3652_v37 = vand.u32 2147483647, %v3642_v3 }
0x15c8   :  { %v3655_v56 = vor.u32 1.1754944e-38, %v3654_v62  ;;  %vm3653_vm11 = vcmp.eq.f32.partialorder %v3652_v37, 8.507059e+37  ;;  %v6810_v62 = vld [vmem:[#allocation12 + $0x1] ss:$0 sm:$0xff] }
0x15c9   :  { %v2856_v37 = vadd.f32 %v6810_v62, %v6583_v21 }
0x15cc   :  { %v5315_v52 = vpop.eup %5314 }
0x15cd   :  { %v3644_v30 = vmul.f32 %v5315_v52, %v3642_v3  ;;  %vm3649_vm8 = vweird.f32 %v5315_v52  ;;  %v6776_v3 = vld [vmem:[#allocation13 + $0x1] ss:$0 sm:$0xff] }
0x15ce   :  { %vm3650_vm10 = vmor %vm3648_vm9, %vm3649_vm8 }
0x15cf   :  { %v3645_v59 = vsub.f32 1.0, %v3644_v30  ;;  %v3971_v30 = vld [vmem:[%s7156_s12 + $0x28] sm:$0xff] }
0x15d1   :  { %v3646_v55 = vmul.f32 %v5315_v52, %v3645_v59  ;;  %v3970_v59 = vld [vmem:[%s7156_s12 + $0x20] sm:$0xff] }
0x15d3   :  { %v3647_v51 = vadd.f32 %v5315_v52, %v3646_v55  ;;  %v6788_v55 = vld [vmem:[#allocation2] sm:$0xff] }
0x15d5   :  { %v3651_v26 = vsel %vm3650_vm10, %v5315_v52, %v3647_v51  ;;  %v6800_v51 = vld [vmem:[#allocation2 + $0x18] sm:$0xff] }
0x15d6   :  { %v3656_v18 = vsel %vm3653_vm11, %v3655_v56, %v3651_v26 }
0x15d7   :  { %v3669_v22 = vsub.f32 1.0, %v3656_v18  ;;  %v3675_v44 = vmul.f32 %v3656_v18, %v6733_v50 }
0x1622   :  { %v3568_v19 = vpop.f32.mrf.mxu0 }
0x1623   :  { %v3569_v17 = vadd.f32 %v6599_v63, %v3568_v19  ;;  %v6792_v19 = vld [vmem:[#allocation2 + $0x8] sm:$0xff] }
0x1625   :  { %3592 = vrot.lane.b32.xlu0 %v3569_v17, %s5679_s11  ;;  %v3571_v63 = vadd.f32 %v3569_v17, %v2808_v20  ;;  %v6796_v17 = vld [vmem:[#allocation2 + $0x10] sm:$0xff] }
0x1627   :  { %v4936_v9 = vmul.f32 -1.442695, %v3571_v63 }
0x1629   :  { %5316 = vpow2.f32 %v4936_v9 }
0x162b   :  { %v3660_v35 = vpop.permute.xlu0 %3659 }
0x162c   :  { %v3662_v11 = vmul.f32 %v3660_v35, %v3656_v18  ;;  %v6816_v18 = vld [vmem:[#allocation2 + $0x20] sm:$0xff] }
0x162e   :  { %3664 = vrot.lane.b32.xlu2 %v3662_v11, %s5680_s7 }
0x162f   :  { %v5317_v45 = vpop.eup %5316 }
0x1630   :  { %v3575_v54 = vadd.f32 1.0, %v5317_v45 }
0x1632   :  { %5318 = vrcp.f32 %v3575_v54  ;;  %v3587_v40 = vand.u32 2147483648, %v3575_v54  ;;  %vm3581_vm5 = vweird.f32 %v3575_v54  ;;  %v3585_v12 = vand.u32 2147483647, %v3575_v54 }
0x1634   :  { %v3588_v7 = vor.u32 1.1754944e-38, %v3587_v40  ;;  %vm3586_vm13 = vcmp.eq.f32.partialorder %v3585_v12, 8.507059e+37  ;;  %v2794_v12 = vpop.f32.mrf.mxu2 }
0x1638   :  { %v5319_v15 = vpop.eup %5318 }
0x1639   :  { %v3577_v29 = vmul.f32 %v5319_v15, %v3575_v54  ;;  %vm3582_vm2 = vweird.f32 %v5319_v15 }
0x163a   :  { %vm3583_vm12 = vmor %vm3581_vm5, %vm3582_vm2 }
0x163b   :  { %v3578_v28 = vsub.f32 1.0, %v3577_v29 }
0x163d   :  { %v3579_v38 = vmul.f32 %v5319_v15, %v3578_v28 }
0x163f   :  { %v3580_v10 = vadd.f32 %v5319_v15, %v3579_v38 }
0x1641   :  { %v3584_v47 = vsel %vm3583_vm12, %v5319_v15, %v3580_v10 }
0x1642   :  { %v3589_v34 = vsel %vm3586_vm13, %v3588_v7, %v3584_v47  ;;  %v6829_v47 = vld [vmem:[#allocation12] ss:$0 sm:$0xff] }
0x1643   :  { %v3602_v27 = vsub.f32 1.0, %v3589_v34  ;;  %v3608_v50 = vmul.f32 %v3589_v34, %v6739_v42  ;;  %v2809_v7 = vadd.f32 %v6829_v47, %v2794_v12 }
0x1688   :  { %v3665_v58 = vpop.permute.xlu2 %3664 }
0x1689   :  { %v3667_v39 = vadd.f32 %v3665_v58, %v2857_v49 }
0x168b   :  { %5320 = vtanh.f32 %v3667_v39 }
0x1691   :  { %v5321_v4 = vpop.eup %5320 }
0x1692   :  { %3671 = vrot.lane.b32.xlu1 %v5321_v4, %s5681_s16  ;;  %v6825_v4 = vld [vmem:[#allocation13] ss:$0 sm:$0xff] }
0x1697   :  { %v3593_v24 = vpop.permute.xlu0 %3592 }
0x1698   :  { %v3595_v8 = vmul.f32 %v3593_v24, %v3589_v34 }
0x169a   :  { %3597 = vrot.lane.b32.xlu1 %v3595_v8, %s5680_s7 }
0x1704   :  { %v3672_v5 = vpop.permute.xlu1 %3671 }
0x1705   :  { %v3674_v25 = vmul.f32 %v3672_v5, %v3669_v22 }
0x1707   :  { %v6758_v23 = vadd.f32 %v3675_v44, %v3674_v25 }
0x1709   :  { %3678 = vrot.lane.b32.xlu2 %v6758_v23, %s5681_s16 }
0x170c   :  { %v3598_v48 = vpop.permute.xlu1 %3597 }
0x170d   :  { %v3600_v57 = vadd.f32 %v3598_v48, %v2808_v20 }
0x170f   :  { %5322 = vtanh.f32 %v3600_v57 }
0x1715   :  { %v5323_v53 = vpop.eup %5322 }
0x1716   :  { %3604 = vrot.lane.b32.xlu0 %v5323_v53, %s5681_s16 }
0x1763   :  { %v3679_v36 = vpop.permute.xlu2 %3678 }
0x1764   :  { %3682 = vst.msk [vmem:[#allocation3 + $0x10] sm:$0xff] %vm494_vm3, %v3679_v36  ;;  %4941 = vmatmul.msk.f32.vlgmr.msrb.gmra.mxu1 %vm494_vm3, %v3679_v36 }
0x1788   :  { %v3605_v0 = vpop.permute.xlu0 %3604 }
0x1789   :  { %v3607_v2 = vmul.f32 %v3605_v0, %v3602_v27 }
0x178b   :  { %v6766_v49 = vadd.f32 %v3608_v50, %v3607_v2 }
0x178d   :  { %3611 = vrot.lane.b32.xlu2 %v6766_v49, %s5681_s16 }
0x17e1   :  { %v3769_v16 = vpop.f32.mrf.mxu1 }
0x17e2   :  { %v3770_v42 = vadd.f32 %v6776_v3, %v3769_v16 }
0x17e4   :  { %3793 = vrot.lane.b32.xlu1 %v3770_v42, %s5679_s11  ;;  %v3772_v26 = vadd.f32 %v3770_v42, %v2856_v37 }
0x17e6   :  { %v4942_v56 = vmul.f32 -1.442695, %v3772_v26 }
0x17e7   :  { %v3612_v52 = vpop.permute.xlu2 %3611 }
0x17e8   :  { %3615 = vst.msk [vmem:[#allocation2 + $0x28] sm:$0xff] %vm494_vm3, %v3612_v52  ;;  %4939 = vmatmul.msk.f32.vlgmr.msra.gmra.mxu0 %vm494_vm3, %v3612_v52  ;;  %5324 = vpow2.f32 %v4942_v56 }
0x17e9   :  { %4184 = vmatpush.msra.mxu0 %v3971_v30 }
0x17eb   :  { %4185 = vmatpush.msra.mxu0 %v3970_v59 }
0x17ee   :  { %v5325_v35 = vpop.eup %5324 }
0x17ef   :  { %v3776_v11 = vadd.f32 1.0, %v5325_v35  ;;  %v6820_v1 = vld [vmem:[#allocation2 + $0x28] sm:$0xff] }
0x17f0   :  { %4947 = vmatmul.msk.f32.vlgmr.msrb.gmra.mxu0 %vm494_vm3, %v6788_v55 }
0x17f1   :  { %5326 = vrcp.f32 %v3776_v11  ;;  %v3788_v54 = vand.u32 2147483648, %v3776_v11  ;;  %vm3782_vm15 = vweird.f32 %v3776_v11  ;;  %v3786_v15 = vand.u32 2147483647, %v3776_v11 }
0x17f3   :  { %v3789_v58 = vor.u32 1.1754944e-38, %v3788_v54  ;;  %vm3787_vm4 = vcmp.eq.f32.partialorder %v3786_v15, 8.507059e+37  ;;  %v3969_v54 = vld [vmem:[%s7156_s12 + $0x18] sm:$0xff]  ;;  %v3968_v15 = vld [vmem:[%s7156_s12 + $0x10] sm:$0xff] }
0x17f4   :  { %4090 = vmatpush.msra.mxu2 %v3969_v54 }
0x17f6   :  { %4091 = vmatpush.msra.mxu2 %v3968_v15 }
0x17f7   :  { %v5327_v21 = vpop.eup %5326 }
0x17f8   :  { %4948 = vmatmul.msk.f32.gmra.mxu0 %vm494_vm3, %v6792_v19  ;;  %v3778_v20 = vmul.f32 %v5327_v21, %v3776_v11  ;;  %vm3783_vm14 = vweird.f32 %v5327_v21 }
0x17f9   :  { %vm3784_vm0 = vmor %vm3782_vm15, %vm3783_vm14 }
0x17fa   :  { %v3779_v63 = vsub.f32 1.0, %v3778_v20 }
0x17fc   :  { %v3780_v9 = vmul.f32 %v5327_v21, %v3779_v63 }
0x17fe   :  { %v3781_v45 = vadd.f32 %v5327_v21, %v3780_v9 }
0x1800   :  { %4949 = vmatmul.msk.f32.gmra.mxu0 %vm494_vm3, %v6796_v17  ;;  %v3785_v29 = vsel %vm3784_vm0, %v5327_v21, %v3781_v45 }
0x1801   :  { %v3790_v28 = vsel %vm3787_vm4, %v3789_v58, %v3785_v29 }
0x1802   :  { %v3803_v52 = vsub.f32 1.0, %v3790_v28  ;;  %v3809_v59 = vmul.f32 %v3790_v28, %v6758_v23 }
0x1808   :  { %4950 = vmatmul.msk.f32.gmra.mxu0 %vm494_vm3, %v6800_v51 }
0x1810   :  { %4967 = vmatmul.msk.f32.vlgmr.msra.gmra.mxu0 %vm494_vm3, %v6788_v55 }
0x1818   :  { %4968 = vmatmul.msk.f32.gmra.mxu0 %vm494_vm3, %v6792_v19 }
0x1820   :  { %4969 = vmatmul.msk.f32.gmra.mxu0 %vm494_vm3, %v6796_v17 }
0x1828   :  { %4970 = vmatmul.msk.f32.gmra.mxu0 %vm494_vm3, %v6800_v51 }
0x1830   :  { %4971 = vmatmul.msk.f32.gmra.mxu0 %vm494_vm3, %v6816_v18 }
0x1838   :  { %4972 = vmatmul.msk.f32.gmra.mxu0 %vm494_vm3, %v6820_v1 }
0x1856   :  { %v3794_v39 = vpop.permute.xlu1 %3793 }
0x1857   :  { %v3796_v38 = vmul.f32 %v3794_v39, %v3790_v28 }
0x1859   :  { %3798 = vrot.lane.b32.xlu0 %v3796_v38, %s5680_s7 }
0x1865   :  { %v3702_v10 = vpop.f32.mrf.mxu0 }
0x1866   :  { %v3703_v40 = vadd.f32 %v6825_v4, %v3702_v10 }
0x1868   :  { %3726 = vrot.lane.b32.xlu1 %v3703_v40, %s5679_s11  ;;  %v3705_v34 = vadd.f32 %v3703_v40, %v2809_v7 }
0x186a   :  { %v4940_v24 = vmul.f32 -1.442695, %v3705_v34 }
0x186c   :  { %5328 = vpow2.f32 %v4940_v24 }
0x1872   :  { %v5329_v8 = vpop.eup %5328 }
0x1873   :  { %v3709_v22 = vadd.f32 1.0, %v5329_v8 }
0x1875   :  { %5330 = vrcp.f32 %v3709_v22  ;;  %v3721_v0 = vand.u32 2147483648, %v3709_v22  ;;  %vm3715_vm7 = vweird.f32 %v3709_v22  ;;  %v3719_v50 = vand.u32 2147483647, %v3709_v22 }
0x1877   :  { %v3722_v46 = vor.u32 1.1754944e-38, %v3721_v0  ;;  %vm3720_vm9 = vcmp.eq.f32.partialorder %v3719_v50, 8.507059e+37 }
0x187b   :  { %v5331_v5 = vpop.eup %5330 }
0x187c   :  { %v3711_v44 = vmul.f32 %v5331_v5, %v3709_v22  ;;  %vm3716_vm6 = vweird.f32 %v5331_v5 }
0x187d   :  { %vm3717_vm8 = vmor %vm3715_vm7, %vm3716_vm6 }
0x187e   :  { %v3712_v48 = vsub.f32 1.0, %v3711_v44 }
0x1880   :  { %v3713_v53 = vmul.f32 %v5331_v5, %v3712_v48 }
0x1882   :  { %v3714_v36 = vadd.f32 %v5331_v5, %v3713_v53 }
0x1884   :  { %v3718_v2 = vsel %vm3717_vm8, %v5331_v5, %v3714_v36 }
0x1885   :  { %v3723_v16 = vsel %vm3720_vm9, %v3722_v46, %v3718_v2 }
0x1886   :  { %v3736_v20 = vsub.f32 1.0, %v3723_v16  ;;  %v3742_v23 = vmul.f32 %v3723_v16, %v6766_v49 }
0x18cb   :  { %v3799_v25 = vpop.permute.xlu0 %3798 }
0x18cc   :  { %v3801_v57 = vadd.f32 %v3799_v25, %v2856_v37 }
0x18ce   :  { %5332 = vtanh.f32 %v3801_v57  ;;  %v2797_v57 = vpop.f32.mrf.mxu2 }
0x18d4   :  { %v5333_v27 = vpop.eup %5332 }
0x18d5   :  { %3805 = vrot.lane.b32.xlu2 %v5333_v27, %s5681_s16  ;;  %v2810_v27 = vadd.f32 %v6829_v47, %v2797_v57  ;;  %v4501_v57 = vld [vmem:[%s7162_s18 + $0x8] sm:$0xff] }
0x18da   :  { %v3727_v33 = vpop.permute.xlu1 %3726 }
0x18db   :  { %v3729_v42 = vmul.f32 %v3727_v33, %v3723_v16 }
0x18dd   :  { %3731 = vrot.lane.b32.xlu2 %v3729_v42, %s5680_s7 }
0x192f   :  { %v3806_v30 = vpop.permute.xlu2 %3805 }
0x1930   :  { %v3808_v37 = vmul.f32 %v3806_v30, %v3803_v52 }
0x1932   :  { %v6835_v26 = vadd.f32 %v3809_v59, %v3808_v37 }
0x1934   :  { %3812 = vrot.lane.b32.xlu0 %v6835_v26, %s5681_s16 }
0x1937   :  { %v3732_v56 = vpop.permute.xlu2 %3731 }
0x1938   :  { %v3734_v35 = vadd.f32 %v3732_v56, %v2809_v7 }
0x193a   :  { %5334 = vtanh.f32 %v3734_v35 }
0x1940   :  { %v5335_v11 = vpop.eup %5334 }
0x1941   :  { %3738 = vrot.lane.b32.xlu1 %v5335_v11, %s5681_s16 }
0x19a6   :  { %v3813_v21 = vpop.permute.xlu0 %3812 }
0x19a7   :  { %3816 = vst.msk [vmem:[#allocation3 + $0x8] sm:$0xff] %vm494_vm3, %v3813_v21  ;;  %4945 = vmatmul.msk.f32.vlgmr.msra.gmra.mxu3 %vm494_vm3, %v3813_v21 }
0x19b3   :  { %v3739_v63 = vpop.permute.xlu1 %3738 }
0x19b4   :  { %v3741_v9 = vmul.f32 %v3739_v63, %v3736_v20 }
0x19b6   :  { %v6843_v45 = vadd.f32 %v3742_v23, %v3741_v9 }
0x19b8   :  { %3745 = vrot.lane.b32.xlu0 %v6843_v45, %s5681_s16 }
0x1a2a   :  { %v3903_v29 = vpop.f32.mrf.mxu3  ;;  %v3746_v58 = vpop.permute.xlu0 %3745 }
0x1a2b   :  { %v3904_v49 = vadd.f32 %v6776_v3, %v3903_v29  ;;  %3749 = vst.msk [vmem:[#allocation2 + $0x30] sm:$0xff] %vm494_vm3, %v3746_v58  ;;  %4943 = vmatmul.msk.f32.vlgmr.msrb.gmra.mxu2 %vm494_vm3, %v3746_v58  ;;  %v2855_v3 = vadd.f32 %v6810_v62, %v6581_v31 }
0x1a2d   :  { %3927 = vrot.lane.b32.xlu2 %v3904_v49, %s5679_s11  ;;  %v3906_v39 = vadd.f32 %v3904_v49, %v2855_v3 }
0x1a2f   :  { %v4946_v38 = vmul.f32 -1.442695, %v3906_v39  ;;  %v3973_v39 = vld [vmem:[%s7157_s13 + $0x8] sm:$0xff] }
0x1a30   :  { %4051 = vmatpush.msra.mxu1 %v3973_v39 }
0x1a31   :  { %5336 = vpow2.f32 %v4946_v38  ;;  %v3975_v38 = vld [vmem:[%s7157_s13 + $0x18] sm:$0xff] }
0x1a32   :  { %v6857_v28 = vld [vmem:[#allocation2 + $0x30] sm:$0xff]  ;;  %4131 = vmatpush.msrb.mxu3 %v3975_v38 }
0x1a33   :  { %4955 = vmatmul.msk.f32.vlgmr.msra.gmra.mxu2 %vm494_vm3, %v6788_v55  ;;  %4973 = vmatmul.msk.f32.gmra.mxu0 %vm494_vm3, %v6857_v28 }
0x1a37   :  { %v5337_v10 = vpop.eup %5336 }
0x1a38   :  { %v3910_v40 = vadd.f32 1.0, %v5337_v10  ;;  %v3974_v10 = vld [vmem:[%s7157_s13 + $0x10] sm:$0xff] }
0x1a39   :  { %4132 = vmatpush.msrb.mxu3 %v3974_v10 }
0x1a3a   :  { %5338 = vrcp.f32 %v3910_v40  ;;  %v3922_v22 = vand.u32 2147483648, %v3910_v40  ;;  %vm3916_vm11 = vweird.f32 %v3910_v40  ;;  %v3920_v5 = vand.u32 2147483647, %v3910_v40 }
0x1a3b   :  { %4956 = vmatmul.msk.f32.gmra.mxu2 %vm494_vm3, %v6792_v19 }
0x1a3c   :  { %v3923_v62 = vor.u32 1.1754944e-38, %v3922_v22  ;;  %vm3921_vm5 = vcmp.eq.f32.partialorder %v3920_v5, 8.507059e+37  ;;  %v3977_v22 = vld [vmem:[%s7157_s13 + $0x28] sm:$0xff]  ;;  %v3976_v5 = vld [vmem:[%s7157_s13 + $0x20] sm:$0xff] }
0x1a40   :  { %v5339_v12 = vpop.eup %5338 }
0x1a41   :  { %v3912_v7 = vmul.f32 %v5339_v12, %v3910_v40  ;;  %vm3917_vm10 = vweird.f32 %v5339_v12 }
0x1a42   :  { %vm3918_vm2 = vmor %vm3916_vm11, %vm3917_vm10 }
0x1a43   :  { %4957 = vmatmul.msk.f32.gmra.mxu2 %vm494_vm3, %v6796_v17  ;;  %v3913_v34 = vsub.f32 1.0, %v3912_v7 }
0x1a45   :  { %v3914_v24 = vmul.f32 %v5339_v12, %v3913_v34 }
0x1a47   :  { %v3915_v8 = vadd.f32 %v5339_v12, %v3914_v24 }
0x1a49   :  { %v3919_v31 = vsel %vm3918_vm2, %v5339_v12, %v3915_v8 }
0x1a4a   :  { %v3924_v44 = vsel %vm3921_vm5, %v3923_v62, %v3919_v31  ;;  %v6917_v62 = vld [vmem:[#allocation3 + $0x10] sm:$0xff] }
0x1a4b   :  { %4958 = vmatmul.msk.f32.gmra.mxu2 %vm494_vm3, %v6800_v51  ;;  %v3937_v23 = vsub.f32 1.0, %v3924_v44  ;;  %v3943_v54 = vmul.f32 %v3924_v44, %v6835_v26  ;;  %v3972_v26 = vld [vmem:[%s7157_s13] sm:$0xff] }
0x1a4c   :  { %4052 = vmatpush.msra.mxu1 %v3972_v26 }
0x1a4e   :  { %4231 = vmatpush.msrb.mxu1 %v3977_v22  ;;  %v4551_v22 = vld [vmem:[%s7163_s19] sm:$0xff] }
0x1a50   :  { %4232 = vmatpush.msrb.mxu1 %v3976_v5 }
0x1a53   :  { %4959 = vmatmul.msk.f32.gmra.mxu2 %vm494_vm3, %v6816_v18 }
0x1a5b   :  { %4960 = vmatmul.msk.f32.gmra.mxu2 %vm494_vm3, %v6820_v1 }
0x1a87   :  { %v3928_v25 = vpop.permute.xlu2 %3927 }
0x1a88   :  { %v3930_v48 = vmul.f32 %v3928_v25, %v3924_v44  ;;  %v6923_v44 = vld [vmem:[#allocation3 + $0x18] sm:$0xff]  ;;  %v6929_v25 = vld [vmem:[#allocation3 + $0x20] sm:$0xff] }
0x1a8a   :  { %3932 = vrot.lane.b32.xlu1 %v3930_v48, %s5680_s7  ;;  %v6935_v48 = vld [vmem:[#allocation3 + $0x28] sm:$0xff] }
0x1aae   :  { %v3836_v53 = vpop.f32.mrf.mxu2 }
0x1aaf   :  { %v3837_v36 = vadd.f32 %v6825_v4, %v3836_v53  ;;  %v4500_v53 = vld [vmem:[%s7162_s18] sm:$0xff] }
0x1ab1   :  { %3860 = vrot.lane.b32.xlu2 %v3837_v36, %s5679_s11  ;;  %v3839_v0 = vadd.f32 %v3837_v36, %v2810_v27  ;;  %v6955_v36 = vld [vmem:[#allocation3 + $0x30] sm:$0xff] }
0x1ab3   :  { %v4944_v50 = vmul.f32 -1.442695, %v3839_v0 }
0x1ab5   :  { %5340 = vpow2.f32 %v4944_v50  ;;  %v6968_v50 = vpop.f32.mrf.mxu0 }
0x1abb   :  { %v5341_v2 = vpop.eup %5340 }
0x1abc   :  { %v3843_v46 = vadd.f32 1.0, %v5341_v2 }
0x1abe   :  { %5342 = vrcp.f32 %v3843_v46  ;;  %v3855_v56 = vand.u32 2147483648, %v3843_v46  ;;  %vm3849_vm13 = vweird.f32 %v3843_v46  ;;  %v3853_v47 = vand.u32 2147483647, %v3843_v46 }
0x1ac0   :  { %v3856_v11 = vor.u32 1.1754944e-38, %v3855_v56  ;;  %vm3854_vm15 = vcmp.eq.f32.partialorder %v3853_v47, 8.507059e+37 }
0x1ac4   :  { %v5343_v33 = vpop.eup %5342 }
0x1ac5   :  { %v3845_v16 = vmul.f32 %v5343_v33, %v3843_v46  ;;  %vm3850_vm12 = vweird.f32 %v5343_v33  ;;  %v6973_v46 = vpop.f32.mrf.mxu0 }
0x1ac6   :  { %vm3851_vm14 = vmor %vm3849_vm13, %vm3850_vm12 }
0x1ac7   :  { %v3846_v52 = vsub.f32 1.0, %v3845_v16  ;;  %v3981_v16 = vld [vmem:[#allocation16 + $0x18] sm:$0xff] }
0x1ac8   :  { %4355 = vmatpush.msra.mxu3 %v3981_v16 }
0x1ac9   :  { %v3847_v59 = vmul.f32 %v5343_v33, %v3846_v52  ;;  %v3980_v52 = vld [vmem:[#allocation16 + $0x10] sm:$0xff] }
0x1aca   :  { %4356 = vmatpush.msra.mxu3 %v3980_v52 }
0x1acb   :  { %v3848_v37 = vadd.f32 %v5343_v33, %v3847_v59 }
0x1acd   :  { %v3852_v35 = vsel %vm3851_vm14, %v5343_v33, %v3848_v37  ;;  %v6979_v33 = vpop.f32.mrf.mxu0  ;;  %v6996_v37 = vld [vmem:[#allocation15] ss:$0 sm:$0xff] }
0x1ace   :  { %v3857_v20 = vsel %vm3854_vm15, %v3856_v11, %v3852_v35 }
0x1acf   :  { %v3870_v40 = vsub.f32 1.0, %v3857_v20  ;;  %v3876_v7 = vmul.f32 %v3857_v20, %v6843_v45  ;;  %v6911_v45 = vld [vmem:[#allocation3 + $0x8] sm:$0xff] }
0x1afc   :  { %v3933_v42 = vpop.permute.xlu1 %3932 }
0x1afd   :  { %v3935_v30 = vadd.f32 %v3933_v42, %v2855_v3 }
0x1aff   :  { %5344 = vtanh.f32 %v3935_v30 }
0x1b05   :  { %v5345_v4 = vpop.eup %5344 }
0x1b06   :  { %3939 = vrot.lane.b32.xlu0 %v5345_v4, %s5681_s16  ;;  %v4458_v4 = vld [vmem:[%s7161_s17 + $0x8] sm:$0xff] }
0x1b0b   :  { %v3861_v21 = vpop.permute.xlu2 %3860 }
0x1b0c   :  { %v3863_v63 = vmul.f32 %v3861_v21, %v3857_v20  ;;  %v4093_v20 = vpop.f32.mrf.mxu2 }
0x1b0e   :  { %3865 = vrot.lane.b32.xlu0 %v3863_v63, %s5680_s7  ;;  %v3983_v63 = vld [vmem:[#allocation16 + $0x28] sm:$0xff]  ;;  %s7193_s7 = sld [smem:[#allocation42_spill]] }
0x1b14   :  { %s4718_s0 = sshll.u32 %s7193_s7, 4  ;;  %s4719_s0 = int_to_ptr.hbm [resolvable:$true] %s4718_s0 }
0x1b15   :  { %4724 = dma.vmem_to_hbm [thread:$0]  %s4717_s30, 1024, %s4719_s0, [#allocation23], %s5662_s8, %s5662_s8, %s5663_s4  }
0x1b16   :  { %s7194_s4 = sld [smem:[#allocation41_spill]] }
0x1b78   :  { %v3940_v9 = vpop.permute.xlu0 %3939 }
0x1b79   :  { %v3942_v15 = vmul.f32 %v3940_v9, %v3937_v23 }
0x1b7b   :  { %v3944_v29 = vadd.f32 %v3943_v54, %v3942_v15 }
0x1b7d   :  { %3946 = vrot.lane.b32.xlu1 %v3944_v29, %s5681_s16 }
0x1b80   :  { %v3866_v58 = vpop.permute.xlu0 %3865 }
0x1b81   :  { %v3868_v49 = vadd.f32 %v3866_v58, %v2810_v27  ;;  %v6959_v27 = vld [vmem:[#allocation3 + $0x38] sm:$0xff] }
0x1b82   :  { %v3982_v58 = vld [vmem:[#allocation16 + $0x20] sm:$0xff] }
0x1b83   :  { %5346 = vtanh.f32 %v3868_v49 }
0x1b89   :  { %v5347_v3 = vpop.eup %5346 }
0x1b8a   :  { %3872 = vrot.lane.b32.xlu2 %v5347_v3, %s5681_s16  ;;  %v4096_v3 = vpop.f32.mrf.mxu2 }
0x1be4   :  { %v3873_v12 = vpop.permute.xlu2 %3872 }
0x1be5   :  { %v3875_v34 = vmul.f32 %v3873_v12, %v3870_v40 }
0x1be7   :  { %v3877_v24 = vadd.f32 %v3876_v7, %v3875_v34  ;;  %v4552_v34 = vld [vmem:[%s7163_s19 + $0x8] sm:$0xff] }
0x1be9   :  { %3879 = vrot.lane.b32.xlu1 %v3877_v24, %s5681_s16 }
0x1bef   :  { %v3947_v8 = vpop.permute.xlu1 %3946 }
0x1bf0   :  { %3949 = vst.msk [vmem:[#allocation3] sm:$0xff] %vm494_vm3, %v3947_v8 }
0x1bf7   :  { %v6905_v31 = vld [vmem:[#allocation3] sm:$0xff] }
0x1bf8   :  { %4951 = vmatmul.msk.f32.vlgmr.msra.gmra.mxu1 %vm494_vm3, %v6905_v31  ;;  %4961 = vmatmul.msk.f32.vlgmr.msrb.gmra.mxu3 %vm494_vm3, %v6905_v31 }
0x1bf9   :  { %4516 = vmatpush.msra.mxu1 %v4501_v57  ;;  %4567 = vmatpush.msrb.mxu3 %v4552_v34 }
0x1bfb   :  { %4517 = vmatpush.msra.mxu1 %v4500_v53  ;;  %v4099_v53 = vpop.f32.mrf.mxu2  ;;  %4568 = vmatpush.msrb.mxu3 %v4551_v22 }
0x1c00   :  { %4952 = vmatmul.msk.f32.gmra.mxu1 %vm494_vm3, %v6911_v45  ;;  %4962 = vmatmul.msk.f32.gmra.mxu3 %vm494_vm3, %v6911_v45 }
0x1c08   :  { %4953 = vmatmul.msk.f32.gmra.mxu1 %vm494_vm3, %v6917_v62  ;;  %4963 = vmatmul.msk.f32.gmra.mxu3 %vm494_vm3, %v6917_v62 }
0x1c10   :  { %4954 = vmatmul.msk.f32.gmra.mxu1 %vm494_vm3, %v6923_v44  ;;  %4964 = vmatmul.msk.f32.gmra.mxu3 %vm494_vm3, %v6923_v44 }
0x1c18   :  { %4965 = vmatmul.msk.f32.gmra.mxu3 %vm494_vm3, %v6929_v25  ;;  %4975 = vmatmul.msk.f32.vlgmr.msrb.gmra.mxu1 %vm494_vm3, %v6905_v31 }
0x1c20   :  { %4966 = vmatmul.msk.f32.gmra.mxu3 %vm494_vm3, %v6935_v48  ;;  %4976 = vmatmul.msk.f32.gmra.mxu1 %vm494_vm3, %v6911_v45 }
0x1c28   :  { %4977 = vmatmul.msk.f32.gmra.mxu1 %vm494_vm3, %v6917_v62 }
0x1c30   :  { %4978 = vmatmul.msk.f32.gmra.mxu1 %vm494_vm3, %v6923_v44 }
0x1c38   :  { %4979 = vmatmul.msk.f32.gmra.mxu1 %vm494_vm3, %v6929_v25 }
0x1c40   :  { %4980 = vmatmul.msk.f32.gmra.mxu1 %vm494_vm3, %v6935_v48 }
0x1c48   :  { %4981 = vmatmul.msk.f32.gmra.mxu1 %vm494_vm3, %v6955_v36 }
0x1c50   :  { %4982 = vmatmul.msk.f32.gmra.mxu1 %vm494_vm3, %v6959_v27 }
0x1c58   :  { %5009 = vmatmul.msk.f32.vlgmr.msra.gmra.mxu1 %vm494_vm3, %v6788_v55 }
0x1c5b   :  { %v3880_v0 = vpop.permute.xlu1 %3879 }
0x1c5c   :  { %3883 = vst.msk [vmem:[#allocation2 + $0x38] sm:$0xff] %vm494_vm3, %v3880_v0 }
0x1c60   :  { %5010 = vmatmul.msk.f32.gmra.mxu1 %vm494_vm3, %v6792_v19  ;;  %v3979_v19 = vld [vmem:[#allocation16 + $0x8] sm:$0xff] }
0x1c61   :  { %4320 = vmatpush.msrb.mxu0 %v3979_v19  ;;  %5034 = vmatpush.msrb.mxu2 %v3979_v19 }
0x1c63   :  { %v3957_v2 = vld [vmem:[#allocation2 + $0x38] sm:$0xff] }
0x1c64   :  { %4974 = vmatmul.msk.f32.gmra.mxu0 %vm494_vm3, %v3957_v2 }
0x1c68   :  { %5011 = vmatmul.msk.f32.gmra.mxu1 %vm494_vm3, %v6796_v17  ;;  %v3978_v17 = vld [vmem:[#allocation16] sm:$0xff] }
0x1c69   :  { %4321 = vmatpush.msrb.mxu0 %v3978_v17  ;;  %5035 = vmatpush.msrb.mxu2 %v3978_v17 }
0x1c6b   :  { %4473 = vmatpush.msra.mxu0 %v4458_v4  ;;  %4402 = vmatpush.msra.mxu2 %v3983_v63 }
0x1c6d   :  { %4403 = vmatpush.msra.mxu2 %v3982_v58 }
0x1c70   :  { %5012 = vmatmul.msk.f32.gmra.mxu1 %vm494_vm3, %v6800_v51  ;;  %v6987_v51 = vpop.f32.mrf.mxu0 }
0x1c75   :  { %v6977_v55 = vpop.f32.mrf.mxu1 }
0x1c76   :  { %v4066_v17 = vadd.f32 %v6977_v55, %v6968_v50 }
0x1c78   :  { %5013 = vmatmul.msk.f32.gmra.mxu1 %vm494_vm3, %v6816_v18  ;;  %v4187_v18 = vpop.f32.mrf.mxu0 }
0x1c7b   :  { %v4134_v11 = vpop.f32.mrf.mxu3 }
0x1c7c   :  { %v4152_v38 = vadd.f32 %v4134_v11, %v4093_v20 }
0x1c7d   :  { %v6983_v42 = vpop.f32.mrf.mxu1 }
0x1c7e   :  { %v4067_v50 = vadd.f32 %v6983_v42, %v6973_v46 }
0x1c80   :  { %5014 = vmatmul.msk.f32.gmra.mxu1 %vm494_vm3, %v6820_v1  ;;  %v4190_v1 = vpop.f32.mrf.mxu0 }
0x1c83   :  { %v4137_v49 = vpop.f32.mrf.mxu3 }
0x1c84   :  { %v4153_v5 = vadd.f32 %v4137_v49, %v4096_v3 }
0x1c85   :  { %v6989_v30 = vpop.f32.mrf.mxu1 }
0x1c88   :  { %5015 = vmatmul.msk.f32.gmra.mxu1 %vm494_vm3, %v6857_v28  ;;  %v4457_v28 = vld [vmem:[%s7161_s17] sm:$0xff]  ;;  %v4193_v54 = vpop.f32.mrf.mxu0 }
0x1c89   :  { %4474 = vmatpush.msra.mxu0 %v4457_v28 }
0x1c8b   :  { %v4140_v24 = vpop.f32.mrf.mxu3 }
0x1c8d   :  { %v6993_v59 = vpop.f32.mrf.mxu1 }
0x1c90   :  { %5016 = vmatmul.msk.f32.gmra.mxu1 %vm494_vm3, %v3957_v2  ;;  %v4196_v40 = vpop.f32.mrf.mxu0  ;;  %v4154_v2 = vadd.f32 %v4140_v24, %v4099_v53 }
0x1c92   :  { %v4160_v4 = vadd.f32 %v4154_v2, %v4066_v17 }
0x1c95   :  { %v4234_v56 = vpop.f32.mrf.mxu1 }
0x1c96   :  { %v4258_v47 = vadd.f32 %v4234_v56, %v4187_v18  ;;  %v4143_v56 = vpop.f32.mrf.mxu3 }
0x1c98   :  { %v4278_v35 = vadd.f32 %v6996_v37, %v4258_v47  ;;  %v4199_v16 = vpop.f32.mrf.mxu0 }
0x1c9a   :  { %v4286_v21 = vmax.f32 %v4278_v35, 0.0  ;;  %v4102_v35 = vpop.f32.mrf.mxu2 }
0x1c9b   :  { %v4155_v11 = vadd.f32 %v4143_v56, %v4102_v35 }
0x1c9c   :  { %4983 = vmatmul.msk.f32.vlgmr.msrb.gmra.mxu0 %vm494_vm3, %v4286_v21  ;;  %4987 = vmatmul.msk.f32.vlgmr.msra.gmra.mxu3 %vm494_vm3, %v4286_v21 }
0x1c9d   :  { %v4237_v23 = vpop.f32.mrf.mxu1 }
0x1c9e   :  { %v4259_v9 = vadd.f32 %v4237_v23, %v4190_v1  ;;  %v4161_v23 = vadd.f32 %v4155_v11, %v4067_v50 }
0x1ca0   :  { %v4279_v15 = vadd.f32 %v6996_v37, %v4259_v9  ;;  %v4202_v20 = vpop.f32.mrf.mxu0 }
0x1ca2   :  { %v4287_v29 = vmax.f32 %v4279_v15, 0.0  ;;  %v4105_v46 = vpop.f32.mrf.mxu2 }
0x1ca4   :  { %4984 = vmatmul.msk.f32.gmra.mxu0 %vm494_vm3, %v4287_v29  ;;  %4988 = vmatmul.msk.f32.gmra.mxu3 %vm494_vm3, %v4287_v29 }
0x1ca5   :  { %v4240_v39 = vpop.f32.mrf.mxu1 }
0x1ca6   :  { %v4260_v26 = vadd.f32 %v4240_v39, %v4193_v54 }
0x1ca8   :  { %v4268_v10 = vadd.f32 %v4260_v26, %v4152_v38  ;;  %v4205_v42 = vpop.f32.mrf.mxu0 }
0x1caa   :  { %v4280_v12 = vadd.f32 %v6996_v37, %v4268_v10  ;;  %v4108_v58 = vpop.f32.mrf.mxu2 }
0x1cac   :  { %v4288_v7 = vmax.f32 %v4280_v12, 0.0 }
0x1cad   :  { %v4243_v8 = vpop.f32.mrf.mxu1 }
0x1cae   :  { %v4261_v57 = vadd.f32 %v4243_v8, %v4196_v40  ;;  %4985 = vmatmul.msk.f32.gmra.mxu0 %vm494_vm3, %v4288_v7  ;;  %4989 = vmatmul.msk.f32.gmra.mxu3 %vm494_vm3, %v4288_v7 }
0x1cb0   :  { %v4269_v0 = vadd.f32 %v4261_v57, %v4153_v5 }
0x1cb2   :  { %v4281_v19 = vadd.f32 %v6996_v37, %v4269_v0 }
0x1cb4   :  { %v4289_v52 = vmax.f32 %v4281_v19, 0.0 }
0x1cb5   :  { %v4246_v18 = vpop.f32.mrf.mxu1 }
0x1cb6   :  { %v4262_v1 = vadd.f32 %v4246_v18, %v4199_v16  ;;  %4986 = vmatmul.msk.f32.vlgmr.msrb.gmra.mxu2 %vm494_vm3, %v4289_v52  ;;  %4990 = vmatmul.msk.f32.gmra.mxu3 %vm494_vm3, %v4289_v52 }
0x1cb7   :  { %5001 = vmatmul.msk.f32.vlgmr.msra.gmra.mxu0 %vm494_vm3, %v6470_v60 }
0x1cb8   :  { %v4270_v47 = vadd.f32 %v4262_v1, %v4160_v4 }
0x1cba   :  { %v4282_v28 = vadd.f32 %v6996_v37, %v4270_v47 }
0x1cbc   :  { %v4290_v55 = vmax.f32 %v4282_v28, 0.0 }
0x1cbd   :  { %v4249_v63 = vpop.f32.mrf.mxu1 }
0x1cbe   :  { %v4263_v9 = vadd.f32 %v4249_v63, %v4202_v20  ;;  %4991 = vmatmul.msk.f32.gmra.mxu3 %vm494_vm3, %v4290_v55  ;;  %4993 = vmatmul.msk.f32.vlgmr.msra.gmra.mxu2 %vm494_vm3, %v4286_v21 }
0x1cbf   :  { %5002 = vmatmul.msk.f32.gmra.mxu0 %vm494_vm3, %v6482_v61  ;;  %v4146_v61 = vpop.f32.mrf.mxu3 }
0x1cc0   :  { %v4271_v60 = vadd.f32 %v4263_v9, %v4161_v23  ;;  %v4156_v21 = vadd.f32 %v4146_v61, %v4105_v46 }
0x1cc2   :  { %v4283_v54 = vadd.f32 %v6996_v37, %v4271_v60 }
0x1cc4   :  { %v4291_v15 = vmax.f32 %v4283_v54, 0.0 }
0x1cc6   :  { %4992 = vmatmul.msk.f32.gmra.mxu3 %vm494_vm3, %v4291_v15  ;;  %4994 = vmatmul.msk.f32.gmra.mxu2 %vm494_vm3, %v4287_v29 }
0x1cc7   :  { %5003 = vmatmul.msk.f32.gmra.mxu0 %vm494_vm3, %v6523_v14  ;;  %v4252_v14 = vpop.f32.mrf.mxu1  ;;  %v4149_v29 = vpop.f32.mrf.mxu3 }
0x1cc8   :  { %v4157_v3 = vadd.f32 %v4149_v29, %v4108_v58 }
0x1cce   :  { %4995 = vmatmul.msk.f32.gmra.mxu2 %vm494_vm3, %v4288_v7  ;;  %5017 = vmatmul.msk.f32.vlgmr.msrb.gmra.mxu3 %vm494_vm3, %v6905_v31  ;;  %v4264_v31 = vadd.f32 %v4252_v14, %v4205_v42 }
0x1ccf   :  { %5004 = vmatmul.msk.f32.gmra.mxu0 %vm494_vm3, %v6533_v43  ;;  %v4068_v43 = vadd.f32 %v6989_v30, %v6979_v33  ;;  %v4255_v39 = vpop.f32.mrf.mxu1 }
0x1cd6   :  { %4996 = vmatmul.msk.f32.gmra.mxu2 %vm494_vm3, %v4289_v52  ;;  %5018 = vmatmul.msk.f32.gmra.mxu3 %vm494_vm3, %v6911_v45  ;;  %v4162_v45 = vadd.f32 %v4156_v21, %v4068_v43 }
0x1cd7   :  { %5005 = vmatmul.msk.f32.gmra.mxu0 %vm494_vm3, %v6507_v32 }
0x1cd8   :  { %v4272_v32 = vadd.f32 %v4264_v31, %v4162_v45  ;;  %v4519_v31 = vpop.f32.mrf.mxu1 }
0x1cde   :  { %4997 = vmatmul.msk.f32.gmra.mxu2 %vm494_vm3, %v4290_v55  ;;  %5019 = vmatmul.msk.f32.gmra.mxu3 %vm494_vm3, %v6917_v62  ;;  %v4284_v62 = vadd.f32 %v6996_v37, %v4272_v32 }
0x1cdf   :  { %5006 = vmatmul.msk.f32.gmra.mxu0 %vm494_vm3, %v6553_v41  ;;  %v4069_v41 = vadd.f32 %v6993_v59, %v6987_v51  ;;  %v5072_v59 = vld [vmem:[#allocation18] ss:$0 sm:$0xff] }
0x1ce0   :  { %v4292_v38 = vmax.f32 %v4284_v62, 0.0  ;;  %v4522_v32 = vpop.f32.mrf.mxu1 }
0x1ce1   :  { %v4208_v49 = vpop.f32.mrf.mxu0  ;;  %v4163_v30 = vadd.f32 %v4157_v3, %v4069_v41 }
0x1ce2   :  { %v4265_v33 = vadd.f32 %v4255_v39, %v4208_v49  ;;  %v7102_v39 = vld [vmem:[#allocation19] ss:$0 sm:$0xff] }
0x1ce4   :  { %v4273_v26 = vadd.f32 %v4265_v33, %v4163_v30 }
0x1ce6   :  { %4998 = vmatmul.msk.f32.gmra.mxu2 %vm494_vm3, %v4291_v15  ;;  %5020 = vmatmul.msk.f32.gmra.mxu3 %vm494_vm3, %v6923_v44  ;;  %v4285_v44 = vadd.f32 %v6996_v37, %v4273_v26 }
0x1ce7   :  { %5007 = vmatmul.msk.f32.gmra.mxu0 %vm494_vm3, %v6563_v13 }
0x1ce8   :  { %v4293_v13 = vmax.f32 %v4285_v44, 0.0  ;;  %v4525_v30 = vpop.f32.mrf.mxu1 }
0x1cee   :  { %4999 = vmatmul.msk.f32.gmra.mxu2 %vm494_vm3, %v4292_v38  ;;  %5021 = vmatmul.msk.f32.gmra.mxu3 %vm494_vm3, %v6929_v25  ;;  %v4603_v25 = vld [vmem:[%s7164_s20 + $0x8] sm:$0xff] }
0x1cef   :  { %5008 = vmatmul.msk.f32.gmra.mxu0 %vm494_vm3, %v6543_v6  ;;  %4642 = vmatpush.msrb.mxu2 %v4603_v25  ;;  %v4602_v6 = vld [vmem:[%s7164_s20] sm:$0xff] }
0x1cf1   :  { %4643 = vmatpush.msrb.mxu2 %v4602_v6 }
0x1cf6   :  { %5000 = vmatmul.msk.f32.gmra.mxu2 %vm494_vm3, %v4293_v13  ;;  %5022 = vmatmul.msk.f32.gmra.mxu3 %vm494_vm3, %v6935_v48 }
0x1cfe   :  { %5023 = vmatmul.msk.f32.gmra.mxu3 %vm494_vm3, %v6955_v36 }
0x1d06   :  { %5024 = vmatmul.msk.f32.gmra.mxu3 %vm494_vm3, %v6959_v27 }
0x1d19   :  { %v4323_v2 = vpop.f32.mrf.mxu0 }
0x1d1f   :  { %v4358_v40 = vpop.f32.mrf.mxu3 }
0x1d21   :  { %v4326_v56 = vpop.f32.mrf.mxu0 }
0x1d27   :  { %v4361_v7 = vpop.f32.mrf.mxu3 }
0x1d2b   :  { %v4329_v20 = vpop.f32.mrf.mxu0 }
0x1d31   :  { %v4364_v5 = vpop.f32.mrf.mxu3 }
0x1d32   :  { %v4378_v16 = vadd.f32 %v4364_v5, %v4323_v2 }
0x1d34   :  { %v4476_v43 = vpop.f32.mrf.mxu0 }
0x1d35   :  { %v4543_v49 = vadd.f32 %v4519_v31, %v4476_v43 }
0x1d39   :  { %v4332_v51 = vpop.f32.mrf.mxu2  ;;  %v4367_v17 = vpop.f32.mrf.mxu3 }
0x1d3a   :  { %v4379_v47 = vadd.f32 %v4367_v17, %v4326_v56 }
0x1d3c   :  { %v4479_v29 = vpop.f32.mrf.mxu0 }
0x1d3d   :  { %v4544_v44 = vadd.f32 %v4522_v32, %v4479_v29 }
0x1d41   :  { %v4405_v37 = vpop.f32.mrf.mxu2  ;;  %v4370_v28 = vpop.f32.mrf.mxu3 }
0x1d42   :  { %v4441_v48 = vadd.f32 %v5072_v59, %v4405_v37  ;;  %v4380_v63 = vadd.f32 %v4370_v28, %v4329_v20  ;;  %v4528_v37 = vpop.f32.mrf.mxu1 }
0x1d44   :  { %v4449_v10 = vmax.f32 %v4441_v48, 0.0  ;;  %v4482_v33 = vpop.f32.mrf.mxu0 }
0x1d46   :  { %5025 = vmatmul.msk.f32.vlgmr.msrb.gmra.mxu2 %vm494_vm3, %v4449_v10  ;;  %v4545_v10 = vadd.f32 %v4525_v30, %v4482_v33 }
0x1d49   :  { %v4408_v36 = vpop.f32.mrf.mxu2  ;;  %v4373_v54 = vpop.f32.mrf.mxu3 }
0x1d4a   :  { %v4442_v27 = vadd.f32 %v5072_v59, %v4408_v36  ;;  %v4381_v61 = vadd.f32 %v4373_v54, %v4332_v51 }
0x1d4c   :  { %v4450_v12 = vmax.f32 %v4442_v27, 0.0 }
0x1d4e   :  { %5026 = vmatmul.msk.f32.gmra.mxu2 %vm494_vm3, %v4450_v12 }
0x1d51   :  { %v4411_v34 = vpop.f32.mrf.mxu2  ;;  %v4570_v45 = vpop.f32.mrf.mxu3 }
0x1d52   :  { %v4431_v24 = vadd.f32 %v4411_v34, %v4358_v40  ;;  %v4594_v3 = vadd.f32 %v4570_v45, %v4543_v49  ;;  %v4531_v34 = vpop.f32.mrf.mxu1 }
0x1d54   :  { %v4443_v8 = vadd.f32 %v5072_v59, %v4431_v24 }
0x1d56   :  { %v4451_v22 = vmax.f32 %v4443_v8, 0.0 }
0x1d58   :  { %5027 = vmatmul.msk.f32.gmra.mxu2 %vm494_vm3, %v4451_v22 }
0x1d59   :  { %v4414_v57 = vpop.f32.mrf.mxu2  ;;  %v4573_v58 = vpop.f32.mrf.mxu3 }
0x1d5a   :  { %v4432_v53 = vadd.f32 %v4414_v57, %v4361_v7  ;;  %v4595_v13 = vadd.f32 %v4573_v58, %v4544_v44 }
0x1d5c   :  { %v4444_v0 = vadd.f32 %v5072_v59, %v4432_v53 }
0x1d5e   :  { %v4452_v19 = vmax.f32 %v4444_v0, 0.0 }
0x1d60   :  { %5028 = vmatmul.msk.f32.gmra.mxu2 %vm494_vm3, %v4452_v19  ;;  %v4534_v19 = vpop.f32.mrf.mxu1 }
0x1d61   :  { %v4417_v52 = vpop.f32.mrf.mxu2  ;;  %v4576_v26 = vpop.f32.mrf.mxu3 }
0x1d62   :  { %v4433_v18 = vadd.f32 %v4417_v52, %v4378_v16  ;;  %v4596_v40 = vadd.f32 %v4576_v26, %v4545_v10 }
0x1d64   :  { %v4445_v4 = vadd.f32 %v5072_v59, %v4433_v18 }
0x1d66   :  { %v4453_v1 = vmax.f32 %v4445_v4, 0.0 }
0x1d68   :  { %5029 = vmatmul.msk.f32.gmra.mxu2 %vm494_vm3, %v4453_v1  ;;  %v4537_v28 = vpop.f32.mrf.mxu1 }
0x1d69   :  { %v4420_v35 = vpop.f32.mrf.mxu2  ;;  %v4579_v48 = vpop.f32.mrf.mxu3 }
0x1d6a   :  { %v4434_v11 = vadd.f32 %v4420_v35, %v4379_v47 }
0x1d6c   :  { %v4446_v50 = vadd.f32 %v5072_v59, %v4434_v11 }
0x1d6e   :  { %v4454_v55 = vmax.f32 %v4446_v50, 0.0 }
0x1d70   :  { %5030 = vmatmul.msk.f32.gmra.mxu2 %vm494_vm3, %v4454_v55 }
0x1d71   :  { %v4423_v23 = vpop.f32.mrf.mxu2  ;;  %v4582_v8 = vpop.f32.mrf.mxu3 }
0x1d72   :  { %v4435_v9 = vadd.f32 %v4423_v23, %v4380_v63 }
0x1d74   :  { %v4447_v60 = vadd.f32 %v5072_v59, %v4435_v9 }
0x1d76   :  { %v4455_v15 = vmax.f32 %v4447_v60, 0.0 }
0x1d78   :  { %5031 = vmatmul.msk.f32.gmra.mxu2 %vm494_vm3, %v4455_v15  ;;  %v4540_v15 = vpop.f32.mrf.mxu1 }
0x1d79   :  { %v4426_v46 = vpop.f32.mrf.mxu2  ;;  %v4585_v17 = vpop.f32.mrf.mxu3 }
0x1d7a   :  { %v4436_v42 = vadd.f32 %v4426_v46, %v4381_v61 }
0x1d7c   :  { %v4448_v14 = vadd.f32 %v5072_v59, %v4436_v42  ;;  %v4485_v59 = vpop.f32.mrf.mxu0 }
0x1d7d   :  { %v4546_v24 = vadd.f32 %v4528_v37, %v4485_v59 }
0x1d7e   :  { %v4456_v21 = vmax.f32 %v4448_v14, 0.0 }
0x1d7f   :  { %v4597_v22 = vadd.f32 %v4579_v48, %v4546_v24 }
0x1d80   :  { %5032 = vmatmul.msk.f32.gmra.mxu2 %vm494_vm3, %v4456_v21 }
0x1d81   :  { %v4588_v50 = vpop.f32.mrf.mxu3 }
0x1d84   :  { %v4488_v7 = vpop.f32.mrf.mxu0 }
0x1d85   :  { %v4547_v0 = vadd.f32 %v4531_v34, %v4488_v7 }
0x1d87   :  { %v4598_v16 = vadd.f32 %v4582_v8, %v4547_v0 }
0x1d89   :  { %v4591_v61 = vpop.f32.mrf.mxu3 }
0x1d8c   :  { %v4491_v2 = vpop.f32.mrf.mxu0 }
0x1d8d   :  { %v4548_v1 = vadd.f32 %v4534_v19, %v4491_v2 }
0x1d8f   :  { %v4599_v56 = vadd.f32 %v4585_v17, %v4548_v1 }
0x1d94   :  { %v4494_v47 = vpop.f32.mrf.mxu0 }
0x1d95   :  { %v4549_v20 = vadd.f32 %v4537_v28, %v4494_v47 }
0x1d97   :  { %v4600_v63 = vadd.f32 %v4588_v50, %v4549_v20 }
0x1d9c   :  { %v4497_v60 = vpop.f32.mrf.mxu0 }
0x1d9d   :  { %v4550_v46 = vadd.f32 %v4540_v15, %v4497_v60 }
0x1d9f   :  { %v4601_v42 = vadd.f32 %v4591_v61, %v4550_v46 }
0x1dc9   :  { %v4645_v41 = vpop.f32.mrf.mxu2 }
0x1dca   :  { %v4669_v62 = vadd.f32 %v4645_v41, %v4594_v3 }
0x1dcc   :  { %v4681_v38 = vadd.f32 %v7102_v39, %v4669_v62 }
0x1dce   :  { %4689 = vst.msk [vmem:[%s7194_s4] sm:$0xff] %vm234_vm1, %v4681_v38 }
0x1dd1   :  { %v4648_v25 = vpop.f32.mrf.mxu2 }
0x1dd2   :  { %v4670_v6 = vadd.f32 %v4648_v25, %v4595_v13 }
0x1dd4   :  { %v4682_v51 = vadd.f32 %v7102_v39, %v4670_v6 }
0x1dd6   :  { %4690 = vst.msk [vmem:[%s7194_s4 + $0x8] sm:$0xff] %vm234_vm1, %v4682_v51 }
0x1ddb   :  { %v4651_v36 = vpop.f32.mrf.mxu2 }
0x1ddc   :  { %v4671_v27 = vadd.f32 %v4651_v36, %v4596_v40 }
0x1dde   :  { %v4683_v12 = vadd.f32 %v7102_v39, %v4671_v27 }
0x1de0   :  { %4691 = vst.msk [vmem:[%s7194_s4 + $0x10] sm:$0xff] %vm234_vm1, %v4683_v12 }
0x1de3   :  { %v4654_v5 = vpop.f32.mrf.mxu2 }
0x1de4   :  { %v4672_v57 = vadd.f32 %v4654_v5, %v4597_v22 }
0x1de6   :  { %v4684_v53 = vadd.f32 %v7102_v39, %v4672_v57 }
0x1de8   :  { %4692 = vst.msk [vmem:[%s7194_s4 + $0x18] sm:$0xff] %vm234_vm1, %v4684_v53 }
0x1deb   :  { %v4657_v52 = vpop.f32.mrf.mxu2 }
0x1dec   :  { %v4673_v18 = vadd.f32 %v4657_v52, %v4598_v16 }
0x1dee   :  { %v4685_v4 = vadd.f32 %v7102_v39, %v4673_v18 }
0x1df0   :  { %4693 = vst.msk [vmem:[%s7194_s4 + $0x20] sm:$0xff] %vm234_vm1, %v4685_v4 }
0x1df3   :  { %v4660_v35 = vpop.f32.mrf.mxu2 }
0x1df4   :  { %v4674_v11 = vadd.f32 %v4660_v35, %v4599_v56 }
0x1df6   :  { %v4686_v55 = vadd.f32 %v7102_v39, %v4674_v11 }
0x1df8   :  { %4694 = vst.msk [vmem:[%s7194_s4 + $0x28] sm:$0xff] %vm234_vm1, %v4686_v55 }
0x1dfb   :  { %v4663_v23 = vpop.f32.mrf.mxu2 }
0x1dfc   :  { %v4675_v9 = vadd.f32 %v4663_v23, %v4600_v63 }
0x1dfe   :  { %v4687_v54 = vadd.f32 %v7102_v39, %v4675_v9 }
0x1e00   :  { %4695 = vst.msk [vmem:[%s7194_s4 + $0x30] sm:$0xff] %vm234_vm1, %v4687_v54 }
0x1e03   :  { %v4666_v14 = vpop.f32.mrf.mxu2 }
0x1e04   :  { %v4676_v21 = vadd.f32 %v4666_v14, %v4601_v42 }
0x1e06   :  { %v4688_v43 = vadd.f32 %v7102_v39, %v4676_v21 }
0x1e08   :  { %4696 = vst.msk [vmem:[%s7194_s4 + $0x38] sm:$0xff] %vm234_vm1, %v4688_v43 }
0x1e09   :  { %5656 = dma.done.wait [#allocation6], 1024  }
0x1e0a   :  { %5657 = vsyncadd [#allocation6], 4294966272 }
0x1e0b   :  { %5658 = dma.done.wait [#allocation23], 1024  }
0x1e0c   :  { %5659 = vsyncadd [#allocation23], 4294966272 }
0x1e0d   :  { %4735 = vsyncpa [#allocation5], 1 }
0x1e0e   :  { %4736 = vsyncpa [#allocation8], 1 }
0x1e0f   :  { %4737 = vsyncpa [#allocation11], 1 }
0x1e10   :  { %4738 = vsyncpa [#allocation14], 1 }
0x1e11   :  { %4739 = vsyncpa [#allocation17], 1 }
0x1e12   :  { %4740 = vsyncpa [#allocation20], 1 }
0x1e13   :  { %4741 = vsyncpa [#allocation6], 1 }
0x1e14   :  { %4742 = vsyncpa [#allocation23], 1 }

</bundles_post_ra>
